<compile_context>
chip_gen: v5e
topology: v5e:2x2
jax: 0.10.0
libtpu: 0.0.40
codegen_flags: <defaults>
</compile_context>

<pallas_src>
import functools

import jax
import jax.numpy as jnp
from jax import lax
from jax.experimental import pallas as pl
from jax.experimental.pallas import tpu as pltpu

# ----------------------------- config ---------------------------------------
CFG = dict(
    image_size=16,
    patch_size=8,
    in_chans=3,
    hidden=32,      # token dim D
    heads=4,        # head dim = 8
    layers=2,
    mlp=64,
    rep_dim=1000,   # torchvision ViT head -> 1000 ImageNet classes
    num_class=10,
    eps=1e-6,
)
MLP_PAD = 128       # mlp hidden padded to a lane-dense 128 (zero-padded, exact)
REP_PAD = 1024      # rep_dim padded to a lane-dense multiple of 128
CLS_PAD = 128       # num_class padded to a lane-dense multiple of 128

_COMPILER_PARAMS = pltpu.CompilerParams(dimension_semantics=("arbitrary",))


def _spec(shape):
    """Whole-array VMEM block for a grid=(1,) call."""
    zeros = (0,) * len(shape)
    return pl.BlockSpec(shape, lambda i, _z=zeros: _z)


# ------------------------- the single fused kernel ---------------------------
def _vit_kernel(patch_ref, bias_ref, wp_ref,
                ln1g_ref, ln1b_ref, wqkv_ref, bqkv_ref, wo_ref, bo_ref,
                ln2g_ref, ln2b_ref, w1_ref, b1_ref, w2_ref, b2_ref,
                lng_ref, lnb_ref, hw_ref, hb_ref, cw_ref, cb_ref,
                o_ref, *, layers, heads, seq, batch, eps, scale):
    """Full ViT forward on a VMEM-resident (B*S, D) token slab."""
    f32 = jnp.float32
    BS = batch * seq
    D = wp_ref.shape[1]
    Dh = D // heads

    # ---- patch embed + class token + positional embedding -------------------
    # patch_ref has a zero row at every class-token position, and bias_ref
    # carries (cls_tok + pos[0]) on class rows / (conv_b + pos[1:]) on patch
    # rows, so one dense matmul + add yields the token slab (B*S, D).
    x = (jnp.dot(patch_ref[...], wp_ref[...], preferred_element_type=f32)
         + bias_ref[...])

    # ---- additive block-diagonal attention bias (built in-kernel, no DMA) ---
    r = lax.broadcasted_iota(jnp.int32, (BS, BS), 0)
    c = lax.broadcasted_iota(jnp.int32, (BS, BS), 1)
    same = None
    for b in range(batch):
        in_r = (r >= b * seq) & (r < (b + 1) * seq)
        in_c = (c >= b * seq) & (c < (b + 1) * seq)
        blk = in_r & in_c
        same = blk if same is None else (same | blk)
    attn_bias = jnp.where(same, 0.0, -1e30).astype(f32)   # applied BEFORE max

    def layer_norm(v, g, b):
        mu = jnp.mean(v, axis=-1, keepdims=True)
        vc = v - mu
        var = jnp.mean(vc * vc, axis=-1, keepdims=True)
        return vc * lax.rsqrt(var + eps) * g + b

    # ---- encoder layers (fully unrolled, weights indexed on leading axis) ---
    for l in range(layers):
        # multi-head self-attention (fused QKV, fused out-proj)
        y = layer_norm(x, ln1g_ref[l], ln1b_ref[l])
        qkv = (jnp.dot(y, wqkv_ref[l], preferred_element_type=f32)
               + bqkv_ref[l])                                   # (BS, 3D)
        ctx_parts = []
        for h in range(heads):
            q = qkv[:, h * Dh:(h + 1) * Dh]
            k = qkv[:, D + h * Dh:D + (h + 1) * Dh]
            v = qkv[:, 2 * D + h * Dh:2 * D + (h + 1) * Dh]
            s = jnp.dot(q, k.T, preferred_element_type=f32) * scale + attn_bias
            s = s - jnp.max(s, axis=-1, keepdims=True)
            p = jnp.exp(s)
            p = p * pl.reciprocal(jnp.sum(p, axis=-1, keepdims=True),
                                  approx=True)
            ctx_parts.append(jnp.dot(p, v, preferred_element_type=f32))
        ctx = jnp.concatenate(ctx_parts, axis=-1)               # (BS, D)
        attn = jnp.dot(ctx, wo_ref[l], preferred_element_type=f32) + bo_ref[l]
        x = x + attn

        # pre-LN MLP (Linear -> GELU -> Linear); hidden lane-padded to 128
        y = layer_norm(x, ln2g_ref[l], ln2b_ref[l])
        h1 = jnp.dot(y, w1_ref[l], preferred_element_type=f32) + b1_ref[l]
        # TODO(synk): torch nn.GELU() is the exact erf GELU; tanh approximation
        # is used here for robust Mosaic lowering.
        h1 = jax.nn.gelu(h1, approximate=True)
        x = x + jnp.dot(h1, w2_ref[l], preferred_element_type=f32) + b2_ref[l]

    # ---- head: final LN + rep head + classifier on class-token rows only ----
    cls_x = jnp.concatenate(
        [x[b * seq:b * seq + 1, :] for b in range(batch)], axis=0)   # (B, D)
    y = layer_norm(cls_x, lng_ref[...], lnb_ref[...])
    rep = (jnp.dot(y.astype(jnp.bfloat16), hw_ref[...],
                   preferred_element_type=f32) + hb_ref[...])        # (B, 1024)
    logits = (jnp.dot(rep.astype(jnp.bfloat16), cw_ref[...],
                      preferred_element_type=f32) + cb_ref[...])     # (B, 128)
    o_ref[...] = logits.astype(o_ref.dtype)                          # one dense store


# ------------------------- pallas_call wrapper --------------------------------
def vit_fused(patches, bias_slab, params, batch, seq):
    D = CFG["hidden"]
    Dh = D // CFG["heads"]
    kern = functools.partial(
        _vit_kernel, layers=CFG["layers"], heads=CFG["heads"],
        seq=seq, batch=batch, eps=CFG["eps"], scale=1.0 / (Dh ** 0.5))
    args = (patches, bias_slab, params["w_patch"],
            params["ln1_g"], params["ln1_b"],
            params["w_qkv"], params["b_qkv"],
            params["w_o"], params["b_o"],
            params["ln2_g"], params["ln2_b"],
            params["w1"], params["b1"], params["w2"], params["b2"],
            params["ln_g"], params["ln_b"],
            params["head_w"], params["head_b"],
            params["cls_w"], params["cls_b"])
    return pl.pallas_call(
        kern,
        out_shape=jax.ShapeDtypeStruct((batch, CLS_PAD), jnp.float32),
        grid=(1,),
        in_specs=[_spec(a.shape) for a in args],
        out_specs=_spec((batch, CLS_PAD)),
        compiler_params=_COMPILER_PARAMS,
    )(*args)


# --------------------------- parameters --------------------------------------
def init_params(key):
    """Weights stored pre-transposed / pre-fused / lane-padded at init time:
    every in-kernel matmul is x @ W with W:(K, N); per-layer weights are
    stacked on a leading layer axis; padded rows/cols are zero so padded
    results are exact."""
    D, P, C = CFG["hidden"], CFG["patch_size"], CFG["in_chans"]
    Hh, M, L = CFG["heads"], CFG["mlp"], CFG["layers"]
    n_patch = (CFG["image_size"] // P) ** 2
    seq = n_patch + 1
    keys = iter(jax.random.split(key, 64))

    def nrm(shape, s=0.02):
        return s * jax.random.normal(next(keys), shape, jnp.float32)

    # Lane-dense padded head/classifier weights (stored bf16 to halve DMA and
    # use the bf16 MXU path); biases stay f32.
    head_w = (jnp.zeros((D, REP_PAD), jnp.float32)
              .at[:, :CFG["rep_dim"]].set(nrm((D, CFG["rep_dim"])))
              .astype(jnp.bfloat16))
    head_b = jnp.zeros((1, REP_PAD), jnp.float32).at[:, :CFG["rep_dim"]].set(
        nrm((1, CFG["rep_dim"])))
    cls_w = (jnp.zeros((REP_PAD, CLS_PAD), jnp.float32)
             .at[:CFG["rep_dim"], :CFG["num_class"]].set(
                 nrm((CFG["rep_dim"], CFG["num_class"])))
             .astype(jnp.bfloat16))
    cls_b = jnp.zeros((1, CLS_PAD), jnp.float32).at[:, :CFG["num_class"]].set(
        nrm((1, CFG["num_class"])))

    # MLP padded 64 -> 128 lanes with zeros (exact: gelu(0)=0, zero w2 rows).
    w1 = jnp.zeros((L, D, MLP_PAD), jnp.float32).at[:, :, :M].set(nrm((L, D, M)))
    b1 = jnp.zeros((L, 1, MLP_PAD), jnp.float32).at[:, :, :M].set(nrm((L, 1, M)))
    w2 = jnp.zeros((L, MLP_PAD, D), jnp.float32).at[:, :M, :].set(nrm((L, M, D)))

    params = dict(
        w_patch=nrm((C * P * P, D)),          # Conv2d(C, D, P, stride=P) as matmul
        conv_b=nrm((1, D)),
        class_token=nrm((1, D)),
        pos_embed=nrm((seq, D)),
        ln_g=jnp.ones((1, D), jnp.float32),
        ln_b=jnp.zeros((1, D), jnp.float32),
        head_w=head_w, head_b=head_b, cls_w=cls_w, cls_b=cls_b,
        # stacked per-layer encoder weights
        ln1_g=jnp.ones((L, 1, D), jnp.float32),
        ln1_b=jnp.zeros((L, 1, D), jnp.float32),
        w_qkv=nrm((L, D, 3 * D)),             # fused QKV (head-major columns)
        b_qkv=nrm((L, 1, 3 * D)),
        w_o=nrm((L, D, D)), b_o=nrm((L, 1, D)),
        ln2_g=jnp.ones((L, 1, D), jnp.float32),
        ln2_b=jnp.zeros((L, 1, D), jnp.float32),
        w1=w1, b1=b1, w2=w2, b2=nrm((L, 1, D)),
    )
    return params


# ----------------------------- forward ----------------------------------------
def vision_transformer_forward(params, images):
    """images: NCHW float32 -> logits (B, num_class)."""
    B, C, H, W = images.shape
    P = CFG["patch_size"]
    gh, gw = H // P, W // P
    n_patch = gh * gw
    S = n_patch + 1
    CPP = C * P * P

    # Patch extraction (im2col for Conv2d(C, D, kernel=P, stride=P)); the
    # (c, i, j) flatten order matches the conv-weight layout used at init.
    patches = images.reshape(B, C, gh, P, gw, P)
    patches = patches.transpose(0, 2, 4, 1, 3, 5).reshape(B, n_patch, CPP)
    # Insert a zero "patch" row at each class-token position so the kernel can
    # produce the full (B*S, D) token slab with one dense matmul (no scatter).
    patches = jnp.concatenate(
        [jnp.zeros((B, 1, CPP), patches.dtype), patches], axis=1
    ).reshape(B * S, CPP)

    # Pre-tiled additive slab: class rows get (cls_tok + pos[0]); patch rows
    # get (conv_bias + pos[1:]).  (dropout is a no-op in eval)
    add_img = jnp.concatenate(
        [params["class_token"] + params["pos_embed"][0:1, :],
         params["conv_b"] + params["pos_embed"][1:, :]], axis=0)     # (S, D)
    bias_slab = jnp.tile(add_img, (B, 1))                            # (B*S, D)

    # Single fused Pallas kernel: embed + encoder layers + LN + head + classifier.
    logits = vit_fused(patches, bias_slab, params, B, S)
    return logits[:, :CFG["num_class"]]


# ------------------------------- main ------------------------------------------
if __name__ == "__main__":
    key = jax.random.PRNGKey(0)
    k_param, k_img = jax.random.split(key)
    params = init_params(k_param)
    images = jax.random.normal(
        k_img, (2, CFG["in_chans"], CFG["image_size"], CFG["image_size"]),
        jnp.float32)

    fwd = jax.jit(vision_transformer_forward)
    logits = fwd(params, images)
    jax.block_until_ready(logits)

    assert logits.shape == (2, CFG["num_class"])
    assert bool(jnp.all(jnp.isfinite(logits)))
    print("KERNEL_OK")
</pallas_src>

<mosaic_0001>
module attributes {stable_mosaic.version = 11 : i64} {
  func.func @_vit_kernel(%arg0: i32, %arg1: memref<10x192xf32, #tpu.memory_space<vmem>>, %arg2: memref<10x32xf32, #tpu.memory_space<vmem>>, %arg3: memref<192x32xf32, #tpu.memory_space<vmem>>, %arg4: memref<2x1x32xf32, #tpu.memory_space<vmem>>, %arg5: memref<2x1x32xf32, #tpu.memory_space<vmem>>, %arg6: memref<2x32x96xf32, #tpu.memory_space<vmem>>, %arg7: memref<2x1x96xf32, #tpu.memory_space<vmem>>, %arg8: memref<2x32x32xf32, #tpu.memory_space<vmem>>, %arg9: memref<2x1x32xf32, #tpu.memory_space<vmem>>, %arg10: memref<2x1x32xf32, #tpu.memory_space<vmem>>, %arg11: memref<2x1x32xf32, #tpu.memory_space<vmem>>, %arg12: memref<2x32x128xf32, #tpu.memory_space<vmem>>, %arg13: memref<2x1x128xf32, #tpu.memory_space<vmem>>, %arg14: memref<2x128x32xf32, #tpu.memory_space<vmem>>, %arg15: memref<2x1x32xf32, #tpu.memory_space<vmem>>, %arg16: memref<1x32xf32, #tpu.memory_space<vmem>>, %arg17: memref<1x32xf32, #tpu.memory_space<vmem>>, %arg18: memref<32x1024xbf16, #tpu.memory_space<vmem>>, %arg19: memref<1x1024xf32, #tpu.memory_space<vmem>>, %arg20: memref<1024x128xbf16, #tpu.memory_space<vmem>>, %arg21: memref<1x128xf32, #tpu.memory_space<vmem>>, %arg22: memref<2x128xf32, #tpu.memory_space<vmem>>) attributes {dimension_semantics = [#tpu.dimension_semantics<arbitrary>], iteration_bounds = array<i64: 1>, scalar_prefetch = 0 : i64, scratch_operands = 0 : i64, tpu.core_type = #tpu.core_type<tc>, window_params = [{pipeline_mode = #tpu.pipeline_mode<synchronous>, transform_indices = @transform_0, window_bounds = array<i64: 10, 192>}, {pipeline_mode = #tpu.pipeline_mode<synchronous>, transform_indices = @transform_1, window_bounds = array<i64: 10, 32>}, {pipeline_mode = #tpu.pipeline_mode<synchronous>, transform_indices = @transform_2, window_bounds = array<i64: 192, 32>}, {pipeline_mode = #tpu.pipeline_mode<synchronous>, transform_indices = @transform_3, window_bounds = array<i64: 2, 1, 32>}, {pipeline_mode = #tpu.pipeline_mode<synchronous>, transform_indices = @transform_4, window_bounds = array<i64: 2, 1, 32>}, {pipeline_mode = #tpu.pipeline_mode<synchronous>, transform_indices = @transform_5, window_bounds = array<i64: 2, 32, 96>}, {pipeline_mode = #tpu.pipeline_mode<synchronous>, transform_indices = @transform_6, window_bounds = array<i64: 2, 1, 96>}, {pipeline_mode = #tpu.pipeline_mode<synchronous>, transform_indices = @transform_7, window_bounds = array<i64: 2, 32, 32>}, {pipeline_mode = #tpu.pipeline_mode<synchronous>, transform_indices = @transform_8, window_bounds = array<i64: 2, 1, 32>}, {pipeline_mode = #tpu.pipeline_mode<synchronous>, transform_indices = @transform_9, window_bounds = array<i64: 2, 1, 32>}, {pipeline_mode = #tpu.pipeline_mode<synchronous>, transform_indices = @transform_10, window_bounds = array<i64: 2, 1, 32>}, {pipeline_mode = #tpu.pipeline_mode<synchronous>, transform_indices = @transform_11, window_bounds = array<i64: 2, 32, 128>}, {pipeline_mode = #tpu.pipeline_mode<synchronous>, transform_indices = @transform_12, window_bounds = array<i64: 2, 1, 128>}, {pipeline_mode = #tpu.pipeline_mode<synchronous>, transform_indices = @transform_13, window_bounds = array<i64: 2, 128, 32>}, {pipeline_mode = #tpu.pipeline_mode<synchronous>, transform_indices = @transform_14, window_bounds = array<i64: 2, 1, 32>}, {pipeline_mode = #tpu.pipeline_mode<synchronous>, transform_indices = @transform_15, window_bounds = array<i64: 1, 32>}, {pipeline_mode = #tpu.pipeline_mode<synchronous>, transform_indices = @transform_16, window_bounds = array<i64: 1, 32>}, {pipeline_mode = #tpu.pipeline_mode<synchronous>, transform_indices = @transform_17, window_bounds = array<i64: 32, 1024>}, {pipeline_mode = #tpu.pipeline_mode<synchronous>, transform_indices = @transform_18, window_bounds = array<i64: 1, 1024>}, {pipeline_mode = #tpu.pipeline_mode<synchronous>, transform_indices = @transform_19, window_bounds = array<i64: 1024, 128>}, {pipeline_mode = #tpu.pipeline_mode<synchronous>, transform_indices = @transform_20, window_bounds = array<i64: 1, 128>}, {pipeline_mode = #tpu.pipeline_mode<synchronous>, transform_indices = @transform_21, window_bounds = array<i64: 2, 128>}]} {
    %c0 = arith.constant 0 : index
    %c0_0 = arith.constant 0 : index
    %0 = vector.load %arg1[%c0, %c0_0] : memref<10x192xf32, #tpu.memory_space<vmem>>, vector<10x192xf32>
    %c0_1 = arith.constant 0 : index
    %c0_2 = arith.constant 0 : index
    %1 = vector.load %arg3[%c0_1, %c0_2] : memref<192x32xf32, #tpu.memory_space<vmem>>, vector<192x32xf32>
    %cst = arith.constant dense<0.000000e+00> : vector<10x32xf32>
    %2 = tpu.matmul %0, %1, %cst {dimension_numbers = #tpu.dot_dimension_numbers<[1], [0], [0], [1], [0, 0, 1, 1], [], []>} : vector<10x192xf32>, vector<192x32xf32>, vector<10x32xf32> -> vector<10x32xf32>
    %c0_3 = arith.constant 0 : index
    %c0_4 = arith.constant 0 : index
    %3 = vector.load %arg2[%c0_3, %c0_4] : memref<10x32xf32, #tpu.memory_space<vmem>>, vector<10x32xf32>
    %4 = arith.addf %2, %3 : vector<10x32xf32>
    %5 = tpu.iota {dimensions = array<i32: 0>} : vector<10x10xi32>
    %6 = tpu.iota {dimensions = array<i32: 1>} : vector<10x10xi32>
    %c0_i32 = arith.constant 0 : i32
    %7 = vector.broadcast %c0_i32 : i32 to vector<10x10xi32>
    %8 = arith.cmpi sge, %5, %7 : vector<10x10xi32>
    %c5_i32 = arith.constant 5 : i32
    %9 = vector.broadcast %c5_i32 : i32 to vector<10x10xi32>
    %10 = arith.cmpi slt, %5, %9 : vector<10x10xi32>
    %11 = arith.andi %8, %10 : vector<10x10xi1>
    %c0_i32_5 = arith.constant 0 : i32
    %12 = vector.broadcast %c0_i32_5 : i32 to vector<10x10xi32>
    %13 = arith.cmpi sge, %6, %12 : vector<10x10xi32>
    %c5_i32_6 = arith.constant 5 : i32
    %14 = vector.broadcast %c5_i32_6 : i32 to vector<10x10xi32>
    %15 = arith.cmpi slt, %6, %14 : vector<10x10xi32>
    %16 = arith.andi %13, %15 : vector<10x10xi1>
    %17 = arith.andi %11, %16 : vector<10x10xi1>
    %c5_i32_7 = arith.constant 5 : i32
    %18 = vector.broadcast %c5_i32_7 : i32 to vector<10x10xi32>
    %19 = arith.cmpi sge, %5, %18 : vector<10x10xi32>
    %c10_i32 = arith.constant 10 : i32
    %20 = vector.broadcast %c10_i32 : i32 to vector<10x10xi32>
    %21 = arith.cmpi slt, %5, %20 : vector<10x10xi32>
    %22 = arith.andi %19, %21 : vector<10x10xi1>
    %c5_i32_8 = arith.constant 5 : i32
    %23 = vector.broadcast %c5_i32_8 : i32 to vector<10x10xi32>
    %24 = arith.cmpi sge, %6, %23 : vector<10x10xi32>
    %c10_i32_9 = arith.constant 10 : i32
    %25 = vector.broadcast %c10_i32_9 : i32 to vector<10x10xi32>
    %26 = arith.cmpi slt, %6, %25 : vector<10x10xi32>
    %27 = arith.andi %24, %26 : vector<10x10xi1>
    %28 = arith.andi %22, %27 : vector<10x10xi1>
    %29 = arith.ori %17, %28 : vector<10x10xi1>
    %cst_10 = arith.constant 0.000000e+00 : f32
    %cst_11 = arith.constant -1.000000e+30 : f32
    %30 = vector.broadcast %cst_10 : f32 to vector<10x10xf32>
    %31 = vector.broadcast %cst_11 : f32 to vector<10x10xf32>
    %32 = arith.select %29, %30, %31 : vector<10x10xi1>, vector<10x10xf32>
    %c0_12 = arith.constant 0 : index
    %c0_13 = arith.constant 0 : index
    %c0_14 = arith.constant 0 : index
    %33 = vector.load %arg4[%c0_12, %c0_13, %c0_14] : memref<2x1x32xf32, #tpu.memory_space<vmem>>, vector<1x1x32xf32>
    %34 = vector.shape_cast %33 : vector<1x1x32xf32> to vector<1x32xf32>
    %c0_15 = arith.constant 0 : index
    %c0_16 = arith.constant 0 : index
    %c0_17 = arith.constant 0 : index
    %35 = vector.load %arg5[%c0_15, %c0_16, %c0_17] : memref<2x1x32xf32, #tpu.memory_space<vmem>>, vector<1x1x32xf32>
    %36 = vector.shape_cast %35 : vector<1x1x32xf32> to vector<1x32xf32>
    %cst_18 = arith.constant dense<0.000000e+00> : vector<10xf32>
    %37 = vector.multi_reduction <add>, %4, %cst_18 [1] : vector<10x32xf32> to vector<10xf32>
    %38 = vector.shape_cast %37 : vector<10xf32> to vector<10x1xf32>
    %cst_19 = arith.constant 3.200000e+01 : f32
    %39 = vector.broadcast %cst_19 : f32 to vector<10x1xf32>
    %40 = arith.divf %38, %39 : vector<10x1xf32>
    %41 = vector.broadcast %40 : vector<10x1xf32> to vector<10x32xf32>
    %42 = arith.subf %4, %41 : vector<10x32xf32>
    %43 = arith.mulf %42, %42 : vector<10x32xf32>
    %cst_20 = arith.constant dense<0.000000e+00> : vector<10xf32>
    %44 = vector.multi_reduction <add>, %43, %cst_20 [1] : vector<10x32xf32> to vector<10xf32>
    %45 = vector.shape_cast %44 : vector<10xf32> to vector<10x1xf32>
    %cst_21 = arith.constant 3.200000e+01 : f32
    %46 = vector.broadcast %cst_21 : f32 to vector<10x1xf32>
    %47 = arith.divf %45, %46 : vector<10x1xf32>
    %cst_22 = arith.constant 9.99999997E-7 : f32
    %48 = vector.broadcast %cst_22 : f32 to vector<10x1xf32>
    %49 = arith.addf %47, %48 : vector<10x1xf32>
    %50 = math.rsqrt %49 : vector<10x1xf32>
    %51 = vector.broadcast %50 : vector<10x1xf32> to vector<10x32xf32>
    %52 = arith.mulf %42, %51 : vector<10x32xf32>
    %53 = vector.broadcast %34 : vector<1x32xf32> to vector<10x32xf32>
    %54 = arith.mulf %52, %53 : vector<10x32xf32>
    %55 = vector.broadcast %36 : vector<1x32xf32> to vector<10x32xf32>
    %56 = arith.addf %54, %55 : vector<10x32xf32>
    %c0_23 = arith.constant 0 : index
    %c0_24 = arith.constant 0 : index
    %c0_25 = arith.constant 0 : index
    %57 = vector.load %arg6[%c0_23, %c0_24, %c0_25] : memref<2x32x96xf32, #tpu.memory_space<vmem>>, vector<1x32x96xf32>
    %58 = vector.shape_cast %57 : vector<1x32x96xf32> to vector<32x96xf32>
    %cst_26 = arith.constant dense<0.000000e+00> : vector<10x96xf32>
    %59 = tpu.matmul %56, %58, %cst_26 {dimension_numbers = #tpu.dot_dimension_numbers<[1], [0], [0], [1], [0, 0, 1, 1], [], []>} : vector<10x32xf32>, vector<32x96xf32>, vector<10x96xf32> -> vector<10x96xf32>
    %c0_27 = arith.constant 0 : index
    %c0_28 = arith.constant 0 : index
    %c0_29 = arith.constant 0 : index
    %60 = vector.load %arg7[%c0_27, %c0_28, %c0_29] : memref<2x1x96xf32, #tpu.memory_space<vmem>>, vector<1x1x96xf32>
    %61 = vector.shape_cast %60 : vector<1x1x96xf32> to vector<1x96xf32>
    %62 = vector.broadcast %61 : vector<1x96xf32> to vector<10x96xf32>
    %63 = arith.addf %59, %62 : vector<10x96xf32>
    %64 = vector.extract_strided_slice %63 {offsets = [0, 0], sizes = [10, 8], strides = [1, 1]} : vector<10x96xf32> to vector<10x8xf32>
    %65 = vector.extract_strided_slice %63 {offsets = [0, 32], sizes = [10, 8], strides = [1, 1]} : vector<10x96xf32> to vector<10x8xf32>
    %66 = vector.extract_strided_slice %63 {offsets = [0, 64], sizes = [10, 8], strides = [1, 1]} : vector<10x96xf32> to vector<10x8xf32>
    %67 = tpu.transpose %65, [1, 0] : vector<10x8xf32> -> vector<8x10xf32>
    %cst_30 = arith.constant dense<0.000000e+00> : vector<10x10xf32>
    %68 = tpu.matmul %64, %67, %cst_30 {dimension_numbers = #tpu.dot_dimension_numbers<[1], [0], [0], [1], [0, 0, 1, 1], [], []>} : vector<10x8xf32>, vector<8x10xf32>, vector<10x10xf32> -> vector<10x10xf32>
    %cst_31 = arith.constant 0.353553385 : f32
    %69 = vector.broadcast %cst_31 : f32 to vector<10x10xf32>
    %70 = arith.mulf %68, %69 : vector<10x10xf32>
    %71 = arith.addf %70, %32 : vector<10x10xf32>
    %cst_32 = arith.constant dense<0xFF800000> : vector<10xf32>
    %72 = vector.multi_reduction <maximumf>, %71, %cst_32 [1] : vector<10x10xf32> to vector<10xf32>
    %73 = vector.shape_cast %72 : vector<10xf32> to vector<10x1xf32>
    %74 = vector.broadcast %73 : vector<10x1xf32> to vector<10x10xf32>
    %75 = arith.subf %71, %74 : vector<10x10xf32>
    %76 = math.exp %75 : vector<10x10xf32>
    %cst_33 = arith.constant dense<0.000000e+00> : vector<10xf32>
    %77 = vector.multi_reduction <add>, %76, %cst_33 [1] : vector<10x10xf32> to vector<10xf32>
    %78 = vector.shape_cast %77 : vector<10xf32> to vector<10x1xf32>
    %79 = tpu.reciprocal %78 {approx = true} : vector<10x1xf32> -> vector<10x1xf32>
    %80 = vector.broadcast %79 : vector<10x1xf32> to vector<10x10xf32>
    %81 = arith.mulf %76, %80 : vector<10x10xf32>
    %cst_34 = arith.constant dense<0.000000e+00> : vector<10x8xf32>
    %82 = tpu.matmul %81, %66, %cst_34 {dimension_numbers = #tpu.dot_dimension_numbers<[1], [0], [0], [1], [0, 0, 1, 1], [], []>} : vector<10x10xf32>, vector<10x8xf32>, vector<10x8xf32> -> vector<10x8xf32>
    %83 = vector.extract_strided_slice %63 {offsets = [0, 8], sizes = [10, 8], strides = [1, 1]} : vector<10x96xf32> to vector<10x8xf32>
    %84 = vector.extract_strided_slice %63 {offsets = [0, 40], sizes = [10, 8], strides = [1, 1]} : vector<10x96xf32> to vector<10x8xf32>
    %85 = vector.extract_strided_slice %63 {offsets = [0, 72], sizes = [10, 8], strides = [1, 1]} : vector<10x96xf32> to vector<10x8xf32>
    %86 = tpu.transpose %84, [1, 0] : vector<10x8xf32> -> vector<8x10xf32>
    %cst_35 = arith.constant dense<0.000000e+00> : vector<10x10xf32>
    %87 = tpu.matmul %83, %86, %cst_35 {dimension_numbers = #tpu.dot_dimension_numbers<[1], [0], [0], [1], [0, 0, 1, 1], [], []>} : vector<10x8xf32>, vector<8x10xf32>, vector<10x10xf32> -> vector<10x10xf32>
    %cst_36 = arith.constant 0.353553385 : f32
    %88 = vector.broadcast %cst_36 : f32 to vector<10x10xf32>
    %89 = arith.mulf %87, %88 : vector<10x10xf32>
    %90 = arith.addf %89, %32 : vector<10x10xf32>
    %cst_37 = arith.constant dense<0xFF800000> : vector<10xf32>
    %91 = vector.multi_reduction <maximumf>, %90, %cst_37 [1] : vector<10x10xf32> to vector<10xf32>
    %92 = vector.shape_cast %91 : vector<10xf32> to vector<10x1xf32>
    %93 = vector.broadcast %92 : vector<10x1xf32> to vector<10x10xf32>
    %94 = arith.subf %90, %93 : vector<10x10xf32>
    %95 = math.exp %94 : vector<10x10xf32>
    %cst_38 = arith.constant dense<0.000000e+00> : vector<10xf32>
    %96 = vector.multi_reduction <add>, %95, %cst_38 [1] : vector<10x10xf32> to vector<10xf32>
    %97 = vector.shape_cast %96 : vector<10xf32> to vector<10x1xf32>
    %98 = tpu.reciprocal %97 {approx = true} : vector<10x1xf32> -> vector<10x1xf32>
    %99 = vector.broadcast %98 : vector<10x1xf32> to vector<10x10xf32>
    %100 = arith.mulf %95, %99 : vector<10x10xf32>
    %cst_39 = arith.constant dense<0.000000e+00> : vector<10x8xf32>
    %101 = tpu.matmul %100, %85, %cst_39 {dimension_numbers = #tpu.dot_dimension_numbers<[1], [0], [0], [1], [0, 0, 1, 1], [], []>} : vector<10x10xf32>, vector<10x8xf32>, vector<10x8xf32> -> vector<10x8xf32>
    %102 = vector.extract_strided_slice %63 {offsets = [0, 16], sizes = [10, 8], strides = [1, 1]} : vector<10x96xf32> to vector<10x8xf32>
    %103 = vector.extract_strided_slice %63 {offsets = [0, 48], sizes = [10, 8], strides = [1, 1]} : vector<10x96xf32> to vector<10x8xf32>
    %104 = vector.extract_strided_slice %63 {offsets = [0, 80], sizes = [10, 8], strides = [1, 1]} : vector<10x96xf32> to vector<10x8xf32>
    %105 = tpu.transpose %103, [1, 0] : vector<10x8xf32> -> vector<8x10xf32>
    %cst_40 = arith.constant dense<0.000000e+00> : vector<10x10xf32>
    %106 = tpu.matmul %102, %105, %cst_40 {dimension_numbers = #tpu.dot_dimension_numbers<[1], [0], [0], [1], [0, 0, 1, 1], [], []>} : vector<10x8xf32>, vector<8x10xf32>, vector<10x10xf32> -> vector<10x10xf32>
    %cst_41 = arith.constant 0.353553385 : f32
    %107 = vector.broadcast %cst_41 : f32 to vector<10x10xf32>
    %108 = arith.mulf %106, %107 : vector<10x10xf32>
    %109 = arith.addf %108, %32 : vector<10x10xf32>
    %cst_42 = arith.constant dense<0xFF800000> : vector<10xf32>
    %110 = vector.multi_reduction <maximumf>, %109, %cst_42 [1] : vector<10x10xf32> to vector<10xf32>
    %111 = vector.shape_cast %110 : vector<10xf32> to vector<10x1xf32>
    %112 = vector.broadcast %111 : vector<10x1xf32> to vector<10x10xf32>
    %113 = arith.subf %109, %112 : vector<10x10xf32>
    %114 = math.exp %113 : vector<10x10xf32>
    %cst_43 = arith.constant dense<0.000000e+00> : vector<10xf32>
    %115 = vector.multi_reduction <add>, %114, %cst_43 [1] : vector<10x10xf32> to vector<10xf32>
    %116 = vector.shape_cast %115 : vector<10xf32> to vector<10x1xf32>
    %117 = tpu.reciprocal %116 {approx = true} : vector<10x1xf32> -> vector<10x1xf32>
    %118 = vector.broadcast %117 : vector<10x1xf32> to vector<10x10xf32>
    %119 = arith.mulf %114, %118 : vector<10x10xf32>
    %cst_44 = arith.constant dense<0.000000e+00> : vector<10x8xf32>
    %120 = tpu.matmul %119, %104, %cst_44 {dimension_numbers = #tpu.dot_dimension_numbers<[1], [0], [0], [1], [0, 0, 1, 1], [], []>} : vector<10x10xf32>, vector<10x8xf32>, vector<10x8xf32> -> vector<10x8xf32>
    %121 = vector.extract_strided_slice %63 {offsets = [0, 24], sizes = [10, 8], strides = [1, 1]} : vector<10x96xf32> to vector<10x8xf32>
    %122 = vector.extract_strided_slice %63 {offsets = [0, 56], sizes = [10, 8], strides = [1, 1]} : vector<10x96xf32> to vector<10x8xf32>
    %123 = vector.extract_strided_slice %63 {offsets = [0, 88], sizes = [10, 8], strides = [1, 1]} : vector<10x96xf32> to vector<10x8xf32>
    %124 = tpu.transpose %122, [1, 0] : vector<10x8xf32> -> vector<8x10xf32>
    %cst_45 = arith.constant dense<0.000000e+00> : vector<10x10xf32>
    %125 = tpu.matmul %121, %124, %cst_45 {dimension_numbers = #tpu.dot_dimension_numbers<[1], [0], [0], [1], [0, 0, 1, 1], [], []>} : vector<10x8xf32>, vector<8x10xf32>, vector<10x10xf32> -> vector<10x10xf32>
    %cst_46 = arith.constant 0.353553385 : f32
    %126 = vector.broadcast %cst_46 : f32 to vector<10x10xf32>
    %127 = arith.mulf %125, %126 : vector<10x10xf32>
    %128 = arith.addf %127, %32 : vector<10x10xf32>
    %cst_47 = arith.constant dense<0xFF800000> : vector<10xf32>
    %129 = vector.multi_reduction <maximumf>, %128, %cst_47 [1] : vector<10x10xf32> to vector<10xf32>
    %130 = vector.shape_cast %129 : vector<10xf32> to vector<10x1xf32>
    %131 = vector.broadcast %130 : vector<10x1xf32> to vector<10x10xf32>
    %132 = arith.subf %128, %131 : vector<10x10xf32>
    %133 = math.exp %132 : vector<10x10xf32>
    %cst_48 = arith.constant dense<0.000000e+00> : vector<10xf32>
    %134 = vector.multi_reduction <add>, %133, %cst_48 [1] : vector<10x10xf32> to vector<10xf32>
    %135 = vector.shape_cast %134 : vector<10xf32> to vector<10x1xf32>
    %136 = tpu.reciprocal %135 {approx = true} : vector<10x1xf32> -> vector<10x1xf32>
    %137 = vector.broadcast %136 : vector<10x1xf32> to vector<10x10xf32>
    %138 = arith.mulf %133, %137 : vector<10x10xf32>
    %cst_49 = arith.constant dense<0.000000e+00> : vector<10x8xf32>
    %139 = tpu.matmul %138, %123, %cst_49 {dimension_numbers = #tpu.dot_dimension_numbers<[1], [0], [0], [1], [0, 0, 1, 1], [], []>} : vector<10x10xf32>, vector<10x8xf32>, vector<10x8xf32> -> vector<10x8xf32>
    %140 = tpu.concatenate %82, %101, %120, %139 in 1 : vector<10x8xf32>, vector<10x8xf32>, vector<10x8xf32>, vector<10x8xf32> -> vector<10x32xf32>
    %c0_50 = arith.constant 0 : index
    %c0_51 = arith.constant 0 : index
    %c0_52 = arith.constant 0 : index
    %141 = vector.load %arg8[%c0_50, %c0_51, %c0_52] : memref<2x32x32xf32, #tpu.memory_space<vmem>>, vector<1x32x32xf32>
    %142 = vector.shape_cast %141 : vector<1x32x32xf32> to vector<32x32xf32>
    %cst_53 = arith.constant dense<0.000000e+00> : vector<10x32xf32>
    %143 = tpu.matmul %140, %142, %cst_53 {dimension_numbers = #tpu.dot_dimension_numbers<[1], [0], [0], [1], [0, 0, 1, 1], [], []>} : vector<10x32xf32>, vector<32x32xf32>, vector<10x32xf32> -> vector<10x32xf32>
    %c0_54 = arith.constant 0 : index
    %c0_55 = arith.constant 0 : index
    %c0_56 = arith.constant 0 : index
    %144 = vector.load %arg9[%c0_54, %c0_55, %c0_56] : memref<2x1x32xf32, #tpu.memory_space<vmem>>, vector<1x1x32xf32>
    %145 = vector.shape_cast %144 : vector<1x1x32xf32> to vector<1x32xf32>
    %146 = vector.broadcast %145 : vector<1x32xf32> to vector<10x32xf32>
    %147 = arith.addf %143, %146 : vector<10x32xf32>
    %148 = arith.addf %4, %147 : vector<10x32xf32>
    %c0_57 = arith.constant 0 : index
    %c0_58 = arith.constant 0 : index
    %c0_59 = arith.constant 0 : index
    %149 = vector.load %arg10[%c0_57, %c0_58, %c0_59] : memref<2x1x32xf32, #tpu.memory_space<vmem>>, vector<1x1x32xf32>
    %150 = vector.shape_cast %149 : vector<1x1x32xf32> to vector<1x32xf32>
    %c0_60 = arith.constant 0 : index
    %c0_61 = arith.constant 0 : index
    %c0_62 = arith.constant 0 : index
    %151 = vector.load %arg11[%c0_60, %c0_61, %c0_62] : memref<2x1x32xf32, #tpu.memory_space<vmem>>, vector<1x1x32xf32>
    %152 = vector.shape_cast %151 : vector<1x1x32xf32> to vector<1x32xf32>
    %cst_63 = arith.constant dense<0.000000e+00> : vector<10xf32>
    %153 = vector.multi_reduction <add>, %148, %cst_63 [1] : vector<10x32xf32> to vector<10xf32>
    %154 = vector.shape_cast %153 : vector<10xf32> to vector<10x1xf32>
    %cst_64 = arith.constant 3.200000e+01 : f32
    %155 = vector.broadcast %cst_64 : f32 to vector<10x1xf32>
    %156 = arith.divf %154, %155 : vector<10x1xf32>
    %157 = vector.broadcast %156 : vector<10x1xf32> to vector<10x32xf32>
    %158 = arith.subf %148, %157 : vector<10x32xf32>
    %159 = arith.mulf %158, %158 : vector<10x32xf32>
    %cst_65 = arith.constant dense<0.000000e+00> : vector<10xf32>
    %160 = vector.multi_reduction <add>, %159, %cst_65 [1] : vector<10x32xf32> to vector<10xf32>
    %161 = vector.shape_cast %160 : vector<10xf32> to vector<10x1xf32>
    %cst_66 = arith.constant 3.200000e+01 : f32
    %162 = vector.broadcast %cst_66 : f32 to vector<10x1xf32>
    %163 = arith.divf %161, %162 : vector<10x1xf32>
    %cst_67 = arith.constant 9.99999997E-7 : f32
    %164 = vector.broadcast %cst_67 : f32 to vector<10x1xf32>
    %165 = arith.addf %163, %164 : vector<10x1xf32>
    %166 = math.rsqrt %165 : vector<10x1xf32>
    %167 = vector.broadcast %166 : vector<10x1xf32> to vector<10x32xf32>
    %168 = arith.mulf %158, %167 : vector<10x32xf32>
    %169 = vector.broadcast %150 : vector<1x32xf32> to vector<10x32xf32>
    %170 = arith.mulf %168, %169 : vector<10x32xf32>
    %171 = vector.broadcast %152 : vector<1x32xf32> to vector<10x32xf32>
    %172 = arith.addf %170, %171 : vector<10x32xf32>
    %c0_68 = arith.constant 0 : index
    %c0_69 = arith.constant 0 : index
    %c0_70 = arith.constant 0 : index
    %173 = vector.load %arg12[%c0_68, %c0_69, %c0_70] : memref<2x32x128xf32, #tpu.memory_space<vmem>>, vector<1x32x128xf32>
    %174 = vector.shape_cast %173 : vector<1x32x128xf32> to vector<32x128xf32>
    %cst_71 = arith.constant dense<0.000000e+00> : vector<10x128xf32>
    %175 = tpu.matmul %172, %174, %cst_71 {dimension_numbers = #tpu.dot_dimension_numbers<[1], [0], [0], [1], [0, 0, 1, 1], [], []>} : vector<10x32xf32>, vector<32x128xf32>, vector<10x128xf32> -> vector<10x128xf32>
    %c0_72 = arith.constant 0 : index
    %c0_73 = arith.constant 0 : index
    %c0_74 = arith.constant 0 : index
    %176 = vector.load %arg13[%c0_72, %c0_73, %c0_74] : memref<2x1x128xf32, #tpu.memory_space<vmem>>, vector<1x1x128xf32>
    %177 = vector.shape_cast %176 : vector<1x1x128xf32> to vector<1x128xf32>
    %178 = vector.broadcast %177 : vector<1x128xf32> to vector<10x128xf32>
    %179 = arith.addf %175, %178 : vector<10x128xf32>
    %180 = arith.mulf %179, %179 : vector<10x128xf32>
    %181 = arith.mulf %179, %180 : vector<10x128xf32>
    %cst_75 = arith.constant 4.471500e-02 : f32
    %182 = vector.broadcast %cst_75 : f32 to vector<10x128xf32>
    %183 = arith.mulf %182, %181 : vector<10x128xf32>
    %184 = arith.addf %179, %183 : vector<10x128xf32>
    %cst_76 = arith.constant 0.797884583 : f32
    %185 = vector.broadcast %cst_76 : f32 to vector<10x128xf32>
    %186 = arith.mulf %185, %184 : vector<10x128xf32>
    %187 = math.tanh %186 : vector<10x128xf32>
    %cst_77 = arith.constant 1.000000e+00 : f32
    %188 = vector.broadcast %cst_77 : f32 to vector<10x128xf32>
    %189 = arith.addf %188, %187 : vector<10x128xf32>
    %cst_78 = arith.constant 5.000000e-01 : f32
    %190 = vector.broadcast %cst_78 : f32 to vector<10x128xf32>
    %191 = arith.mulf %190, %189 : vector<10x128xf32>
    %192 = arith.mulf %179, %191 : vector<10x128xf32>
    %c0_79 = arith.constant 0 : index
    %c0_80 = arith.constant 0 : index
    %c0_81 = arith.constant 0 : index
    %193 = vector.load %arg14[%c0_79, %c0_80, %c0_81] : memref<2x128x32xf32, #tpu.memory_space<vmem>>, vector<1x128x32xf32>
    %194 = vector.shape_cast %193 : vector<1x128x32xf32> to vector<128x32xf32>
    %cst_82 = arith.constant dense<0.000000e+00> : vector<10x32xf32>
    %195 = tpu.matmul %192, %194, %cst_82 {dimension_numbers = #tpu.dot_dimension_numbers<[1], [0], [0], [1], [0, 0, 1, 1], [], []>} : vector<10x128xf32>, vector<128x32xf32>, vector<10x32xf32> -> vector<10x32xf32>
    %196 = arith.addf %148, %195 : vector<10x32xf32>
    %c0_83 = arith.constant 0 : index
    %c0_84 = arith.constant 0 : index
    %c0_85 = arith.constant 0 : index
    %197 = vector.load %arg15[%c0_83, %c0_84, %c0_85] : memref<2x1x32xf32, #tpu.memory_space<vmem>>, vector<1x1x32xf32>
    %198 = vector.shape_cast %197 : vector<1x1x32xf32> to vector<1x32xf32>
    %199 = vector.broadcast %198 : vector<1x32xf32> to vector<10x32xf32>
    %200 = arith.addf %196, %199 : vector<10x32xf32>
    %c1 = arith.constant 1 : index
    %c0_86 = arith.constant 0 : index
    %c0_87 = arith.constant 0 : index
    %201 = vector.load %arg4[%c1, %c0_86, %c0_87] : memref<2x1x32xf32, #tpu.memory_space<vmem>>, vector<1x1x32xf32>
    %202 = vector.shape_cast %201 : vector<1x1x32xf32> to vector<1x32xf32>
    %c1_88 = arith.constant 1 : index
    %c0_89 = arith.constant 0 : index
    %c0_90 = arith.constant 0 : index
    %203 = vector.load %arg5[%c1_88, %c0_89, %c0_90] : memref<2x1x32xf32, #tpu.memory_space<vmem>>, vector<1x1x32xf32>
    %204 = vector.shape_cast %203 : vector<1x1x32xf32> to vector<1x32xf32>
    %cst_91 = arith.constant dense<0.000000e+00> : vector<10xf32>
    %205 = vector.multi_reduction <add>, %200, %cst_91 [1] : vector<10x32xf32> to vector<10xf32>
    %206 = vector.shape_cast %205 : vector<10xf32> to vector<10x1xf32>
    %cst_92 = arith.constant 3.200000e+01 : f32
    %207 = vector.broadcast %cst_92 : f32 to vector<10x1xf32>
    %208 = arith.divf %206, %207 : vector<10x1xf32>
    %209 = vector.broadcast %208 : vector<10x1xf32> to vector<10x32xf32>
    %210 = arith.subf %200, %209 : vector<10x32xf32>
    %211 = arith.mulf %210, %210 : vector<10x32xf32>
    %cst_93 = arith.constant dense<0.000000e+00> : vector<10xf32>
    %212 = vector.multi_reduction <add>, %211, %cst_93 [1] : vector<10x32xf32> to vector<10xf32>
    %213 = vector.shape_cast %212 : vector<10xf32> to vector<10x1xf32>
    %cst_94 = arith.constant 3.200000e+01 : f32
    %214 = vector.broadcast %cst_94 : f32 to vector<10x1xf32>
    %215 = arith.divf %213, %214 : vector<10x1xf32>
    %cst_95 = arith.constant 9.99999997E-7 : f32
    %216 = vector.broadcast %cst_95 : f32 to vector<10x1xf32>
    %217 = arith.addf %215, %216 : vector<10x1xf32>
    %218 = math.rsqrt %217 : vector<10x1xf32>
    %219 = vector.broadcast %218 : vector<10x1xf32> to vector<10x32xf32>
    %220 = arith.mulf %210, %219 : vector<10x32xf32>
    %221 = vector.broadcast %202 : vector<1x32xf32> to vector<10x32xf32>
    %222 = arith.mulf %220, %221 : vector<10x32xf32>
    %223 = vector.broadcast %204 : vector<1x32xf32> to vector<10x32xf32>
    %224 = arith.addf %222, %223 : vector<10x32xf32>
    %c1_96 = arith.constant 1 : index
    %c0_97 = arith.constant 0 : index
    %c0_98 = arith.constant 0 : index
    %225 = vector.load %arg6[%c1_96, %c0_97, %c0_98] : memref<2x32x96xf32, #tpu.memory_space<vmem>>, vector<1x32x96xf32>
    %226 = vector.shape_cast %225 : vector<1x32x96xf32> to vector<32x96xf32>
    %cst_99 = arith.constant dense<0.000000e+00> : vector<10x96xf32>
    %227 = tpu.matmul %224, %226, %cst_99 {dimension_numbers = #tpu.dot_dimension_numbers<[1], [0], [0], [1], [0, 0, 1, 1], [], []>} : vector<10x32xf32>, vector<32x96xf32>, vector<10x96xf32> -> vector<10x96xf32>
    %c1_100 = arith.constant 1 : index
    %c0_101 = arith.constant 0 : index
    %c0_102 = arith.constant 0 : index
    %228 = vector.load %arg7[%c1_100, %c0_101, %c0_102] : memref<2x1x96xf32, #tpu.memory_space<vmem>>, vector<1x1x96xf32>
    %229 = vector.shape_cast %228 : vector<1x1x96xf32> to vector<1x96xf32>
    %230 = vector.broadcast %229 : vector<1x96xf32> to vector<10x96xf32>
    %231 = arith.addf %227, %230 : vector<10x96xf32>
    %232 = vector.extract_strided_slice %231 {offsets = [0, 0], sizes = [10, 8], strides = [1, 1]} : vector<10x96xf32> to vector<10x8xf32>
    %233 = vector.extract_strided_slice %231 {offsets = [0, 32], sizes = [10, 8], strides = [1, 1]} : vector<10x96xf32> to vector<10x8xf32>
    %234 = vector.extract_strided_slice %231 {offsets = [0, 64], sizes = [10, 8], strides = [1, 1]} : vector<10x96xf32> to vector<10x8xf32>
    %235 = tpu.transpose %233, [1, 0] : vector<10x8xf32> -> vector<8x10xf32>
    %cst_103 = arith.constant dense<0.000000e+00> : vector<10x10xf32>
    %236 = tpu.matmul %232, %235, %cst_103 {dimension_numbers = #tpu.dot_dimension_numbers<[1], [0], [0], [1], [0, 0, 1, 1], [], []>} : vector<10x8xf32>, vector<8x10xf32>, vector<10x10xf32> -> vector<10x10xf32>
    %cst_104 = arith.constant 0.353553385 : f32
    %237 = vector.broadcast %cst_104 : f32 to vector<10x10xf32>
    %238 = arith.mulf %236, %237 : vector<10x10xf32>
    %239 = arith.addf %238, %32 : vector<10x10xf32>
    %cst_105 = arith.constant dense<0xFF800000> : vector<10xf32>
    %240 = vector.multi_reduction <maximumf>, %239, %cst_105 [1] : vector<10x10xf32> to vector<10xf32>
    %241 = vector.shape_cast %240 : vector<10xf32> to vector<10x1xf32>
    %242 = vector.broadcast %241 : vector<10x1xf32> to vector<10x10xf32>
    %243 = arith.subf %239, %242 : vector<10x10xf32>
    %244 = math.exp %243 : vector<10x10xf32>
    %cst_106 = arith.constant dense<0.000000e+00> : vector<10xf32>
    %245 = vector.multi_reduction <add>, %244, %cst_106 [1] : vector<10x10xf32> to vector<10xf32>
    %246 = vector.shape_cast %245 : vector<10xf32> to vector<10x1xf32>
    %247 = tpu.reciprocal %246 {approx = true} : vector<10x1xf32> -> vector<10x1xf32>
    %248 = vector.broadcast %247 : vector<10x1xf32> to vector<10x10xf32>
    %249 = arith.mulf %244, %248 : vector<10x10xf32>
    %cst_107 = arith.constant dense<0.000000e+00> : vector<10x8xf32>
    %250 = tpu.matmul %249, %234, %cst_107 {dimension_numbers = #tpu.dot_dimension_numbers<[1], [0], [0], [1], [0, 0, 1, 1], [], []>} : vector<10x10xf32>, vector<10x8xf32>, vector<10x8xf32> -> vector<10x8xf32>
    %251 = vector.extract_strided_slice %231 {offsets = [0, 8], sizes = [10, 8], strides = [1, 1]} : vector<10x96xf32> to vector<10x8xf32>
    %252 = vector.extract_strided_slice %231 {offsets = [0, 40], sizes = [10, 8], strides = [1, 1]} : vector<10x96xf32> to vector<10x8xf32>
    %253 = vector.extract_strided_slice %231 {offsets = [0, 72], sizes = [10, 8], strides = [1, 1]} : vector<10x96xf32> to vector<10x8xf32>
    %254 = tpu.transpose %252, [1, 0] : vector<10x8xf32> -> vector<8x10xf32>
    %cst_108 = arith.constant dense<0.000000e+00> : vector<10x10xf32>
    %255 = tpu.matmul %251, %254, %cst_108 {dimension_numbers = #tpu.dot_dimension_numbers<[1], [0], [0], [1], [0, 0, 1, 1], [], []>} : vector<10x8xf32>, vector<8x10xf32>, vector<10x10xf32> -> vector<10x10xf32>
    %cst_109 = arith.constant 0.353553385 : f32
    %256 = vector.broadcast %cst_109 : f32 to vector<10x10xf32>
    %257 = arith.mulf %255, %256 : vector<10x10xf32>
    %258 = arith.addf %257, %32 : vector<10x10xf32>
    %cst_110 = arith.constant dense<0xFF800000> : vector<10xf32>
    %259 = vector.multi_reduction <maximumf>, %258, %cst_110 [1] : vector<10x10xf32> to vector<10xf32>
    %260 = vector.shape_cast %259 : vector<10xf32> to vector<10x1xf32>
    %261 = vector.broadcast %260 : vector<10x1xf32> to vector<10x10xf32>
    %262 = arith.subf %258, %261 : vector<10x10xf32>
    %263 = math.exp %262 : vector<10x10xf32>
    %cst_111 = arith.constant dense<0.000000e+00> : vector<10xf32>
    %264 = vector.multi_reduction <add>, %263, %cst_111 [1] : vector<10x10xf32> to vector<10xf32>
    %265 = vector.shape_cast %264 : vector<10xf32> to vector<10x1xf32>
    %266 = tpu.reciprocal %265 {approx = true} : vector<10x1xf32> -> vector<10x1xf32>
    %267 = vector.broadcast %266 : vector<10x1xf32> to vector<10x10xf32>
    %268 = arith.mulf %263, %267 : vector<10x10xf32>
    %cst_112 = arith.constant dense<0.000000e+00> : vector<10x8xf32>
    %269 = tpu.matmul %268, %253, %cst_112 {dimension_numbers = #tpu.dot_dimension_numbers<[1], [0], [0], [1], [0, 0, 1, 1], [], []>} : vector<10x10xf32>, vector<10x8xf32>, vector<10x8xf32> -> vector<10x8xf32>
    %270 = vector.extract_strided_slice %231 {offsets = [0, 16], sizes = [10, 8], strides = [1, 1]} : vector<10x96xf32> to vector<10x8xf32>
    %271 = vector.extract_strided_slice %231 {offsets = [0, 48], sizes = [10, 8], strides = [1, 1]} : vector<10x96xf32> to vector<10x8xf32>
    %272 = vector.extract_strided_slice %231 {offsets = [0, 80], sizes = [10, 8], strides = [1, 1]} : vector<10x96xf32> to vector<10x8xf32>
    %273 = tpu.transpose %271, [1, 0] : vector<10x8xf32> -> vector<8x10xf32>
    %cst_113 = arith.constant dense<0.000000e+00> : vector<10x10xf32>
    %274 = tpu.matmul %270, %273, %cst_113 {dimension_numbers = #tpu.dot_dimension_numbers<[1], [0], [0], [1], [0, 0, 1, 1], [], []>} : vector<10x8xf32>, vector<8x10xf32>, vector<10x10xf32> -> vector<10x10xf32>
    %cst_114 = arith.constant 0.353553385 : f32
    %275 = vector.broadcast %cst_114 : f32 to vector<10x10xf32>
    %276 = arith.mulf %274, %275 : vector<10x10xf32>
    %277 = arith.addf %276, %32 : vector<10x10xf32>
    %cst_115 = arith.constant dense<0xFF800000> : vector<10xf32>
    %278 = vector.multi_reduction <maximumf>, %277, %cst_115 [1] : vector<10x10xf32> to vector<10xf32>
    %279 = vector.shape_cast %278 : vector<10xf32> to vector<10x1xf32>
    %280 = vector.broadcast %279 : vector<10x1xf32> to vector<10x10xf32>
    %281 = arith.subf %277, %280 : vector<10x10xf32>
    %282 = math.exp %281 : vector<10x10xf32>
    %cst_116 = arith.constant dense<0.000000e+00> : vector<10xf32>
    %283 = vector.multi_reduction <add>, %282, %cst_116 [1] : vector<10x10xf32> to vector<10xf32>
    %284 = vector.shape_cast %283 : vector<10xf32> to vector<10x1xf32>
    %285 = tpu.reciprocal %284 {approx = true} : vector<10x1xf32> -> vector<10x1xf32>
    %286 = vector.broadcast %285 : vector<10x1xf32> to vector<10x10xf32>
    %287 = arith.mulf %282, %286 : vector<10x10xf32>
    %cst_117 = arith.constant dense<0.000000e+00> : vector<10x8xf32>
    %288 = tpu.matmul %287, %272, %cst_117 {dimension_numbers = #tpu.dot_dimension_numbers<[1], [0], [0], [1], [0, 0, 1, 1], [], []>} : vector<10x10xf32>, vector<10x8xf32>, vector<10x8xf32> -> vector<10x8xf32>
    %289 = vector.extract_strided_slice %231 {offsets = [0, 24], sizes = [10, 8], strides = [1, 1]} : vector<10x96xf32> to vector<10x8xf32>
    %290 = vector.extract_strided_slice %231 {offsets = [0, 56], sizes = [10, 8], strides = [1, 1]} : vector<10x96xf32> to vector<10x8xf32>
    %291 = vector.extract_strided_slice %231 {offsets = [0, 88], sizes = [10, 8], strides = [1, 1]} : vector<10x96xf32> to vector<10x8xf32>
    %292 = tpu.transpose %290, [1, 0] : vector<10x8xf32> -> vector<8x10xf32>
    %cst_118 = arith.constant dense<0.000000e+00> : vector<10x10xf32>
    %293 = tpu.matmul %289, %292, %cst_118 {dimension_numbers = #tpu.dot_dimension_numbers<[1], [0], [0], [1], [0, 0, 1, 1], [], []>} : vector<10x8xf32>, vector<8x10xf32>, vector<10x10xf32> -> vector<10x10xf32>
    %cst_119 = arith.constant 0.353553385 : f32
    %294 = vector.broadcast %cst_119 : f32 to vector<10x10xf32>
    %295 = arith.mulf %293, %294 : vector<10x10xf32>
    %296 = arith.addf %295, %32 : vector<10x10xf32>
    %cst_120 = arith.constant dense<0xFF800000> : vector<10xf32>
    %297 = vector.multi_reduction <maximumf>, %296, %cst_120 [1] : vector<10x10xf32> to vector<10xf32>
    %298 = vector.shape_cast %297 : vector<10xf32> to vector<10x1xf32>
    %299 = vector.broadcast %298 : vector<10x1xf32> to vector<10x10xf32>
    %300 = arith.subf %296, %299 : vector<10x10xf32>
    %301 = math.exp %300 : vector<10x10xf32>
    %cst_121 = arith.constant dense<0.000000e+00> : vector<10xf32>
    %302 = vector.multi_reduction <add>, %301, %cst_121 [1] : vector<10x10xf32> to vector<10xf32>
    %303 = vector.shape_cast %302 : vector<10xf32> to vector<10x1xf32>
    %304 = tpu.reciprocal %303 {approx = true} : vector<10x1xf32> -> vector<10x1xf32>
    %305 = vector.broadcast %304 : vector<10x1xf32> to vector<10x10xf32>
    %306 = arith.mulf %301, %305 : vector<10x10xf32>
    %cst_122 = arith.constant dense<0.000000e+00> : vector<10x8xf32>
    %307 = tpu.matmul %306, %291, %cst_122 {dimension_numbers = #tpu.dot_dimension_numbers<[1], [0], [0], [1], [0, 0, 1, 1], [], []>} : vector<10x10xf32>, vector<10x8xf32>, vector<10x8xf32> -> vector<10x8xf32>
    %308 = tpu.concatenate %250, %269, %288, %307 in 1 : vector<10x8xf32>, vector<10x8xf32>, vector<10x8xf32>, vector<10x8xf32> -> vector<10x32xf32>
    %c1_123 = arith.constant 1 : index
    %c0_124 = arith.constant 0 : index
    %c0_125 = arith.constant 0 : index
    %309 = vector.load %arg8[%c1_123, %c0_124, %c0_125] : memref<2x32x32xf32, #tpu.memory_space<vmem>>, vector<1x32x32xf32>
    %310 = vector.shape_cast %309 : vector<1x32x32xf32> to vector<32x32xf32>
    %cst_126 = arith.constant dense<0.000000e+00> : vector<10x32xf32>
    %311 = tpu.matmul %308, %310, %cst_126 {dimension_numbers = #tpu.dot_dimension_numbers<[1], [0], [0], [1], [0, 0, 1, 1], [], []>} : vector<10x32xf32>, vector<32x32xf32>, vector<10x32xf32> -> vector<10x32xf32>
    %c1_127 = arith.constant 1 : index
    %c0_128 = arith.constant 0 : index
    %c0_129 = arith.constant 0 : index
    %312 = vector.load %arg9[%c1_127, %c0_128, %c0_129] : memref<2x1x32xf32, #tpu.memory_space<vmem>>, vector<1x1x32xf32>
    %313 = vector.shape_cast %312 : vector<1x1x32xf32> to vector<1x32xf32>
    %314 = vector.broadcast %313 : vector<1x32xf32> to vector<10x32xf32>
    %315 = arith.addf %311, %314 : vector<10x32xf32>
    %316 = arith.addf %200, %315 : vector<10x32xf32>
    %c1_130 = arith.constant 1 : index
    %c0_131 = arith.constant 0 : index
    %c0_132 = arith.constant 0 : index
    %317 = vector.load %arg10[%c1_130, %c0_131, %c0_132] : memref<2x1x32xf32, #tpu.memory_space<vmem>>, vector<1x1x32xf32>
    %318 = vector.shape_cast %317 : vector<1x1x32xf32> to vector<1x32xf32>
    %c1_133 = arith.constant 1 : index
    %c0_134 = arith.constant 0 : index
    %c0_135 = arith.constant 0 : index
    %319 = vector.load %arg11[%c1_133, %c0_134, %c0_135] : memref<2x1x32xf32, #tpu.memory_space<vmem>>, vector<1x1x32xf32>
    %320 = vector.shape_cast %319 : vector<1x1x32xf32> to vector<1x32xf32>
    %cst_136 = arith.constant dense<0.000000e+00> : vector<10xf32>
    %321 = vector.multi_reduction <add>, %316, %cst_136 [1] : vector<10x32xf32> to vector<10xf32>
    %322 = vector.shape_cast %321 : vector<10xf32> to vector<10x1xf32>
    %cst_137 = arith.constant 3.200000e+01 : f32
    %323 = vector.broadcast %cst_137 : f32 to vector<10x1xf32>
    %324 = arith.divf %322, %323 : vector<10x1xf32>
    %325 = vector.broadcast %324 : vector<10x1xf32> to vector<10x32xf32>
    %326 = arith.subf %316, %325 : vector<10x32xf32>
    %327 = arith.mulf %326, %326 : vector<10x32xf32>
    %cst_138 = arith.constant dense<0.000000e+00> : vector<10xf32>
    %328 = vector.multi_reduction <add>, %327, %cst_138 [1] : vector<10x32xf32> to vector<10xf32>
    %329 = vector.shape_cast %328 : vector<10xf32> to vector<10x1xf32>
    %cst_139 = arith.constant 3.200000e+01 : f32
    %330 = vector.broadcast %cst_139 : f32 to vector<10x1xf32>
    %331 = arith.divf %329, %330 : vector<10x1xf32>
    %cst_140 = arith.constant 9.99999997E-7 : f32
    %332 = vector.broadcast %cst_140 : f32 to vector<10x1xf32>
    %333 = arith.addf %331, %332 : vector<10x1xf32>
    %334 = math.rsqrt %333 : vector<10x1xf32>
    %335 = vector.broadcast %334 : vector<10x1xf32> to vector<10x32xf32>
    %336 = arith.mulf %326, %335 : vector<10x32xf32>
    %337 = vector.broadcast %318 : vector<1x32xf32> to vector<10x32xf32>
    %338 = arith.mulf %336, %337 : vector<10x32xf32>
    %339 = vector.broadcast %320 : vector<1x32xf32> to vector<10x32xf32>
    %340 = arith.addf %338, %339 : vector<10x32xf32>
    %c1_141 = arith.constant 1 : index
    %c0_142 = arith.constant 0 : index
    %c0_143 = arith.constant 0 : index
    %341 = vector.load %arg12[%c1_141, %c0_142, %c0_143] : memref<2x32x128xf32, #tpu.memory_space<vmem>>, vector<1x32x128xf32>
    %342 = vector.shape_cast %341 : vector<1x32x128xf32> to vector<32x128xf32>
    %cst_144 = arith.constant dense<0.000000e+00> : vector<10x128xf32>
    %343 = tpu.matmul %340, %342, %cst_144 {dimension_numbers = #tpu.dot_dimension_numbers<[1], [0], [0], [1], [0, 0, 1, 1], [], []>} : vector<10x32xf32>, vector<32x128xf32>, vector<10x128xf32> -> vector<10x128xf32>
    %c1_145 = arith.constant 1 : index
    %c0_146 = arith.constant 0 : index
    %c0_147 = arith.constant 0 : index
    %344 = vector.load %arg13[%c1_145, %c0_146, %c0_147] : memref<2x1x128xf32, #tpu.memory_space<vmem>>, vector<1x1x128xf32>
    %345 = vector.shape_cast %344 : vector<1x1x128xf32> to vector<1x128xf32>
    %346 = vector.broadcast %345 : vector<1x128xf32> to vector<10x128xf32>
    %347 = arith.addf %343, %346 : vector<10x128xf32>
    %348 = arith.mulf %347, %347 : vector<10x128xf32>
    %349 = arith.mulf %347, %348 : vector<10x128xf32>
    %cst_148 = arith.constant 4.471500e-02 : f32
    %350 = vector.broadcast %cst_148 : f32 to vector<10x128xf32>
    %351 = arith.mulf %350, %349 : vector<10x128xf32>
    %352 = arith.addf %347, %351 : vector<10x128xf32>
    %cst_149 = arith.constant 0.797884583 : f32
    %353 = vector.broadcast %cst_149 : f32 to vector<10x128xf32>
    %354 = arith.mulf %353, %352 : vector<10x128xf32>
    %355 = math.tanh %354 : vector<10x128xf32>
    %cst_150 = arith.constant 1.000000e+00 : f32
    %356 = vector.broadcast %cst_150 : f32 to vector<10x128xf32>
    %357 = arith.addf %356, %355 : vector<10x128xf32>
    %cst_151 = arith.constant 5.000000e-01 : f32
    %358 = vector.broadcast %cst_151 : f32 to vector<10x128xf32>
    %359 = arith.mulf %358, %357 : vector<10x128xf32>
    %360 = arith.mulf %347, %359 : vector<10x128xf32>
    %c1_152 = arith.constant 1 : index
    %c0_153 = arith.constant 0 : index
    %c0_154 = arith.constant 0 : index
    %361 = vector.load %arg14[%c1_152, %c0_153, %c0_154] : memref<2x128x32xf32, #tpu.memory_space<vmem>>, vector<1x128x32xf32>
    %362 = vector.shape_cast %361 : vector<1x128x32xf32> to vector<128x32xf32>
    %cst_155 = arith.constant dense<0.000000e+00> : vector<10x32xf32>
    %363 = tpu.matmul %360, %362, %cst_155 {dimension_numbers = #tpu.dot_dimension_numbers<[1], [0], [0], [1], [0, 0, 1, 1], [], []>} : vector<10x128xf32>, vector<128x32xf32>, vector<10x32xf32> -> vector<10x32xf32>
    %364 = arith.addf %316, %363 : vector<10x32xf32>
    %c1_156 = arith.constant 1 : index
    %c0_157 = arith.constant 0 : index
    %c0_158 = arith.constant 0 : index
    %365 = vector.load %arg15[%c1_156, %c0_157, %c0_158] : memref<2x1x32xf32, #tpu.memory_space<vmem>>, vector<1x1x32xf32>
    %366 = vector.shape_cast %365 : vector<1x1x32xf32> to vector<1x32xf32>
    %367 = vector.broadcast %366 : vector<1x32xf32> to vector<10x32xf32>
    %368 = arith.addf %364, %367 : vector<10x32xf32>
    %369 = vector.extract_strided_slice %368 {offsets = [0, 0], sizes = [1, 32], strides = [1, 1]} : vector<10x32xf32> to vector<1x32xf32>
    %370 = vector.extract_strided_slice %368 {offsets = [5, 0], sizes = [1, 32], strides = [1, 1]} : vector<10x32xf32> to vector<1x32xf32>
    %371 = tpu.concatenate %369, %370 in 0 : vector<1x32xf32>, vector<1x32xf32> -> vector<2x32xf32>
    %c0_159 = arith.constant 0 : index
    %c0_160 = arith.constant 0 : index
    %372 = vector.load %arg16[%c0_159, %c0_160] : memref<1x32xf32, #tpu.memory_space<vmem>>, vector<1x32xf32>
    %c0_161 = arith.constant 0 : index
    %c0_162 = arith.constant 0 : index
    %373 = vector.load %arg17[%c0_161, %c0_162] : memref<1x32xf32, #tpu.memory_space<vmem>>, vector<1x32xf32>
    %cst_163 = arith.constant dense<0.000000e+00> : vector<2xf32>
    %374 = vector.multi_reduction <add>, %371, %cst_163 [1] : vector<2x32xf32> to vector<2xf32>
    %375 = vector.shape_cast %374 : vector<2xf32> to vector<2x1xf32>
    %cst_164 = arith.constant 3.200000e+01 : f32
    %376 = vector.broadcast %cst_164 : f32 to vector<2x1xf32>
    %377 = arith.divf %375, %376 : vector<2x1xf32>
    %378 = vector.broadcast %377 : vector<2x1xf32> to vector<2x32xf32>
    %379 = arith.subf %371, %378 : vector<2x32xf32>
    %380 = arith.mulf %379, %379 : vector<2x32xf32>
    %cst_165 = arith.constant dense<0.000000e+00> : vector<2xf32>
    %381 = vector.multi_reduction <add>, %380, %cst_165 [1] : vector<2x32xf32> to vector<2xf32>
    %382 = vector.shape_cast %381 : vector<2xf32> to vector<2x1xf32>
    %cst_166 = arith.constant 3.200000e+01 : f32
    %383 = vector.broadcast %cst_166 : f32 to vector<2x1xf32>
    %384 = arith.divf %382, %383 : vector<2x1xf32>
    %cst_167 = arith.constant 9.99999997E-7 : f32
    %385 = vector.broadcast %cst_167 : f32 to vector<2x1xf32>
    %386 = arith.addf %384, %385 : vector<2x1xf32>
    %387 = math.rsqrt %386 : vector<2x1xf32>
    %388 = vector.broadcast %387 : vector<2x1xf32> to vector<2x32xf32>
    %389 = arith.mulf %379, %388 : vector<2x32xf32>
    %390 = vector.broadcast %372 : vector<1x32xf32> to vector<2x32xf32>
    %391 = arith.mulf %389, %390 : vector<2x32xf32>
    %392 = vector.broadcast %373 : vector<1x32xf32> to vector<2x32xf32>
    %393 = arith.addf %391, %392 : vector<2x32xf32>
    %394 = arith.truncf %393 : vector<2x32xf32> to vector<2x32xbf16>
    %c0_168 = arith.constant 0 : index
    %c0_169 = arith.constant 0 : index
    %395 = vector.load %arg18[%c0_168, %c0_169] : memref<32x1024xbf16, #tpu.memory_space<vmem>>, vector<32x1024xbf16>
    %cst_170 = arith.constant dense<0.000000e+00> : vector<2x1024xf32>
    %396 = tpu.matmul %394, %395, %cst_170 {dimension_numbers = #tpu.dot_dimension_numbers<[1], [0], [0], [1], [0, 0, 1, 1], [], []>} : vector<2x32xbf16>, vector<32x1024xbf16>, vector<2x1024xf32> -> vector<2x1024xf32>
    %c0_171 = arith.constant 0 : index
    %c0_172 = arith.constant 0 : index
    %397 = vector.load %arg19[%c0_171, %c0_172] : memref<1x1024xf32, #tpu.memory_space<vmem>>, vector<1x1024xf32>
    %398 = vector.broadcast %397 : vector<1x1024xf32> to vector<2x1024xf32>
    %399 = arith.addf %396, %398 : vector<2x1024xf32>
    %400 = arith.truncf %399 : vector<2x1024xf32> to vector<2x1024xbf16>
    %c0_173 = arith.constant 0 : index
    %c0_174 = arith.constant 0 : index
    %401 = vector.load %arg20[%c0_173, %c0_174] : memref<1024x128xbf16, #tpu.memory_space<vmem>>, vector<1024x128xbf16>
    %cst_175 = arith.constant dense<0.000000e+00> : vector<2x128xf32>
    %402 = tpu.matmul %400, %401, %cst_175 {dimension_numbers = #tpu.dot_dimension_numbers<[1], [0], [0], [1], [0, 0, 1, 1], [], []>} : vector<2x1024xbf16>, vector<1024x128xbf16>, vector<2x128xf32> -> vector<2x128xf32>
    %c0_176 = arith.constant 0 : index
    %c0_177 = arith.constant 0 : index
    %403 = vector.load %arg21[%c0_176, %c0_177] : memref<1x128xf32, #tpu.memory_space<vmem>>, vector<1x128xf32>
    %404 = vector.broadcast %403 : vector<1x128xf32> to vector<2x128xf32>
    %405 = arith.addf %402, %404 : vector<2x128xf32>
    %c0_178 = arith.constant 0 : index
    %c0_179 = arith.constant 0 : index
    %406 = vector.load %arg22[%c0_178, %c0_179] : memref<2x128xf32, #tpu.memory_space<vmem>>, vector<2x128xf32>
    tpu.vector_store %arg22[%c0_178, %c0_179], %405 {strides = array<i32>} : memref<2x128xf32, #tpu.memory_space<vmem>>, vector<2x128xf32>,
    return
  }
  func.func @transform_0(%arg0: i32) -> (i32, i32) {
    %c0_i32 = arith.constant 0 : i32
    %c0_i32_0 = arith.constant 0 : i32
    %c0_i32_1 = arith.constant 0 : i32
    return %c0_i32, %c0_i32_0 : i32, i32
  }
  func.func @transform_1(%arg0: i32) -> (i32, i32) {
    %c0_i32 = arith.constant 0 : i32
    %c0_i32_0 = arith.constant 0 : i32
    %c0_i32_1 = arith.constant 0 : i32
    return %c0_i32, %c0_i32_0 : i32, i32
  }
  func.func @transform_2(%arg0: i32) -> (i32, i32) {
    %c0_i32 = arith.constant 0 : i32
    %c0_i32_0 = arith.constant 0 : i32
    %c0_i32_1 = arith.constant 0 : i32
    return %c0_i32, %c0_i32_0 : i32, i32
  }
  func.func @transform_3(%arg0: i32) -> (i32, i32, i32) {
    %c0_i32 = arith.constant 0 : i32
    %c0_i32_0 = arith.constant 0 : i32
    %c0_i32_1 = arith.constant 0 : i32
    %c0_i32_2 = arith.constant 0 : i32
    return %c0_i32, %c0_i32_0, %c0_i32_1 : i32, i32, i32
  }
  func.func @transform_4(%arg0: i32) -> (i32, i32, i32) {
    %c0_i32 = arith.constant 0 : i32
    %c0_i32_0 = arith.constant 0 : i32
    %c0_i32_1 = arith.constant 0 : i32
    %c0_i32_2 = arith.constant 0 : i32
    return %c0_i32, %c0_i32_0, %c0_i32_1 : i32, i32, i32
  }
  func.func @transform_5(%arg0: i32) -> (i32, i32, i32) {
    %c0_i32 = arith.constant 0 : i32
    %c0_i32_0 = arith.constant 0 : i32
    %c0_i32_1 = arith.constant 0 : i32
    %c0_i32_2 = arith.constant 0 : i32
    return %c0_i32, %c0_i32_0, %c0_i32_1 : i32, i32, i32
  }
  func.func @transform_6(%arg0: i32) -> (i32, i32, i32) {
    %c0_i32 = arith.constant 0 : i32
    %c0_i32_0 = arith.constant 0 : i32
    %c0_i32_1 = arith.constant 0 : i32
    %c0_i32_2 = arith.constant 0 : i32
    return %c0_i32, %c0_i32_0, %c0_i32_1 : i32, i32, i32
  }
  func.func @transform_7(%arg0: i32) -> (i32, i32, i32) {
    %c0_i32 = arith.constant 0 : i32
    %c0_i32_0 = arith.constant 0 : i32
    %c0_i32_1 = arith.constant 0 : i32
    %c0_i32_2 = arith.constant 0 : i32
    return %c0_i32, %c0_i32_0, %c0_i32_1 : i32, i32, i32
  }
  func.func @transform_8(%arg0: i32) -> (i32, i32, i32) {
    %c0_i32 = arith.constant 0 : i32
    %c0_i32_0 = arith.constant 0 : i32
    %c0_i32_1 = arith.constant 0 : i32
    %c0_i32_2 = arith.constant 0 : i32
    return %c0_i32, %c0_i32_0, %c0_i32_1 : i32, i32, i32
  }
  func.func @transform_9(%arg0: i32) -> (i32, i32, i32) {
    %c0_i32 = arith.constant 0 : i32
    %c0_i32_0 = arith.constant 0 : i32
    %c0_i32_1 = arith.constant 0 : i32
    %c0_i32_2 = arith.constant 0 : i32
    return %c0_i32, %c0_i32_0, %c0_i32_1 : i32, i32, i32
  }
  func.func @transform_10(%arg0: i32) -> (i32, i32, i32) {
    %c0_i32 = arith.constant 0 : i32
    %c0_i32_0 = arith.constant 0 : i32
    %c0_i32_1 = arith.constant 0 : i32
    %c0_i32_2 = arith.constant 0 : i32
    return %c0_i32, %c0_i32_0, %c0_i32_1 : i32, i32, i32
  }
  func.func @transform_11(%arg0: i32) -> (i32, i32, i32) {
    %c0_i32 = arith.constant 0 : i32
    %c0_i32_0 = arith.constant 0 : i32
    %c0_i32_1 = arith.constant 0 : i32
    %c0_i32_2 = arith.constant 0 : i32
    return %c0_i32, %c0_i32_0, %c0_i32_1 : i32, i32, i32
  }
  func.func @transform_12(%arg0: i32) -> (i32, i32, i32) {
    %c0_i32 = arith.constant 0 : i32
    %c0_i32_0 = arith.constant 0 : i32
    %c0_i32_1 = arith.constant 0 : i32
    %c0_i32_2 = arith.constant 0 : i32
    return %c0_i32, %c0_i32_0, %c0_i32_1 : i32, i32, i32
  }
  func.func @transform_13(%arg0: i32) -> (i32, i32, i32) {
    %c0_i32 = arith.constant 0 : i32
    %c0_i32_0 = arith.constant 0 : i32
    %c0_i32_1 = arith.constant 0 : i32
    %c0_i32_2 = arith.constant 0 : i32
    return %c0_i32, %c0_i32_0, %c0_i32_1 : i32, i32, i32
  }
  func.func @transform_14(%arg0: i32) -> (i32, i32, i32) {
    %c0_i32 = arith.constant 0 : i32
    %c0_i32_0 = arith.constant 0 : i32
    %c0_i32_1 = arith.constant 0 : i32
    %c0_i32_2 = arith.constant 0 : i32
    return %c0_i32, %c0_i32_0, %c0_i32_1 : i32, i32, i32
  }
  func.func @transform_15(%arg0: i32) -> (i32, i32) {
    %c0_i32 = arith.constant 0 : i32
    %c0_i32_0 = arith.constant 0 : i32
    %c0_i32_1 = arith.constant 0 : i32
    return %c0_i32, %c0_i32_0 : i32, i32
  }
  func.func @transform_16(%arg0: i32) -> (i32, i32) {
    %c0_i32 = arith.constant 0 : i32
    %c0_i32_0 = arith.constant 0 : i32
    %c0_i32_1 = arith.constant 0 : i32
    return %c0_i32, %c0_i32_0 : i32, i32
  }
  func.func @transform_17(%arg0: i32) -> (i32, i32) {
    %c0_i32 = arith.constant 0 : i32
    %c0_i32_0 = arith.constant 0 : i32
    %c0_i32_1 = arith.constant 0 : i32
    return %c0_i32, %c0_i32_0 : i32, i32
  }
  func.func @transform_18(%arg0: i32) -> (i32, i32) {
    %c0_i32 = arith.constant 0 : i32
    %c0_i32_0 = arith.constant 0 : i32
    %c0_i32_1 = arith.constant 0 : i32
    return %c0_i32, %c0_i32_0 : i32, i32
  }
  func.func @transform_19(%arg0: i32) -> (i32, i32) {
    %c0_i32 = arith.constant 0 : i32
    %c0_i32_0 = arith.constant 0 : i32
    %c0_i32_1 = arith.constant 0 : i32
    return %c0_i32, %c0_i32_0 : i32, i32
  }
  func.func @transform_20(%arg0: i32) -> (i32, i32) {
    %c0_i32 = arith.constant 0 : i32
    %c0_i32_0 = arith.constant 0 : i32
    %c0_i32_1 = arith.constant 0 : i32
    return %c0_i32, %c0_i32_0 : i32, i32
  }
  func.func @transform_21(%arg0: i32) -> (i32, i32) {
    %c0_i32 = arith.constant 0 : i32
    %c0_i32_0 = arith.constant 0 : i32
    %c0_i32_1 = arith.constant 0 : i32
    return %c0_i32, %c0_i32_0 : i32, i32
  }
}

</mosaic_0001>

<bundles_post_ra>
// kernel: tile.9
= control target key start
LH: loop header
LB: loop body
LE: loop exit
PB: predicated region body
PF: predicated region fallthrough
CT: control target
= control target key end

     0   :  { %vm3_vm0 = vcmask 261120   ;;  %s34_s0 = inlined_call_operand.vmem [shape: f32[2,5,32], index: 0, kind: input, shape index: {}]   ;;  %s35_s1 = inlined_call_operand.vmem [shape: f32[10,32], index: 1, kind: output, shape index: {}]  }
   0x1   :  { %v2_v0 = vld [vmem:[%s34_s0] sm:$0x1f]   ;;  %v10_v1 = vld [vmem:[%s34_s0 + $0x8] sm:$0x1f]  }
   0x2   :  { %4 = vst.msk [vmem:[%s35_s1] sm:$0x1f] %vm3_vm0, %v2_v0  }
   0x3   :  { %11 = vst.msk [vmem:[%s35_s1 + $0x5] sm:$0x1f] %vm3_vm0, %v10_v1  }

// kernel: vision_transformer_forward.1
= control target key start
LH: loop header
LB: loop body
LE: loop exit
PB: predicated region body
PF: predicated region fallthrough
CT: control target
= control target key end

     0   :  { %s4338_s0 = inlined_call_operand.vmem [shape: f32[10,192], index: 0, kind: input, shape index: {}]   ;;  %s4339_s1 = inlined_call_operand.vmem [shape: f32[10,32], index: 1, kind: input, shape index: {}]   ;;  %s4340_s2 = inlined_call_operand.vmem [shape: f32[192,32], index: 2, kind: input, shape index: {}]   ;;  %s4341_s3 = inlined_call_operand.vmem [shape: f32[2,1,32], index: 3, kind: input, shape index: {}]   ;;  %s4342_s4 = inlined_call_operand.vmem [shape: f32[2,1,32], index: 4, kind: input, shape index: {}]   ;;  %s4343_s5 = inlined_call_operand.vmem [shape: f32[2,32,96], index: 5, kind: input, shape index: {}]   ;;  %s4344_s6 = inlined_call_operand.vmem [shape: f32[2,1,96], index: 6, kind: input, shape index: {}]   ;;  %s4345_s7 = inlined_call_operand.vmem [shape: f32[2,32,32], index: 7, kind: input, shape index: {}]   ;;  %s4346_s8 = inlined_call_operand.vmem [shape: f32[2,1,32], index: 8, kind: input, shape index: {}]   ;;  %s4347_s9 = inlined_call_operand.vmem [shape: f32[2,1,32], index: 9, kind: input, shape index: {}]   ;;  %s4348_s10 = inlined_call_operand.vmem [shape: f32[2,1,32], index: 10, kind: input, shape index: {}]   ;;  %s4349_s11 = inlined_call_operand.vmem [shape: f32[2,32,128], index: 11, kind: input, shape index: {}]   ;;  %s4350_s12 = inlined_call_operand.vmem [shape: f32[2,1,128], index: 12, kind: input, shape index: {}]   ;;  %s4351_s13 = inlined_call_operand.vmem [shape: f32[2,128,32], index: 13, kind: input, shape index: {}]   ;;  %s4352_s14 = inlined_call_operand.vmem [shape: f32[2,1,32], index: 14, kind: input, shape index: {}]   ;;  %s4353_s15 = inlined_call_operand.vmem [shape: f32[1,32], index: 15, kind: input, shape index: {}]   ;;  %s4354_s16 = inlined_call_operand.vmem [shape: f32[1,32], index: 16, kind: input, shape index: {}]   ;;  %s4355_s17 = inlined_call_operand.vmem [shape: bf16[32,1024], index: 17, kind: input, shape index: {}]   ;;  %s4356_s18 = inlined_call_operand.vmem [shape: f32[1,1024], index: 18, kind: input, shape index: {}]   ;;  %s4357_s19 = inlined_call_operand.vmem [shape: bf16[1024,128], index: 19, kind: input, shape index: {}]   ;;  %s4358_s20 = inlined_call_operand.vmem [shape: f32[1,128], index: 20, kind: input, shape index: {}]   ;;  %s4359_s21 = inlined_call_operand.hbm [shape: f32[2,128], index: 21, kind: output, shape index: {}]  }
   0x1   :  { %4390 = sst [smem:[#allocation5_spill]] %s4338_s0 }
   0x2   :  { %4391 = sst [smem:[#allocation6_spill]] %s4339_s1 }
   0x3   :  { %4392 = sst [smem:[#allocation7_spill]] %s4340_s2 }
   0x4   :  { %4393 = sst [smem:[#allocation8_spill]] %s4341_s3 }
   0x5   :  { %4394 = sst [smem:[#allocation9_spill]] %s4342_s4 }
   0x6   :  { %4395 = sst [smem:[#allocation10_spill]] %s4343_s5 }
   0x7   :  { %s4396_s26 = sld [smem:[#allocation7_spill]]  ;;  %vm100_vm0 = vcmask 523264  }
   0x8   :  { %s4397_s22 = sld [smem:[#allocation5_spill]] }
   0xd   :  { %v89_v0 = vld [vmem:[%s4396_s26 + $0x78] sm:$0xff]  ;;  %v88_v1 = vld [vmem:[%s4396_s26 + $0x70] sm:$0xff]  ;;  %v87_v2 = vld [vmem:[%s4396_s26 + $0x68] sm:$0xff] }
   0xe   :  { %107 = vmatpush.msra.mxu0 %v89_v0  ;;  %v97_v3 = vld [vmem:[%s4396_s26 + $0xb8] sm:$0xff]  ;;  %v86_v4 = vld [vmem:[%s4396_s26 + $0x60] sm:$0xff]  ;;  %v96_v5 = vld [vmem:[%s4396_s26 + $0xb0] sm:$0xff] }
   0xf   :  { %138 = vmatpush.msra.mxu1 %v97_v3  ;;  %v95_v6 = vld [vmem:[%s4396_s26 + $0xa8] sm:$0xff]  ;;  %v85_v7 = vld [vmem:[%s4396_s26 + $0x58] sm:$0xff]  ;;  %v94_v8 = vld [vmem:[%s4396_s26 + $0xa0] sm:$0xff] }
  0x10   :  { %108 = vmatpush.msra.mxu0 %v88_v1  ;;  %v84_v9 = vld [vmem:[%s4396_s26 + $0x50] sm:$0xff]  ;;  %v83_v10 = vld [vmem:[%s4396_s26 + $0x48] sm:$0xff]  ;;  %v93_v11 = vld [vmem:[%s4396_s26 + $0x98] sm:$0xff] }
  0x11   :  { %139 = vmatpush.msra.mxu1 %v96_v5  ;;  %v92_v12 = vld [vmem:[%s4396_s26 + $0x90] sm:$0xff]  ;;  %v82_v13 = vld [vmem:[%s4396_s26 + $0x40] sm:$0xff]  ;;  %v91_v14 = vld [vmem:[%s4396_s26 + $0x88] sm:$0xff] }
  0x12   :  { %109 = vmatpush.msra.mxu0 %v87_v2  ;;  %v81_v15 = vld [vmem:[%s4396_s26 + $0x38] sm:$0xff]  ;;  %v90_v16 = vld [vmem:[%s4396_s26 + $0x80] sm:$0xff]  ;;  %v80_v17 = vld [vmem:[%s4396_s26 + $0x30] sm:$0xff] }
  0x13   :  { %140 = vmatpush.msra.mxu1 %v95_v6  ;;  %v71_v18 = vld [vmem:[%s4397_s22 + $0x8] sm:$0xff] }
  0x14   :  { %110 = vmatpush.msra.mxu0 %v86_v4 }
  0x15   :  { %141 = vmatpush.msra.mxu1 %v94_v8 }
  0x16   :  { %111 = vmatpush.msra.mxu0 %v85_v7 }
  0x17   :  { %142 = vmatpush.msra.mxu1 %v93_v11 }
  0x18   :  { %112 = vmatpush.msra.mxu0 %v84_v9 }
  0x19   :  { %143 = vmatpush.msra.mxu1 %v92_v12 }
  0x1a   :  { %113 = vmatpush.msra.mxu0 %v83_v10 }
  0x1b   :  { %144 = vmatpush.msra.mxu1 %v91_v14 }
  0x1c   :  { %114 = vmatpush.msra.mxu0 %v82_v13 }
  0x1d   :  { %26 = vsyncpa [#allocation3], 0  ;;  %v79_v19 = vld [vmem:[%s4396_s26 + $0x28] sm:$0xff]  ;;  %145 = vmatpush.msra.mxu1 %v90_v16  ;;  %v78_v20 = vld [vmem:[%s4396_s26 + $0x20] sm:$0xff]  ;;  %s4398_s28 = sld [smem:[#allocation6_spill]]  ;;  %vm190_vm1 = vcmask 254976  }
  0x1e   :  { %115 = vmatpush.msra.mxu0 %v81_v15  ;;  %2556 = vmatmul.msk.f32.vlgmr.msra.gmra.mxu1 %vm100_vm0, %v71_v18  ;;  %v77_v21 = vld [vmem:[%s4396_s26 + $0x18] sm:$0xff]  ;;  %v76_v22 = vld [vmem:[%s4396_s26 + $0x10] sm:$0xff]  ;;  %v75_v24 = vld [vmem:[%s4396_s26 + $0x8] sm:$0xff]  ;;  %vm186_vm2 = vcmask 261120   ;;  %v3228_v40 = vmov 32.0   ;;  %s4399_s4 = sld [smem:[#allocation10_spill]] }
  0x1f   :  { %v73_v23 = vld [vmem:[%s4397_s22 + $0x18] sm:$0x3]  ;;  %v74_v25 = vld [vmem:[%s4396_s26] sm:$0xff]  ;;  %v72_v27 = vld [vmem:[%s4397_s22 + $0x10] sm:$0x3]  ;;  %3110 = vrcp.f32 %v3228_v40  ;;  %s4400_s3 = sld [smem:[#allocation8_spill]] }
  0x20   :  { %116 = vmatpush.msra.mxu0 %v80_v17  ;;  %v70_v26 = vld [vmem:[%s4397_s22] sm:$0xff]  ;;  %s4401_s29 = sld [smem:[#allocation9_spill]]  ;;  %s3229_s30 = smov 96   ;;  %vm292_vm10 = vcmask 64512  }
  0x21   :  { %s4382_s5 = smov 64   ;;  %s4388_s23 = smov 120  }
  0x22   :  { %117 = vmatpush.msra.mxu0 %v79_v19  ;;  %s4378_s1 = smov 80   ;;  %s3234_s24 = smov 88  }
  0x23   :  { %v99_v30 = vld [vmem:[%s4398_s28 + $0x8] sm:$0x3]  ;;  %v98_v34 = vld [vmem:[%s4398_s28] sm:$0xff]  ;;  %s4380_s2 = smov 72   ;;  %s4376_s25 = smov 112  }
  0x24   :  { %118 = vmatpush.msra.mxu0 %v78_v20  ;;  %v252_v57 = vld [vmem:[%s4399_s4 + $0x18] sm:$0xff]  ;;  %v251_v58 = vld [vmem:[%s4399_s4 + $0x10] sm:$0xff]  ;;  %v250_v59 = vld [vmem:[%s4399_s4 + $0x8] sm:$0xff]  ;;  %s4374_s27 = smov 104   ;;  %s4372_s28 = smov 56  }
  0x25   :  { %v3111_v41 = vpop.eup %3110  ;;  %3070 = vmatpush.msra.mxu3 %v252_v57  ;;  %275 = vmatpush.msra.mxu2 %v252_v57  ;;  %v249_v60 = vld [vmem:[%s4399_s4] sm:$0xff]  ;;  %s4368_s26 = smov 48   ;;  %s4370_s22 = smov 40  }
  0x26   :  { %119 = vmatpush.msra.mxu0 %v77_v21  ;;  %2557 = vmatmul.msk.f32.gmra.mxu1 %vm100_vm0, %v73_v23  ;;  %v195_v42 = vmul.f32 32.0, %v3111_v41  ;;  %vm199_vm3 = vweird.f32 %v3111_v41  ;;  %v3091_v11 = vld [vmem:[%s4400_s3] ss:$0 sm:$0xff]  ;;  %s4366_s0 = smov 8  }
  0x27   :  { %3071 = vmatpush.msra.mxu3 %v251_v58  ;;  %276 = vmatpush.msra.mxu2 %v251_v58  ;;  %v3092_v15 = vld [vmem:[%s4401_s29] ss:$0 sm:$0xff] }
  0x28   :  { %120 = vmatpush.msra.mxu0 %v76_v22  ;;  %v196_v43 = vsub.f32 1.0, %v195_v42 }
  0x29   :  { %3072 = vmatpush.msra.mxu3 %v250_v59  ;;  %277 = vmatpush.msra.mxu2 %v250_v59 }
  0x2a   :  { %121 = vmatpush.msra.mxu0 %v75_v24  ;;  %v197_v44 = vmul.f32 %v3111_v41, %v196_v43 }
  0x2b   :  { %3073 = vmatpush.msra.mxu3 %v249_v60  ;;  %278 = vmatpush.msra.mxu2 %v249_v60 }
  0x2c   :  { %122 = vmatpush.msra.mxu0 %v74_v25  ;;  %v198_v45 = vadd.f32 %v3111_v41, %v197_v44  ;;  %v3093_v25 = vld [vmem:[%s4344_s6] ss:$0 sm:$0xff] }
  0x2d   :  { %123 = vmatmul.f32.vlgmr.msra.gmra.mxu0 %v70_v26 }
  0x2e   :  { %v3455_v46 = vsel %vm199_vm3, %v3111_v41, %v198_v45 }
  0x35   :  { %126 = vmatmul.f32.gmra.mxu0 %v72_v27 }
  0x9b   :  { %v147_v28 = vpop.f32.mrf.mxu1 }
  0xa3   :  { %v150_v32 = vpop.f32.mrf.mxu1 }
  0xaa   :  { %v124_v29 = vpop.f32.mrf.mxu0 }
  0xab   :  { %v125_v36 = vadd.f32 %v124_v29, %v98_v34 }
  0xad   :  { %v3451_v38 = vadd.f32 %v147_v28, %v125_v36 }
  0xaf   :  { %v187_v39 = vsel %vm186_vm2, %v3451_v38, 0.0 }
  0xb2   :  { %v127_v31 = vpop.f32.mrf.mxu0 }
  0xb3   :  { %v128_v33 = vadd.f32 %v127_v31, %v99_v30 }
  0xb5   :  { %v3447_v35 = vadd.f32 %v150_v32, %v128_v33  ;;  %v153_v32 = vlaneseq }
  0xb7   :  { %v191_v37 = vsel %vm190_vm1, %v3447_v35, 0.0  ;;  %v157_v33 = vand.u32 127, %v153_v32  ;;  %v154_v34 = vshrl.u32 %v153_v32, 7 }
  0xb8   :  { %192 = vadd.xlane.f32.xlu0 %v191_v37 }
  0xb9   :  { %vm175_vm11 = vcmp.ge.s32.totalorder %v157_v33, 5  ;;  %vm176_vm12 = vcmp.lt.s32.totalorder %v157_v33, 10  ;;  %vm160_vm13 = vcmp.lt.s32.totalorder %v154_v34, 5  ;;  %vm165_vm14 = vcmp.lt.s32.totalorder %v157_v33, 5 }
  0xba   :  { %vm169_vm15 = vcmp.ge.s32.totalorder %v154_v34, 5  ;;  %vm177_vm0 = vmand %vm175_vm11, %vm176_vm12  ;;  %v155_v36 = vadd.s32 8, %v154_v34  ;;  %vm363_vm11 = vcmask 1041408   ;;  %vm718_vm12 = vcmask 130048  }
  0xbb   :  { %vm167_vm3 = vmand %vm160_vm13, %vm165_vm14  ;;  %vm721_vm13 = vcmask 195584  }
  0xc0   :  { %188 = vadd.xlane.f32.xlu0 %v187_v39  ;;  %v3233_v39 = vmov -1e+30  }
 0x12b   :  { %v193_v47 = vpop.xlane.xlu0 %192 }
 0x12c   :  { %v202_v48 = vmul.f32 %v3455_v46, %v193_v47 }
 0x12e   :  { %v204_v49 = vsub.f32 %v3447_v35, %v202_v48 }
 0x130   :  { %v206_v50 = vmul.f32 %v204_v49, %v204_v49 }
 0x132   :  { %v210_v51 = vsel %vm190_vm1, %v206_v50, 0.0 }
 0x133   :  { %211 = vadd.xlane.f32.xlu1 %v210_v51  ;;  %v189_v52 = vpop.xlane.xlu0 %188 }
 0x134   :  { %v201_v53 = vmul.f32 %v3455_v46, %v189_v52 }
 0x136   :  { %v203_v54 = vsub.f32 %v3451_v38, %v201_v53 }
 0x138   :  { %v205_v55 = vmul.f32 %v203_v54, %v203_v54 }
 0x13a   :  { %v207_v56 = vsel %vm186_vm2, %v205_v55, 0.0 }
 0x13b   :  { %208 = vadd.xlane.f32.xlu1 %v207_v56 }
 0x1a6   :  { %v212_v61 = vpop.xlane.xlu1 %211 }
 0x1a7   :  { %v214_v62 = vmul.f32 %v212_v61, %v3455_v46 }
 0x1a9   :  { %v216_v63 = vadd.f32 1e-06, %v214_v62 }
 0x1ab   :  { %3112 = vrsqrt.f32 %v216_v63  ;;  %vm233_vm5 = vweird.f32 %v216_v63 }
 0x1ae   :  { %v209_v0 = vpop.xlane.xlu1 %208 }
 0x1af   :  { %v213_v1 = vmul.f32 %v209_v0, %v3455_v46 }
 0x1b1   :  { %v3113_v2 = vpop.eup %3112  ;;  %v215_v3 = vadd.f32 1e-06, %v213_v1 }
 0x1b2   :  { %v228_v4 = vmul.f32 %v3113_v2, %v216_v63  ;;  %vm234_vm4 = vweird.f32 %v3113_v2 }
 0x1b3   :  { %3114 = vrsqrt.f32 %v215_v3  ;;  %vm235_vm6 = vmor %vm233_vm5, %vm234_vm4  ;;  %vm223_vm8 = vweird.f32 %v215_v3 }
 0x1b4   :  { %v229_v5 = vmul.f32 %v3113_v2, %v228_v4  ;;  %vm178_vm4 = vmand %vm169_vm15, %vm177_vm0 }
 0x1b5   :  { %vm180_vm5 = vmor %vm167_vm3, %vm178_vm4 }
 0x1b6   :  { %v230_v6 = vmul.f32 0.5, %v229_v5  ;;  %v3510_v40 = vsel %vm180_vm5, 0.0, %v3233_v39 }
 0x1b8   :  { %v231_v7 = vsub.f32 1.5, %v230_v6 }
 0x1b9   :  { %v3115_v8 = vpop.eup %3114 }
 0x1ba   :  { %v232_v9 = vmul.f32 %v3113_v2, %v231_v7  ;;  %v218_v10 = vmul.f32 %v3115_v8, %v215_v3  ;;  %vm224_vm7 = vweird.f32 %v3115_v8 }
 0x1bb   :  { %vm225_vm9 = vmor %vm223_vm8, %vm224_vm7  ;;  %vm172_vm7 = vcmp.lt.s32.totalorder %v155_v36, 10 }
 0x1bc   :  { %v236_v12 = vsel %vm235_vm6, %v3113_v2, %v232_v9  ;;  %v219_v13 = vmul.f32 %v3115_v8, %v218_v10  ;;  %vm328_vm6 = vcmask 80896   ;;  %vm179_vm8 = vmand %vm172_vm7, %vm177_vm0 }
 0x1bd   :  { %v238_v14 = vmul.f32 %v236_v12, %v204_v49  ;;  %v3514_v45 = vsel %vm179_vm8, 0.0, %v3233_v39 }
 0x1be   :  { %v220_v16 = vmul.f32 0.5, %v219_v13 }
 0x1bf   :  { %v243_v17 = vmul.f32 %v3091_v11, %v238_v14 }
 0x1c0   :  { %v221_v18 = vsub.f32 1.5, %v220_v16 }
 0x1c1   :  { %v248_v19 = vadd.f32 %v3092_v15, %v243_v17 }
 0x1c2   :  { %v222_v20 = vmul.f32 %v3115_v8, %v221_v18 }
 0x1c3   :  { %2559 = vmatmul.msk.f32.vlgmr.msra.gmra.mxu3 %vm186_vm2, %v248_v19 }
 0x1c4   :  { %v226_v21 = vsel %vm225_vm9, %v3115_v8, %v222_v20  ;;  %vm332_vm9 = vcmask 74752  }
 0x1c5   :  { %v237_v22 = vmul.f32 %v226_v21, %v203_v54 }
 0x1c7   :  { %v242_v23 = vmul.f32 %v3091_v11, %v237_v22 }
 0x1c9   :  { %v247_v24 = vadd.f32 %v3092_v15, %v242_v23 }
 0x1cb   :  { %2558 = vmatmul.msk.f32.vlgmr.msra.gmra.mxu2 %vm186_vm2, %v247_v24 }
 0x246   :  { %v283_v26 = vpop.f32.mrf.mxu3 }
 0x247   :  { %v3488_v27 = vadd.f32 %v3093_v25, %v283_v26 }
 0x249   :  { %290 = vrot.lane.b32.xlu2 %v3488_v27, %s3229_s30 }
 0x24e   :  { %v280_v28 = vpop.f32.mrf.mxu2 }
 0x24f   :  { %v3492_v29 = vadd.f32 %v3093_v25, %v280_v28 }
 0x251   :  { %352 = vrot.lane.b32.xlu1 %v3492_v29, %s4382_s5  ;;  %288 = vrot.lane.b32.xlu2 %v3492_v29, %s3229_s30 }
 0x259   :  { %389 = vrot.lane.b32.xlu1 %v3492_v29, %s4388_s23  ;;  %496 = vrot.lane.b32.xlu2 %v3488_v27, %s4378_s1 }
 0x261   :  { %391 = vrot.lane.b32.xlu1 %v3488_v27, %s4388_s23  ;;  %s4412_s23 = smov 16  }
 0x2a3   :  { %v291_v30 = vpop.permute.xlu2 %290 }
 0x2a4   :  { %2560 = vmatpush.xpose.msk.msrb.mxu3 %vm292_vm10, %v291_v30 }
 0x2ab   :  { %v289_v31 = vpop.permute.xlu2 %288 }
 0x2ac   :  { %2561 = vmatpush.xpose.msk.msrb.mxu3 %vm292_vm10, %v289_v31 }
 0x2af   :  { %2562 = vmatmul.msk.f32.vlgmr.msrb.gmra.mxu3 %vm292_vm10, %v3492_v29 }
 0x2b3   :  { %v497_v0 = vpop.permute.xlu2 %496 }
 0x2b7   :  { %2563 = vmatmul.msk.f32.gmra.mxu3 %vm292_vm10, %v3488_v27 }
 0x2c3   :  { %v353_v50 = vpop.permute.xlu1 %352 }
 0x2cb   :  { %v390_v51 = vpop.permute.xlu1 %389 }
 0x2d3   :  { %v392_v52 = vpop.permute.xlu1 %391 }
 0x332   :  { %v318_v37 = vpop.f32.mrf.mxu3 }
 0x333   :  { %v324_v41 = vmul.f32 0.35355338, %v318_v37 }
 0x335   :  { %v326_v42 = vadd.f32 %v324_v41, %v3510_v40 }
 0x337   :  { %v329_v43 = vsel %vm328_vm6, %v326_v42, -inf }
 0x338   :  { %330 = vmax.xlane.f32.xlu0 %v329_v43 }
 0x33a   :  { %v321_v44 = vpop.f32.mrf.mxu3 }
 0x33b   :  { %v325_v47 = vmul.f32 0.35355338, %v321_v44 }
 0x33d   :  { %v327_v48 = vadd.f32 %v325_v47, %v3514_v45 }
 0x33f   :  { %v333_v49 = vsel %vm332_vm9, %v327_v48, -inf }
 0x340   :  { %334 = vmax.xlane.f32.xlu1 %v333_v49 }
 0x34c   :  { %354 = vrot.lane.b32.xlu0 %v3488_v27, %s4382_s5  ;;  %s4408_s5 = smov 56  }
 0x354   :  { %395 = vrot.lane.b32.xlu0 %v3488_v27, %s3234_s24 }
 0x359   :  { %597 = vrot.lane.b32.xlu1 %v3488_v27, %s4380_s2 }
 0x35c   :  { %393 = vrot.lane.b32.xlu0 %v3492_v29, %s3234_s24 }
 0x364   :  { %494 = vrot.lane.b32.xlu0 %v3492_v29, %s4378_s1  ;;  %s4409_s1 = smov 40  }
 0x36c   :  { %490 = vrot.lane.b32.xlu0 %v3492_v29, %s4376_s25 }
 0x374   :  { %492 = vrot.lane.b32.xlu0 %v3488_v27, %s4376_s25  ;;  %s4411_s25 = smov 8  }
 0x37c   :  { %593 = vrot.lane.b32.xlu0 %v3488_v27, %s4374_s27 }
 0x3ab   :  { %v331_v53 = vpop.xlane.xlu0 %330 }
 0x3ac   :  { %v336_v54 = vsub.f32 %v326_v42, %v331_v53 }
 0x3ae   :  { %v338_v55 = vmul.f32 1.442695, %v336_v54 }
 0x3b0   :  { %3116 = vpow2.f32 %v338_v55 }
 0x3b3   :  { %v335_v56 = vpop.xlane.xlu1 %334 }
 0x3b4   :  { %v337_v57 = vsub.f32 %v327_v48, %v335_v56 }
 0x3b6   :  { %v3117_v58 = vpop.eup %3116  ;;  %v340_v59 = vmul.f32 1.442695, %v337_v57 }
 0x3b7   :  { %v342_v60 = vsel %vm328_vm6, %v3117_v58, 0.0 }
 0x3b8   :  { %3118 = vpow2.f32 %v340_v59  ;;  %343 = vadd.xlane.f32.xlu2 %v342_v60 }
 0x3be   :  { %v3119_v61 = vpop.eup %3118  ;;  %v355_v62 = vpop.permute.xlu0 %354 }
 0x3bf   :  { %2564 = vmatpush.msk.msrb.mxu2 %vm363_vm11, %v355_v62  ;;  %v345_v63 = vsel %vm332_vm9, %v3119_v61, 0.0 }
 0x3c0   :  { %346 = vadd.xlane.f32.xlu1 %v345_v63 }
 0x3c1   :  { %381 = vmatpush.msrb.mxu2 %v353_v50 }
 0x3c3   :  { %2574 = vmatpush.xpose.msk.msra.mxu2 %vm292_vm10, %v497_v0 }
 0x3c6   :  { %v396_v1 = vpop.permute.xlu0 %395 }
 0x3c7   :  { %2567 = vmatpush.xpose.msk.msra.mxu3 %vm292_vm10, %v396_v1 }
 0x3cb   :  { %v598_v2 = vpop.permute.xlu1 %597 }
 0x3cc   :  { %2581 = vmatpush.xpose.msk.msrb.mxu0 %vm292_vm10, %v598_v2 }
 0x3ce   :  { %v394_v3 = vpop.permute.xlu0 %393 }
 0x3cf   :  { %2568 = vmatpush.xpose.msk.msra.mxu3 %vm292_vm10, %v394_v3 }
 0x3d0   :  { %591 = vrot.lane.b32.xlu2 %v3492_v29, %s4374_s27 }
 0x3d2   :  { %2569 = vmatmul.msk.f32.vlgmr.msra.gmra.mxu3 %vm292_vm10, %v390_v51 }
 0x3d6   :  { %v495_v4 = vpop.permute.xlu0 %494 }
 0x3d7   :  { %2575 = vmatpush.xpose.msk.msra.mxu2 %vm292_vm10, %v495_v4 }
 0x3d9   :  { %595 = vrot.lane.b32.xlu1 %v3492_v29, %s4380_s2  ;;  %s4410_s2 = smov 48  }
 0x3da   :  { %2570 = vmatmul.msk.f32.gmra.mxu3 %vm292_vm10, %v392_v52 }
 0x3de   :  { %v491_v11 = vpop.permute.xlu0 %490 }
 0x3e6   :  { %v493_v13 = vpop.permute.xlu0 %492 }
 0x3ee   :  { %v594_v16 = vpop.permute.xlu0 %593 }
 0x42b   :  { %v344_v5 = vpop.xlane.xlu2 %343 }
 0x42c   :  { %3120 = vrcp.f32 %v344_v5 }
 0x432   :  { %v3121_v6 = vpop.eup %3120 }
 0x433   :  { %v347_v7 = vpop.xlane.xlu1 %346  ;;  %v350_v8 = vmul.f32 %v3121_v6, %v3117_v58  ;;  %v592_v14 = vpop.permute.xlu2 %591 }
 0x434   :  { %3122 = vrcp.f32 %v347_v7 }
 0x435   :  { %2565 = vmatmul.msk.f32.vlgmr.msrb.gmra.mxu2 %vm328_vm6, %v350_v8 }
 0x43a   :  { %v3123_v9 = vpop.eup %3122 }
 0x43b   :  { %v351_v10 = vmul.f32 %v3123_v9, %v3119_v61 }
 0x43d   :  { %2566 = vmatmul.msk.f32.gmra.mxu2 %vm328_vm6, %v351_v10 }
 0x445   :  { %2576 = vmatmul.msk.f32.vlgmr.msra.gmra.mxu2 %vm292_vm10, %v491_v11 }
 0x44b   :  { %v596_v12 = vpop.permute.xlu1 %595 }
 0x44c   :  { %2582 = vmatpush.xpose.msk.msrb.mxu0 %vm292_vm10, %v596_v12 }
 0x44d   :  { %2577 = vmatmul.msk.f32.gmra.mxu2 %vm292_vm10, %v493_v13 }
 0x44f   :  { %2583 = vmatmul.msk.f32.vlgmr.msrb.gmra.mxu0 %vm292_vm10, %v592_v14 }
 0x455   :  { %v422_v15 = vpop.f32.mrf.mxu3 }
 0x456   :  { %v428_v17 = vmul.f32 0.35355338, %v422_v15 }
 0x457   :  { %2584 = vmatmul.msk.f32.gmra.mxu0 %vm292_vm10, %v594_v16 }
 0x458   :  { %v430_v18 = vadd.f32 %v428_v17, %v3510_v40 }
 0x45a   :  { %v432_v19 = vsel %vm328_vm6, %v430_v18, -inf }
 0x45b   :  { %433 = vmax.xlane.f32.xlu1 %v432_v19 }
 0x45d   :  { %v425_v20 = vpop.f32.mrf.mxu3 }
 0x45e   :  { %v429_v21 = vmul.f32 0.35355338, %v425_v20 }
 0x460   :  { %v431_v22 = vadd.f32 %v429_v21, %v3514_v45 }
 0x462   :  { %v435_v23 = vsel %vm332_vm9, %v431_v22, -inf }
 0x463   :  { %436 = vmax.xlane.f32.xlu2 %v435_v23 }
 0x4b8   :  { %v3559_v24 = vpop.f32.mrf.mxu2 }
 0x4c0   :  { %v3561_v25 = vpop.f32.mrf.mxu2 }
 0x4c8   :  { %v523_v26 = vpop.f32.mrf.mxu2 }
 0x4c9   :  { %v529_v51 = vmul.f32 0.35355338, %v523_v26 }
 0x4cb   :  { %v531_v55 = vadd.f32 %v529_v51, %v3510_v40 }
 0x4cc   :  { %v624_v28 = vpop.f32.mrf.mxu0 }
 0x4cd   :  { %v630_v30 = vmul.f32 0.35355338, %v624_v28  ;;  %v533_v56 = vsel %vm328_vm6, %v531_v55, -inf }
 0x4ce   :  { %v434_v31 = vpop.xlane.xlu1 %433 }
 0x4cf   :  { %v438_v32 = vsub.f32 %v430_v18, %v434_v31  ;;  %v632_v33 = vadd.f32 %v630_v30, %v3510_v40 }
 0x4d0   :  { %v526_v34 = vpop.f32.mrf.mxu2 }
 0x4d1   :  { %v440_v36 = vmul.f32 1.442695, %v438_v32  ;;  %v530_v37 = vmul.f32 0.35355338, %v526_v34  ;;  %v634_v39 = vsel %vm328_vm6, %v632_v33, -inf }
 0x4d2   :  { %635 = vmax.xlane.f32.xlu2 %v634_v39 }
 0x4d3   :  { %3124 = vpow2.f32 %v440_v36  ;;  %v532_v41 = vadd.f32 %v530_v37, %v3514_v45 }
 0x4d4   :  { %v627_v42 = vpop.f32.mrf.mxu0 }
 0x4d5   :  { %v631_v43 = vmul.f32 0.35355338, %v627_v42  ;;  %v536_v44 = vsel %vm332_vm9, %v532_v41, -inf }
 0x4d6   :  { %537 = vmax.xlane.f32.xlu1 %v536_v44  ;;  %v437_v47 = vpop.xlane.xlu2 %436 }
 0x4d7   :  { %v3568_v48 = vadd.f32 %v631_v43, %v3514_v45  ;;  %v439_v49 = vsub.f32 %v431_v22, %v437_v47 }
 0x4d9   :  { %v3125_v50 = vpop.eup %3124  ;;  %v637_v52 = vsel %vm332_vm9, %v3568_v48, -inf  ;;  %v442_v54 = vmul.f32 1.442695, %v439_v49 }
 0x4da   :  { %638 = vmax.xlane.f32.xlu0 %v637_v52  ;;  %v444_v53 = vsel %vm328_vm6, %v3125_v50, 0.0  ;;  %v727_v52 = vld [vmem:[%s4345_s7 + $0x18] sm:$0xff] }
 0x4db   :  { %445 = vadd.xlane.f32.xlu2 %v444_v53  ;;  %3126 = vpow2.f32 %v442_v54  ;;  %v726_v53 = vld [vmem:[%s4345_s7 + $0x10] sm:$0xff]  ;;  %750 = vmatpush.msrb.mxu2 %v727_v52  ;;  %v725_v54 = vld [vmem:[%s4345_s7 + $0x8] sm:$0xff] }
 0x4dd   :  { %751 = vmatpush.msrb.mxu2 %v726_v53 }
 0x4df   :  { %752 = vmatpush.msrb.mxu2 %v725_v54 }
 0x4e1   :  { %v3127_v57 = vpop.eup %3126 }
 0x4e2   :  { %534 = vmax.xlane.f32.xlu0 %v533_v56  ;;  %v447_v58 = vsel %vm332_vm9, %v3127_v57, 0.0 }
 0x4ea   :  { %448 = vadd.xlane.f32.xlu0 %v447_v58 }
 0x4ef   :  { %456 = vrot.lane.b32.xlu1 %v3488_v27, %s4372_s28 }
 0x4f3   :  { %454 = vrot.lane.b32.xlu2 %v3492_v29, %s4372_s28  ;;  %s4402_s28 = smov 120  }
 0x4fe   :  { %557 = vrot.lane.b32.xlu0 %v3488_v27, %s4368_s26 }
 0x545   :  { %v636_v59 = vpop.xlane.xlu2 %635 }
 0x546   :  { %v640_v60 = vsub.f32 %v632_v33, %v636_v59 }
 0x548   :  { %v642_v61 = vmul.f32 1.442695, %v640_v60 }
 0x549   :  { %v538_v62 = vpop.xlane.xlu1 %537 }
 0x54a   :  { %3128 = vpow2.f32 %v642_v61  ;;  %v540_v63 = vsub.f32 %v532_v41, %v538_v62 }
 0x54c   :  { %v543_v0 = vmul.f32 1.442695, %v540_v63 }
 0x54d   :  { %v639_v1 = vpop.xlane.xlu0 %638 }
 0x54e   :  { %3130 = vpow2.f32 %v543_v0  ;;  %v446_v7 = vpop.xlane.xlu2 %445  ;;  %v641_v20 = vsub.f32 %v3568_v48, %v639_v1 }
 0x54f   :  { %3132 = vrcp.f32 %v446_v7 }
 0x550   :  { %v3129_v2 = vpop.eup %3128  ;;  %v644_v21 = vmul.f32 1.442695, %v641_v20  ;;  %v821_v20 = vld [vmem:[%s4349_s11 + $0x10] sm:$0xff] }
 0x551   :  { %v646_v3 = vsel %vm328_vm6, %v3129_v2, 0.0 }
 0x552   :  { %647 = vadd.xlane.f32.xlu1 %v646_v3 }
 0x554   :  { %v3131_v4 = vpop.eup %3130 }
 0x555   :  { %v535_v5 = vpop.xlane.xlu0 %534  ;;  %v548_v6 = vsel %vm332_vm9, %v3131_v4, 0.0  ;;  %v3133_v10 = vpop.eup %3132 }
 0x556   :  { %v539_v8 = vsub.f32 %v531_v55, %v535_v5  ;;  %549 = vadd.xlane.f32.xlu2 %v548_v6  ;;  %v455_v15 = vpop.permute.xlu2 %454  ;;  %v452_v16 = vmul.f32 %v3133_v10, %v3125_v50  ;;  %v724_v55 = vld [vmem:[%s4345_s7] sm:$0xff] }
 0x557   :  { %753 = vmatpush.msrb.mxu2 %v724_v55 }
 0x558   :  { %v541_v9 = vmul.f32 1.442695, %v539_v8 }
 0x55a   :  { %3134 = vpow2.f32 %v541_v9 }
 0x55d   :  { %v449_v11 = vpop.xlane.xlu0 %448 }
 0x55e   :  { %3136 = vrcp.f32 %v449_v11 }
 0x55f   :  { %3138 = vpow2.f32 %v644_v21  ;;  %v820_v21 = vld [vmem:[%s4349_s11 + $0x8] sm:$0xff] }
 0x560   :  { %v3135_v12 = vpop.eup %3134 }
 0x561   :  { %v457_v13 = vpop.permute.xlu1 %456  ;;  %v545_v14 = vsel %vm328_vm6, %v3135_v12, 0.0 }
 0x562   :  { %2571 = vmatpush.msk.msrb.mxu1 %vm363_vm11, %v457_v13  ;;  %546 = vadd.xlane.f32.xlu0 %v545_v14 }
 0x564   :  { %482 = vmatpush.msrb.mxu1 %v455_v15  ;;  %v3137_v17 = vpop.eup %3136 }
 0x565   :  { %2572 = vmatmul.msk.f32.vlgmr.msrb.gmra.mxu1 %vm328_vm6, %v452_v16  ;;  %v453_v18 = vmul.f32 %v3137_v17, %v3127_v57  ;;  %v3139_v22 = vpop.eup %3138 }
 0x566   :  { %v649_v23 = vsel %vm332_vm9, %v3139_v22, 0.0 }
 0x56b   :  { %656 = vrot.lane.b32.xlu1 %v3492_v29, %s4370_s22 }
 0x56d   :  { %2573 = vmatmul.msk.f32.gmra.mxu1 %vm328_vm6, %v453_v18 }
 0x570   :  { %v558_v19 = vpop.permute.xlu0 %557 }
 0x571   :  { %2578 = vmatpush.msk.msrb.mxu3 %vm363_vm11, %v558_v19  ;;  %v822_v19 = vld [vmem:[%s4349_s11 + $0x18] sm:$0xff] }
 0x576   :  { %555 = vrot.lane.b32.xlu0 %v3492_v29, %s4368_s26  ;;  %s4386_s26 = smov 24  }
 0x57e   :  { %658 = vrot.lane.b32.xlu0 %v3488_v27, %s4370_s22  ;;  %s4404_s22 = smov 72  }
 0x5a8   :  { %650 = vadd.xlane.f32.xlu0 %v649_v23 }
 0x5c5   :  { %v648_v29 = vpop.xlane.xlu1 %647 }
 0x5c9   :  { %v550_v30 = vpop.xlane.xlu2 %549 }
 0x5d5   :  { %v547_v26 = vpop.xlane.xlu0 %546 }
 0x5d6   :  { %3140 = vrcp.f32 %v547_v26 }
 0x5d7   :  { %3142 = vrcp.f32 %v550_v30 }
 0x5d8   :  { %3144 = vrcp.f32 %v648_v29 }
 0x5dc   :  { %v3141_v31 = vpop.eup %3140 }
 0x5dd   :  { %v553_v32 = vmul.f32 %v3141_v31, %v3135_v12  ;;  %v3143_v34 = vpop.eup %3142  ;;  %v657_v42 = vpop.permute.xlu1 %656 }
 0x5de   :  { %v3145_v36 = vpop.eup %3144  ;;  %v554_v39 = vmul.f32 %v3143_v34, %v3131_v4  ;;  %v3095_v34 = vld [vmem:[%s4347_s9] ss:$0 sm:$0xff] }
 0x5df   :  { %v654_v41 = vmul.f32 %v3145_v36, %v3129_v2 }
 0x5e2   :  { %v484_v28 = vpop.f32.mrf.mxu1 }
 0x5e3   :  { %694 = vrot.lane.b32.xlu2 %v484_v28, %s4366_s0 }
 0x5e8   :  { %v556_v27 = vpop.permute.xlu0 %555 }
 0x5e9   :  { %583 = vmatpush.msrb.mxu3 %v556_v27 }
 0x5ea   :  { %v487_v33 = vpop.f32.mrf.mxu1  ;;  %2579 = vmatmul.msk.f32.vlgmr.msrb.gmra.mxu3 %vm328_vm6, %v553_v32 }
 0x5eb   :  { %696 = vrot.lane.b32.xlu0 %v487_v33, %s4366_s0  ;;  %s4384_s0 = smov 16   ;;  %845 = vmatpush.msra.mxu3 %v822_v19 }
 0x5ed   :  { %846 = vmatpush.msra.mxu3 %v821_v20 }
 0x5ef   :  { %847 = vmatpush.msra.mxu3 %v820_v21 }
 0x5f0   :  { %v659_v37 = vpop.permute.xlu0 %658 }
 0x5f1   :  { %2585 = vmatpush.msk.msra.mxu1 %vm363_vm11, %v659_v37 }
 0x5f2   :  { %2580 = vmatmul.msk.f32.gmra.mxu3 %vm328_vm6, %v554_v39  ;;  %v3096_v39 = vld [vmem:[%s4348_s10] ss:$0 sm:$0xff] }
 0x5f3   :  { %684 = vmatpush.msra.mxu1 %v657_v42  ;;  %v889_v42 = vld [vmem:[%s4351_s13 + $0x78] sm:$0xff] }
 0x5f4   :  { %2586 = vmatmul.msk.f32.vlgmr.msra.gmra.mxu1 %vm328_vm6, %v654_v41  ;;  %890 = vmatpush.msra.mxu0 %v889_v42 }
 0x61b   :  { %v651_v43 = vpop.xlane.xlu0 %650 }
 0x61c   :  { %3146 = vrcp.f32 %v651_v43  ;;  %v888_v43 = vld [vmem:[%s4351_s13 + $0x70] sm:$0xff] }
 0x61d   :  { %891 = vmatpush.msra.mxu0 %v888_v43 }
 0x622   :  { %v3147_v44 = vpop.eup %3146 }
 0x623   :  { %v655_v47 = vmul.f32 %v3147_v44, %v3139_v22  ;;  %v819_v22 = vld [vmem:[%s4349_s11] sm:$0xff] }
 0x624   :  { %848 = vmatpush.msra.mxu3 %v819_v22 }
 0x625   :  { %2587 = vmatmul.msk.f32.gmra.mxu1 %vm328_vm6, %v655_v47  ;;  %v887_v47 = vld [vmem:[%s4351_s13 + $0x68] sm:$0xff] }
 0x626   :  { %892 = vmatpush.msra.mxu0 %v887_v47 }
 0x63d   :  { %v695_v56 = vpop.permute.xlu2 %694 }
 0x63e   :  { %v716_v57 = vsel %vm292_vm10, %v3559_v24, %v695_v56  ;;  %v3094_v24 = vld [vmem:[%s4346_s8] ss:$0 sm:$0xff] }
 0x65d   :  { %v697_v62 = vpop.permute.xlu0 %696 }
 0x65e   :  { %v717_v0 = vsel %vm292_vm10, %v3561_v25, %v697_v62  ;;  %v885_v62 = vld [vmem:[%s4351_s13 + $0x58] sm:$0xff] }
 0x66d   :  { %v585_v48 = vpop.f32.mrf.mxu3 }
 0x66e   :  { %702 = vrot.lane.b32.xlu1 %v585_v48, %s4384_s0 }
 0x671   :  { %v686_v49 = vpop.f32.mrf.mxu1 }
 0x672   :  { %710 = vrot.lane.b32.xlu2 %v686_v49, %s4386_s26 }
 0x675   :  { %v588_v50 = vpop.f32.mrf.mxu3 }
 0x676   :  { %704 = vrot.lane.b32.xlu1 %v588_v50, %s4384_s0  ;;  %s4405_s0 = smov 80  }
 0x6a2   :  { %v689_v51 = vpop.f32.mrf.mxu1 }
 0x6a3   :  { %712 = vrot.lane.b32.xlu2 %v689_v51, %s4386_s26  ;;  %s4413_s26 = smov 24  }
 0x6cc   :  { %v711_v59 = vpop.permute.xlu2 %710 }
 0x6e0   :  { %v703_v58 = vpop.permute.xlu1 %702 }
 0x6e1   :  { %v719_v60 = vsel %vm718_vm12, %v716_v57, %v703_v58 }
 0x6e2   :  { %v722_v61 = vsel %vm721_vm13, %v719_v60, %v711_v59 }
 0x6e3   :  { %2588 = vmatmul.msk.f32.vlgmr.msrb.gmra.mxu2 %vm186_vm2, %v722_v61  ;;  %v886_v61 = vld [vmem:[%s4351_s13 + $0x60] sm:$0xff] }
 0x6e4   :  { %893 = vmatpush.msra.mxu0 %v886_v61 }
 0x6e6   :  { %894 = vmatpush.msra.mxu0 %v885_v62 }
 0x6e8   :  { %v705_v63 = vpop.permute.xlu1 %704 }
 0x6e9   :  { %v720_v1 = vsel %vm718_vm12, %v717_v0, %v705_v63  ;;  %v884_v63 = vld [vmem:[%s4351_s13 + $0x50] sm:$0xff]  ;;  %v883_v0 = vld [vmem:[%s4351_s13 + $0x48] sm:$0xff] }
 0x6ea   :  { %895 = vmatpush.msra.mxu0 %v884_v63 }
 0x6ec   :  { %896 = vmatpush.msra.mxu0 %v883_v0 }
 0x6fd   :  { %v713_v2 = vpop.permute.xlu2 %712 }
 0x6fe   :  { %v723_v3 = vsel %vm721_vm13, %v720_v1, %v713_v2  ;;  %v882_v1 = vld [vmem:[%s4351_s13 + $0x40] sm:$0xff]  ;;  %v881_v2 = vld [vmem:[%s4351_s13 + $0x38] sm:$0xff] }
 0x6ff   :  { %2589 = vmatmul.msk.f32.gmra.mxu2 %vm186_vm2, %v723_v3  ;;  %897 = vmatpush.msra.mxu0 %v882_v1  ;;  %v880_v3 = vld [vmem:[%s4351_s13 + $0x30] sm:$0xff] }
 0x701   :  { %898 = vmatpush.msra.mxu0 %v881_v2 }
 0x703   :  { %899 = vmatpush.msra.mxu0 %v880_v3 }
 0x766   :  { %v755_v4 = vpop.f32.mrf.mxu2 }
 0x767   :  { %v756_v5 = vadd.f32 %v3094_v24, %v755_v4  ;;  %v878_v4 = vld [vmem:[%s4351_s13 + $0x20] sm:$0xff] }
 0x769   :  { %v3634_v6 = vadd.f32 %v756_v5, %v3451_v38  ;;  %v877_v5 = vld [vmem:[%s4351_s13 + $0x18] sm:$0xff] }
 0x76b   :  { %v765_v7 = vsel %vm186_vm2, %v3634_v6, 0.0 }
 0x76c   :  { %766 = vadd.xlane.f32.xlu1 %v765_v7  ;;  %v876_v7 = vld [vmem:[%s4351_s13 + $0x10] sm:$0xff] }
 0x782   :  { %v758_v25 = vpop.f32.mrf.mxu2 }
 0x783   :  { %v759_v8 = vadd.f32 %v3094_v24, %v758_v25  ;;  %v879_v24 = vld [vmem:[%s4351_s13 + $0x28] sm:$0xff] }
 0x784   :  { %900 = vmatpush.msra.mxu0 %v879_v24  ;;  %v875_v25 = vld [vmem:[%s4351_s13 + $0x8] sm:$0xff]  ;;  %v3099_v24 = vld [vmem:[%s4400_s3 + $0x1] ss:$0 sm:$0xff] }
 0x785   :  { %v3639_v9 = vadd.f32 %v759_v8, %v3447_v35  ;;  %v874_v8 = vld [vmem:[%s4351_s13] sm:$0xff] }
 0x786   :  { %901 = vmatpush.msra.mxu0 %v878_v4 }
 0x787   :  { %v768_v10 = vsel %vm190_vm1, %v3639_v9, 0.0 }
 0x788   :  { %769 = vadd.xlane.f32.xlu2 %v768_v10  ;;  %902 = vmatpush.msra.mxu0 %v877_v5  ;;  %v3097_v10 = vld [vmem:[%s4350_s12] ss:$0 sm:$0xff] }
 0x78a   :  { %903 = vmatpush.msra.mxu0 %v876_v7  ;;  %v3100_v7 = vld [vmem:[%s4401_s29 + $0x1] ss:$0 sm:$0xff] }
 0x78c   :  { %904 = vmatpush.msra.mxu0 %v875_v25 }
 0x78e   :  { %905 = vmatpush.msra.mxu0 %v874_v8 }
 0x7df   :  { %v767_v11 = vpop.xlane.xlu1 %766 }
 0x7e0   :  { %v771_v12 = vmul.f32 %v767_v11, %v3455_v46 }
 0x7e2   :  { %v773_v13 = vsub.f32 %v3634_v6, %v771_v12 }
 0x7e4   :  { %v775_v38 = vmul.f32 %v773_v13, %v773_v13 }
 0x7e6   :  { %v777_v14 = vsel %vm186_vm2, %v775_v38, 0.0 }
 0x7e7   :  { %778 = vadd.xlane.f32.xlu0 %v777_v14 }
 0x7fb   :  { %v770_v15 = vpop.xlane.xlu2 %769 }
 0x7fc   :  { %v772_v16 = vmul.f32 %v770_v15, %v3455_v46 }
 0x7fe   :  { %v774_v17 = vsub.f32 %v3639_v9, %v772_v16 }
 0x800   :  { %v776_v35 = vmul.f32 %v774_v17, %v774_v17 }
 0x802   :  { %v780_v18 = vsel %vm190_vm1, %v776_v35, 0.0 }
 0x803   :  { %781 = vadd.xlane.f32.xlu1 %v780_v18 }
 0x85a   :  { %v779_v23 = vpop.xlane.xlu0 %778 }
 0x85b   :  { %v783_v26 = vmul.f32 %v779_v23, %v3455_v46 }
 0x85d   :  { %v785_v28 = vadd.f32 1e-06, %v783_v26 }
 0x85f   :  { %3148 = vrsqrt.f32 %v785_v28  ;;  %vm793_vm15 = vweird.f32 %v785_v28 }
 0x865   :  { %v3149_v30 = vpop.eup %3148 }
 0x866   :  { %v788_v31 = vmul.f32 %v3149_v30, %v785_v28  ;;  %vm794_vm14 = vweird.f32 %v3149_v30 }
 0x867   :  { %vm795_vm0 = vmor %vm793_vm15, %vm794_vm14 }
 0x868   :  { %v789_v29 = vmul.f32 %v3149_v30, %v788_v31 }
 0x86a   :  { %v790_v32 = vmul.f32 0.5, %v789_v29 }
 0x86c   :  { %v791_v27 = vsub.f32 1.5, %v790_v32 }
 0x86e   :  { %v792_v33 = vmul.f32 %v3149_v30, %v791_v27 }
 0x870   :  { %v796_v36 = vsel %vm795_vm0, %v3149_v30, %v792_v33  ;;  %v3098_v33 = vld [vmem:[%s4352_s14] ss:$0 sm:$0xff] }
 0x871   :  { %v807_v37 = vmul.f32 %v796_v36, %v773_v13 }
 0x873   :  { %v812_v41 = vmul.f32 %v3095_v34, %v807_v37 }
 0x875   :  { %v817_v44 = vadd.f32 %v3096_v39, %v812_v41 }
 0x876   :  { %v782_v48 = vpop.xlane.xlu1 %781 }
 0x877   :  { %v784_v49 = vmul.f32 %v782_v48, %v3455_v46  ;;  %2590 = vmatmul.msk.f32.vlgmr.msra.gmra.mxu3 %vm186_vm2, %v817_v44 }
 0x879   :  { %v786_v50 = vadd.f32 1e-06, %v784_v49 }
 0x87b   :  { %3150 = vrsqrt.f32 %v786_v50  ;;  %vm803_vm4 = vweird.f32 %v786_v50 }
 0x881   :  { %v3151_v51 = vpop.eup %3150 }
 0x882   :  { %v798_v52 = vmul.f32 %v3151_v51, %v786_v50  ;;  %vm804_vm3 = vweird.f32 %v3151_v51 }
 0x883   :  { %vm805_vm5 = vmor %vm803_vm4, %vm804_vm3 }
 0x884   :  { %v799_v53 = vmul.f32 %v3151_v51, %v798_v52 }
 0x886   :  { %v800_v54 = vmul.f32 0.5, %v799_v53 }
 0x888   :  { %v801_v55 = vsub.f32 1.5, %v800_v54 }
 0x88a   :  { %v802_v56 = vmul.f32 %v3151_v51, %v801_v55  ;;  %v2597_v55 = vld [vmem:[%s4399_s4 + $0x38] sm:$0xff] }
 0x88b   :  { %1007 = vmatpush.msrb.mxu1 %v2597_v55 }
 0x88c   :  { %v806_v57 = vsel %vm805_vm5, %v3151_v51, %v802_v56  ;;  %v2596_v56 = vld [vmem:[%s4399_s4 + $0x30] sm:$0xff] }
 0x88d   :  { %v808_v58 = vmul.f32 %v806_v57, %v774_v17  ;;  %1008 = vmatpush.msrb.mxu1 %v2596_v56  ;;  %v2595_v57 = vld [vmem:[%s4399_s4 + $0x28] sm:$0xff] }
 0x88f   :  { %v813_v59 = vmul.f32 %v3095_v34, %v808_v58  ;;  %v2594_v58 = vld [vmem:[%s4399_s4 + $0x20] sm:$0xff]  ;;  %1009 = vmatpush.msrb.mxu1 %v2595_v57 }
 0x891   :  { %v818_v60 = vadd.f32 %v3096_v39, %v813_v59  ;;  %1010 = vmatpush.msrb.mxu1 %v2594_v58 }
 0x893   :  { %2591 = vmatmul.msk.f32.gmra.mxu3 %vm186_vm2, %v818_v60 }
 0x8fa   :  { %v850_v11 = vpop.f32.mrf.mxu3 }
 0x8fb   :  { %v851_v12 = vadd.f32 %v3097_v10, %v850_v11 }
 0x8fd   :  { %v856_v13 = vmul.f32 %v851_v12, %v851_v12 }
 0x8ff   :  { %v858_v38 = vmul.f32 %v856_v13, %v851_v12 }
 0x901   :  { %v860_v14 = vmul.f32 0.044715, %v858_v38 }
 0x903   :  { %v862_v15 = vadd.f32 %v860_v14, %v851_v12 }
 0x905   :  { %v864_v16 = vmul.f32 0.7978846, %v862_v15 }
 0x907   :  { %3152 = vtanh.f32 %v864_v16 }
 0x90d   :  { %v3153_v17 = vpop.eup %3152 }
 0x90e   :  { %v868_v35 = vadd.f32 1.0, %v3153_v17 }
 0x910   :  { %v870_v18 = vmul.f32 0.5, %v868_v35 }
 0x912   :  { %v872_v19 = vmul.f32 %v870_v18, %v851_v12 }
 0x914   :  { %906 = vmatmul.f32.vlgmr.msra.gmra.mxu0 %v872_v19 }
 0x916   :  { %v853_v20 = vpop.f32.mrf.mxu3 }
 0x917   :  { %v854_v21 = vadd.f32 %v3097_v10, %v853_v20 }
 0x919   :  { %v857_v22 = vmul.f32 %v854_v21, %v854_v21 }
 0x91b   :  { %v859_v23 = vmul.f32 %v857_v22, %v854_v21 }
 0x91d   :  { %v861_v26 = vmul.f32 0.044715, %v859_v23 }
 0x91f   :  { %v863_v28 = vadd.f32 %v861_v26, %v854_v21 }
 0x921   :  { %v865_v30 = vmul.f32 0.7978846, %v863_v28 }
 0x923   :  { %3154 = vtanh.f32 %v865_v30 }
 0x929   :  { %v3155_v31 = vpop.eup %3154 }
 0x92a   :  { %v869_v29 = vadd.f32 1.0, %v3155_v31 }
 0x92c   :  { %v871_v32 = vmul.f32 0.5, %v869_v29 }
 0x92e   :  { %v873_v27 = vmul.f32 %v871_v32, %v854_v21  ;;  %v3101_v21 = vld [vmem:[%s4344_s6 + $0x1] ss:$0 sm:$0xff]  ;;  %s4403_s6 = smov 64  }
 0x930   :  { %909 = vmatmul.f32.gmra.mxu0 %v873_v27 }
 0x991   :  { %v907_v34 = vpop.f32.mrf.mxu0 }
 0x992   :  { %v913_v36 = vadd.f32 %v907_v34, %v3634_v6 }
 0x994   :  { %v3726_v37 = vadd.f32 %v3098_v33, %v913_v36 }
 0x996   :  { %v925_v39 = vsel %vm186_vm2, %v3726_v37, 0.0 }
 0x997   :  { %926 = vadd.xlane.f32.xlu2 %v925_v39 }
 0x9ad   :  { %v910_v41 = vpop.f32.mrf.mxu0 }
 0x9ae   :  { %v914_v42 = vadd.f32 %v910_v41, %v3639_v9 }
 0x9b0   :  { %v3731_v43 = vadd.f32 %v3098_v33, %v914_v42 }
 0x9b2   :  { %v928_v44 = vsel %vm190_vm1, %v3731_v43, 0.0 }
 0x9b3   :  { %929 = vadd.xlane.f32.xlu1 %v928_v44 }
 0xa0a   :  { %v927_v47 = vpop.xlane.xlu2 %926 }
 0xa0b   :  { %v931_v48 = vmul.f32 %v927_v47, %v3455_v46 }
 0xa0d   :  { %v933_v6 = vsub.f32 %v3726_v37, %v931_v48 }
 0xa0f   :  { %v935_v49 = vmul.f32 %v933_v6, %v933_v6 }
 0xa11   :  { %v937_v50 = vsel %vm186_vm2, %v935_v49, 0.0 }
 0xa12   :  { %938 = vadd.xlane.f32.xlu0 %v937_v50 }
 0xa26   :  { %v930_v51 = vpop.xlane.xlu1 %929 }
 0xa27   :  { %v932_v52 = vmul.f32 %v930_v51, %v3455_v46 }
 0xa29   :  { %v934_v9 = vsub.f32 %v3731_v43, %v932_v52 }
 0xa2b   :  { %v936_v53 = vmul.f32 %v934_v9, %v934_v9 }
 0xa2d   :  { %v940_v54 = vsel %vm190_vm1, %v936_v53, 0.0 }
 0xa2e   :  { %941 = vadd.xlane.f32.xlu2 %v940_v54 }
 0xa85   :  { %v939_v59 = vpop.xlane.xlu0 %938 }
 0xa86   :  { %v943_v60 = vmul.f32 %v939_v59, %v3455_v46 }
 0xa88   :  { %v945_v61 = vadd.f32 1e-06, %v943_v60 }
 0xa8a   :  { %3156 = vrsqrt.f32 %v945_v61  ;;  %vm953_vm8 = vweird.f32 %v945_v61 }
 0xa90   :  { %v3157_v62 = vpop.eup %3156 }
 0xa91   :  { %v948_v63 = vmul.f32 %v3157_v62, %v945_v61  ;;  %vm954_vm7 = vweird.f32 %v3157_v62 }
 0xa92   :  { %vm955_vm14 = vmor %vm953_vm8, %vm954_vm7 }
 0xa93   :  { %v949_v0 = vmul.f32 %v3157_v62, %v948_v63 }
 0xa95   :  { %v950_v1 = vmul.f32 0.5, %v949_v0 }
 0xa97   :  { %v951_v2 = vsub.f32 1.5, %v950_v1 }
 0xa99   :  { %v952_v3 = vmul.f32 %v3157_v62, %v951_v2 }
 0xa9b   :  { %v956_v4 = vsel %vm955_vm14, %v3157_v62, %v952_v3 }
 0xa9c   :  { %v967_v5 = vmul.f32 %v956_v4, %v933_v6 }
 0xa9e   :  { %v972_v25 = vmul.f32 %v3099_v24, %v967_v5 }
 0xaa0   :  { %v977_v8 = vadd.f32 %v3100_v7, %v972_v25 }
 0xaa1   :  { %v942_v10 = vpop.xlane.xlu2 %941 }
 0xaa2   :  { %v944_v11 = vmul.f32 %v942_v10, %v3455_v46  ;;  %2599 = vmatmul.msk.f32.vlgmr.msrb.gmra.mxu1 %vm186_vm2, %v977_v8 }
 0xaa4   :  { %v946_v12 = vadd.f32 1e-06, %v944_v11 }
 0xaa6   :  { %3158 = vrsqrt.f32 %v946_v12  ;;  %vm963_vm0 = vweird.f32 %v946_v12 }
 0xaac   :  { %v3159_v13 = vpop.eup %3158 }
 0xaad   :  { %v958_v38 = vmul.f32 %v3159_v13, %v946_v12  ;;  %vm964_vm15 = vweird.f32 %v3159_v13 }
 0xaae   :  { %vm965_vm3 = vmor %vm963_vm0, %vm964_vm15 }
 0xaaf   :  { %v959_v14 = vmul.f32 %v3159_v13, %v958_v38 }
 0xab1   :  { %v960_v15 = vmul.f32 0.5, %v959_v14 }
 0xab3   :  { %v961_v16 = vsub.f32 1.5, %v960_v15 }
 0xab5   :  { %v962_v17 = vmul.f32 %v3159_v13, %v961_v16 }
 0xab7   :  { %v966_v35 = vsel %vm965_vm3, %v3159_v13, %v962_v17 }
 0xab8   :  { %v968_v18 = vmul.f32 %v966_v35, %v934_v9 }
 0xaba   :  { %v973_v19 = vmul.f32 %v3099_v24, %v968_v18 }
 0xabc   :  { %v978_v20 = vadd.f32 %v3100_v7, %v973_v19 }
 0xabe   :  { %2600 = vmatmul.msk.f32.gmra.mxu1 %vm186_vm2, %v978_v20 }
 0xb1f   :  { %v1012_v22 = vpop.f32.mrf.mxu1 }
 0xb20   :  { %v3766_v23 = vadd.f32 %v3101_v21, %v1012_v22 }
 0xb22   :  { %1020 = vrot.lane.b32.xlu0 %v3766_v23, %s3229_s30 }
 0xb2a   :  { %1121 = vrot.lane.b32.xlu0 %v3766_v23, %s3234_s24 }
 0xb3b   :  { %v1015_v26 = vpop.f32.mrf.mxu1 }
 0xb3c   :  { %v3772_v28 = vadd.f32 %v3101_v21, %v1015_v26 }
 0xb3e   :  { %1123 = vrot.lane.b32.xlu0 %v3772_v28, %s3234_s24  ;;  %1022 = vrot.lane.b32.xlu1 %v3772_v28, %s3229_s30  ;;  %s4406_s30 = smov 112   ;;  %s4407_s24 = smov 104  }
 0xb46   :  { %1119 = vrot.lane.b32.xlu0 %v3772_v28, %s4402_s28  ;;  %1081 = vrot.lane.b32.xlu1 %v3766_v23, %s4403_s6 }
 0xb4e   :  { %1325 = vrot.lane.b32.xlu0 %v3772_v28, %s4404_s22  ;;  %1083 = vrot.lane.b32.xlu1 %v3772_v28, %s4403_s6 }
 0xb56   :  { %1323 = vrot.lane.b32.xlu0 %v3766_v23, %s4404_s22  ;;  %1224 = vrot.lane.b32.xlu1 %v3772_v28, %s4405_s0 }
 0xb5e   :  { %1222 = vrot.lane.b32.xlu1 %v3766_v23, %s4405_s0 }
 0xb66   :  { %1218 = vrot.lane.b32.xlu1 %v3766_v23, %s4406_s30 }
 0xb94   :  { %v1021_v30 = vpop.permute.xlu0 %1020 }
 0xb9c   :  { %v1122_v31 = vpop.permute.xlu0 %1121 }
 0xbb0   :  { %v1124_v29 = vpop.permute.xlu0 %1123  ;;  %v1023_v32 = vpop.permute.xlu1 %1022 }
 0xbb1   :  { %2601 = vmatpush.xpose.msk.msra.mxu2 %vm292_vm10, %v1023_v32  ;;  %2608 = vmatpush.xpose.msk.msra.mxu1 %vm292_vm10, %v1124_v29 }
 0xbb5   :  { %2602 = vmatpush.xpose.msk.msra.mxu2 %vm292_vm10, %v1021_v30  ;;  %2609 = vmatpush.xpose.msk.msra.mxu1 %vm292_vm10, %v1122_v31 }
 0xbb8   :  { %v1120_v27 = vpop.permute.xlu0 %1119  ;;  %2603 = vmatmul.msk.f32.vlgmr.msra.gmra.mxu2 %vm292_vm10, %v3766_v23  ;;  %v1082_v33 = vpop.permute.xlu1 %1081 }
 0xbc0   :  { %v1326_v34 = vpop.permute.xlu0 %1325  ;;  %2604 = vmatmul.msk.f32.gmra.mxu2 %vm292_vm10, %v3772_v28  ;;  %v1084_v36 = vpop.permute.xlu1 %1083 }
 0xbc1   :  { %2605 = vmatpush.msk.msrb.mxu3 %vm363_vm11, %v1084_v36  ;;  %2622 = vmatpush.xpose.msk.msrb.mxu1 %vm292_vm10, %v1326_v34 }
 0xbc3   :  { %1109 = vmatpush.msrb.mxu3 %v1082_v33 }
 0xbc8   :  { %v1324_v39 = vpop.permute.xlu0 %1323  ;;  %v1225_v41 = vpop.permute.xlu1 %1224 }
 0xbc9   :  { %2615 = vmatpush.xpose.msk.msra.mxu3 %vm292_vm10, %v1225_v41  ;;  %2623 = vmatpush.xpose.msk.msrb.mxu1 %vm292_vm10, %v1324_v39 }
 0xbd0   :  { %v1223_v42 = vpop.permute.xlu1 %1222 }
 0xbd1   :  { %2616 = vmatpush.xpose.msk.msra.mxu3 %vm292_vm10, %v1223_v42 }
 0xbd8   :  { %v1219_v12 = vpop.permute.xlu1 %1218 }
 0xc3b   :  { %v1049_v44 = vpop.f32.mrf.mxu2 }
 0xc3c   :  { %v1055_v47 = vmul.f32 0.35355338, %v1049_v44 }
 0xc3e   :  { %v1057_v48 = vadd.f32 %v1055_v47, %v3510_v40 }
 0xc40   :  { %v1059_v6 = vsel %vm328_vm6, %v1057_v48, -inf }
 0xc41   :  { %1060 = vmax.xlane.f32.xlu2 %v1059_v6 }
 0xc43   :  { %v1052_v49 = vpop.f32.mrf.mxu2 }
 0xc44   :  { %v1056_v50 = vmul.f32 0.35355338, %v1052_v49 }
 0xc46   :  { %v1058_v51 = vadd.f32 %v1056_v50, %v3514_v45 }
 0xc48   :  { %v1062_v52 = vsel %vm332_vm9, %v1058_v51, -inf }
 0xc49   :  { %1063 = vmax.xlane.f32.xlu2 %v1062_v52 }
 0xc61   :  { %1117 = vrot.lane.b32.xlu2 %v3766_v23, %s4402_s28 }
 0xcb4   :  { %v1061_v9 = vpop.xlane.xlu2 %1060 }
 0xcb5   :  { %v1065_v53 = vsub.f32 %v1057_v48, %v1061_v9 }
 0xcb7   :  { %v1067_v54 = vmul.f32 1.442695, %v1065_v53 }
 0xcb9   :  { %3160 = vpow2.f32 %v1067_v54 }
 0xcbc   :  { %v1064_v55 = vpop.xlane.xlu2 %1063 }
 0xcbd   :  { %v1066_v56 = vsub.f32 %v1058_v51, %v1064_v55 }
 0xcbf   :  { %v3161_v57 = vpop.eup %3160  ;;  %v1069_v58 = vmul.f32 1.442695, %v1066_v56 }
 0xcc0   :  { %v1071_v59 = vsel %vm328_vm6, %v3161_v57, 0.0 }
 0xcc1   :  { %3162 = vpow2.f32 %v1069_v58  ;;  %1072 = vadd.xlane.f32.xlu2 %v1071_v59 }
 0xcc4   :  { %v1118_v60 = vpop.permute.xlu2 %1117 }
 0xcc5   :  { %2610 = vmatmul.msk.f32.vlgmr.msra.gmra.mxu1 %vm292_vm10, %v1118_v60 }
 0xcc7   :  { %v3163_v61 = vpop.eup %3162 }
 0xcc8   :  { %v1074_v62 = vsel %vm332_vm9, %v3163_v61, 0.0 }
 0xcc9   :  { %1075 = vadd.xlane.f32.xlu2 %v1074_v62 }
 0xccd   :  { %2611 = vmatmul.msk.f32.gmra.mxu1 %vm292_vm10, %v1120_v27 }
 0xce1   :  { %1319 = vrot.lane.b32.xlu2 %v3766_v23, %s4407_s24 }
 0xd34   :  { %v1073_v63 = vpop.xlane.xlu2 %1072 }
 0xd35   :  { %3164 = vrcp.f32 %v1073_v63 }
 0xd3b   :  { %v3165_v0 = vpop.eup %3164 }
 0xd3c   :  { %v1079_v1 = vmul.f32 %v3165_v0, %v3161_v57  ;;  %v1076_v2 = vpop.xlane.xlu2 %1075 }
 0xd3d   :  { %3166 = vrcp.f32 %v1076_v2 }
 0xd3e   :  { %2606 = vmatmul.msk.f32.vlgmr.msrb.gmra.mxu3 %vm328_vm6, %v1079_v1 }
 0xd42   :  { %v1150_v3 = vpop.f32.mrf.mxu1 }
 0xd43   :  { %v3167_v24 = vpop.eup %3166  ;;  %v1156_v4 = vmul.f32 0.35355338, %v1150_v3 }
 0xd44   :  { %v1320_v5 = vpop.permute.xlu2 %1319  ;;  %v1080_v7 = vmul.f32 %v3167_v24, %v3163_v61 }
 0xd45   :  { %2624 = vmatmul.msk.f32.vlgmr.msrb.gmra.mxu1 %vm292_vm10, %v1320_v5  ;;  %v1158_v25 = vadd.f32 %v1156_v4, %v3510_v40 }
 0xd46   :  { %2607 = vmatmul.msk.f32.gmra.mxu3 %vm328_vm6, %v1080_v7 }
 0xd47   :  { %v1160_v8 = vsel %vm328_vm6, %v1158_v25, -inf }
 0xd48   :  { %1161 = vmax.xlane.f32.xlu0 %v1160_v8 }
 0xd4a   :  { %v1153_v10 = vpop.f32.mrf.mxu1 }
 0xd4b   :  { %v1157_v11 = vmul.f32 0.35355338, %v1153_v10 }
 0xd4d   :  { %v1159_v13 = vadd.f32 %v1157_v11, %v3514_v45 }
 0xd4e   :  { %2617 = vmatmul.msk.f32.vlgmr.msra.gmra.mxu3 %vm292_vm10, %v1219_v12 }
 0xd4f   :  { %v1163_v38 = vsel %vm332_vm9, %v1159_v13, -inf }
 0xd50   :  { %1164 = vmax.xlane.f32.xlu1 %v1163_v38 }
 0xdbb   :  { %v1162_v14 = vpop.xlane.xlu0 %1161 }
 0xdbc   :  { %v1166_v15 = vsub.f32 %v1158_v25, %v1162_v14 }
 0xdbe   :  { %v1168_v16 = vmul.f32 1.442695, %v1166_v15 }
 0xdc0   :  { %3168 = vpow2.f32 %v1168_v16 }
 0xdc1   :  { %v3827_v17 = vpop.f32.mrf.mxu3 }
 0xdc2   :  { %v1352_v35 = vpop.f32.mrf.mxu1 }
 0xdc3   :  { %v1358_v18 = vmul.f32 0.35355338, %v1352_v35  ;;  %v1165_v19 = vpop.xlane.xlu1 %1164 }
 0xdc4   :  { %v1167_v20 = vsub.f32 %v1159_v13, %v1165_v19 }
 0xdc5   :  { %v1360_v21 = vadd.f32 %v1358_v18, %v3510_v40 }
 0xdc6   :  { %v3169_v22 = vpop.eup %3168  ;;  %v1170_v26 = vmul.f32 1.442695, %v1167_v20 }
 0xdc7   :  { %v1172_v30 = vsel %vm328_vm6, %v3169_v22, 0.0  ;;  %v1362_v31 = vsel %vm328_vm6, %v1360_v21, -inf }
 0xdc8   :  { %3170 = vpow2.f32 %v1170_v26  ;;  %1173 = vadd.xlane.f32.xlu1 %v1172_v30  ;;  %1363 = vmax.xlane.f32.xlu2 %v1362_v31  ;;  %v2631_v26 = vld [vmem:[%s4345_s7 + $0x30] sm:$0xff]  ;;  %v2629_v30 = vld [vmem:[%s4345_s7 + $0x20] sm:$0xff] }
 0xdc9   :  { %v3832_v29 = vpop.f32.mrf.mxu3 }
 0xdce   :  { %v3171_v32 = vpop.eup %3170 }
 0xdcf   :  { %v1175_v27 = vsel %vm332_vm9, %v3171_v32, 0.0 }
 0xdd0   :  { %1176 = vadd.xlane.f32.xlu0 %v1175_v27 }
 0xdd1   :  { %v1251_v33 = vpop.f32.mrf.mxu3 }
 0xdd2   :  { %v1257_v34 = vmul.f32 0.35355338, %v1251_v33 }
 0xdd4   :  { %v1259_v36 = vadd.f32 %v1257_v34, %v3510_v40 }
 0xdd6   :  { %v1261_v39 = vsel %vm328_vm6, %v1259_v36, -inf }
 0xdd8   :  { %1262 = vmax.xlane.f32.xlu0 %v1261_v39 }
 0xde0   :  { %1184 = vrot.lane.b32.xlu2 %v3772_v28, %s4408_s5 }
 0xde1   :  { %1182 = vrot.lane.b32.xlu1 %v3766_v23, %s4408_s5 }
 0xde8   :  { %1386 = vrot.lane.b32.xlu2 %v3772_v28, %s4409_s1 }
 0xde9   :  { %1285 = vrot.lane.b32.xlu1 %v3772_v28, %s4410_s2 }
 0xdf0   :  { %1283 = vrot.lane.b32.xlu2 %v3766_v23, %s4410_s2 }
 0xdf1   :  { %1220 = vrot.lane.b32.xlu1 %v3772_v28, %s4406_s30 }
 0xdf8   :  { %1321 = vrot.lane.b32.xlu2 %v3772_v28, %s4407_s24 }
 0xe3b   :  { %v1364_v40 = vpop.xlane.xlu2 %1363  ;;  %v1174_v6 = vpop.xlane.xlu1 %1173 }
 0xe3c   :  { %v1368_v41 = vsub.f32 %v1360_v21, %v1364_v40 }
 0xe3e   :  { %v1370_v42 = vmul.f32 1.442695, %v1368_v41 }
 0xe40   :  { %3172 = vpow2.f32 %v1370_v42 }
 0xe41   :  { %3174 = vrcp.f32 %v1174_v6 }
 0xe43   :  { %v1185_v44 = vpop.permute.xlu2 %1184  ;;  %v1177_v47 = vpop.xlane.xlu0 %1176 }
 0xe44   :  { %2612 = vmatpush.msk.msrb.mxu2 %vm363_vm11, %v1185_v44 }
 0xe46   :  { %v3173_v48 = vpop.eup %3172 }
 0xe47   :  { %v1374_v49 = vsel %vm328_vm6, %v3173_v48, 0.0  ;;  %v3175_v53 = vpop.eup %3174 }
 0xe48   :  { %1375 = vadd.xlane.f32.xlu0 %v1374_v49  ;;  %v1180_v28 = vmul.f32 %v3175_v53, %v3169_v22  ;;  %v2632_v22 = vld [vmem:[%s4345_s7 + $0x38] sm:$0xff] }
 0xe49   :  { %1478 = vmatpush.msrb.mxu3 %v2632_v22  ;;  %v2655_v22 = vld [vmem:[%s4351_s13 + $0xd0] sm:$0xff] }
 0xe4b   :  { %v1387_v50 = vpop.permute.xlu2 %1386  ;;  %v1263_v51 = vpop.xlane.xlu0 %1262  ;;  %1479 = vmatpush.msrb.mxu3 %v2631_v26  ;;  %v2654_v26 = vld [vmem:[%s4351_s13 + $0xc8] sm:$0xff] }
 0xe4c   :  { %v1267_v52 = vsub.f32 %v1259_v36, %v1263_v51 }
 0xe4e   :  { %v1269_v9 = vmul.f32 1.442695, %v1267_v52 }
 0xe50   :  { %3176 = vpow2.f32 %v1269_v9 }
 0xe51   :  { %3178 = vrcp.f32 %v1177_v47 }
 0xe53   :  { %v1284_v54 = vpop.permute.xlu2 %1283  ;;  %v1183_v55 = vpop.permute.xlu1 %1182 }
 0xe54   :  { %1210 = vmatpush.msrb.mxu2 %v1183_v55 }
 0xe55   :  { %2613 = vmatmul.msk.f32.vlgmr.msrb.gmra.mxu2 %vm328_vm6, %v1180_v28 }
 0xe56   :  { %v3177_v56 = vpop.eup %3176  ;;  %2626 = vmatpush.msk.msra.mxu2 %vm363_vm11, %v1387_v50 }
 0xe57   :  { %v1273_v57 = vsel %vm328_vm6, %v3177_v56, 0.0  ;;  %v3179_v58 = vpop.eup %3178 }
 0xe58   :  { %1274 = vadd.xlane.f32.xlu0 %v1273_v57  ;;  %v1181_v61 = vmul.f32 %v3179_v58, %v3171_v32 }
 0xe5b   :  { %v1322_v59 = vpop.permute.xlu2 %1321  ;;  %v1286_v60 = vpop.permute.xlu1 %1285 }
 0xe5c   :  { %2619 = vmatpush.msk.msrb.mxu0 %vm363_vm11, %v1286_v60  ;;  %2625 = vmatmul.msk.f32.gmra.mxu1 %vm292_vm10, %v1322_v59  ;;  %v2641_v59 = vld [vmem:[%s4349_s11 + $0x38] sm:$0xff]  ;;  %v2640_v60 = vld [vmem:[%s4349_s11 + $0x30] sm:$0xff] }
 0xe5d   :  { %2614 = vmatmul.msk.f32.gmra.mxu2 %vm328_vm6, %v1181_v61  ;;  %v2639_v61 = vld [vmem:[%s4349_s11 + $0x28] sm:$0xff] }
 0xe5e   :  { %1311 = vmatpush.msrb.mxu0 %v1284_v54 }
 0xe60   :  { %1577 = vmatpush.msra.mxu0 %v2641_v59 }
 0xe62   :  { %1578 = vmatpush.msra.mxu0 %v2640_v60 }
 0xe63   :  { %v1221_v62 = vpop.permute.xlu1 %1220 }
 0xe64   :  { %2618 = vmatmul.msk.f32.gmra.mxu3 %vm292_vm10, %v1221_v62  ;;  %v2638_v62 = vld [vmem:[%s4349_s11 + $0x20] sm:$0xff]  ;;  %1579 = vmatpush.msra.mxu0 %v2639_v61 }
 0xe66   :  { %1580 = vmatpush.msra.mxu0 %v2638_v62 }
 0xe6c   :  { %1384 = vrot.lane.b32.xlu0 %v3766_v23, %s4409_s1 }
 0xebb   :  { %v1376_v63 = vpop.xlane.xlu0 %1375 }
 0xecb   :  { %v1275_v0 = vpop.xlane.xlu0 %1274 }
 0xecc   :  { %3180 = vrcp.f32 %v1275_v0  ;;  %v2659_v0 = vld [vmem:[%s4351_s13 + $0xf0] sm:$0xff] }
 0xecd   :  { %3182 = vrcp.f32 %v1376_v63  ;;  %v2660_v63 = vld [vmem:[%s4351_s13 + $0xf8] sm:$0xff] }
 0xece   :  { %1623 = vmatpush.msra.mxu1 %v2660_v63 }
 0xed0   :  { %1624 = vmatpush.msra.mxu1 %v2659_v0 }
 0xed2   :  { %v3181_v1 = vpop.eup %3180 }
 0xed3   :  { %v1281_v2 = vmul.f32 %v3181_v1, %v3177_v56  ;;  %v3183_v24 = vpop.eup %3182  ;;  %v2658_v1 = vld [vmem:[%s4351_s13 + $0xe8] sm:$0xff] }
 0xed4   :  { %v1382_v4 = vmul.f32 %v3183_v24, %v3173_v48  ;;  %v3895_v48 = vld [vmem:[%s4346_s8 + $0x1] ss:$0 sm:$0xff]  ;;  %1625 = vmatpush.msra.mxu1 %v2658_v1 }
 0xed5   :  { %2620 = vmatmul.msk.f32.vlgmr.msrb.gmra.mxu0 %vm328_vm6, %v1281_v2 }
 0xed8   :  { %v1212_v3 = vpop.f32.mrf.mxu2 }
 0xed9   :  { %1422 = vrot.lane.b32.xlu0 %v1212_v3, %s4411_s25  ;;  %v1355_v7 = vpop.f32.mrf.mxu1 }
 0xeda   :  { %v1359_v25 = vmul.f32 0.35355338, %v1355_v7 }
 0xedc   :  { %v1361_v23 = vadd.f32 %v1359_v25, %v3514_v45 }
 0xede   :  { %v1385_v5 = vpop.permute.xlu0 %1384  ;;  %v1365_v8 = vsel %vm332_vm9, %v1361_v23, -inf }
 0xedf   :  { %1412 = vmatpush.msra.mxu2 %v1385_v5 }
 0xee0   :  { %2627 = vmatmul.msk.f32.vlgmr.msra.gmra.mxu2 %vm328_vm6, %v1382_v4  ;;  %v1215_v11 = vpop.f32.mrf.mxu2 }
 0xee7   :  { %v1254_v38 = vpop.f32.mrf.mxu3 }
 0xee8   :  { %v1258_v14 = vmul.f32 0.35355338, %v1254_v38 }
 0xeea   :  { %v1260_v16 = vadd.f32 %v1258_v14, %v3514_v45  ;;  %v2630_v45 = vld [vmem:[%s4345_s7 + $0x28] sm:$0xff] }
 0xeeb   :  { %1480 = vmatpush.msrb.mxu3 %v2630_v45  ;;  %v2653_v45 = vld [vmem:[%s4351_s13 + $0xc0] sm:$0xff] }
 0xeec   :  { %v1264_v18 = vsel %vm332_vm9, %v1260_v16, -inf }
 0xeed   :  { %1481 = vmatpush.msrb.mxu3 %v2629_v30  ;;  %v2652_v30 = vld [vmem:[%s4351_s13 + $0xb8] sm:$0xff] }
 0xf03   :  { %1366 = vmax.xlane.f32.xlu0 %v1365_v8 }
 0xf4b   :  { %v1423_v13 = vpop.permute.xlu0 %1422 }
 0xf4c   :  { %v1444_v31 = vsel %vm292_vm10, %v3827_v17, %v1423_v13 }
 0xf52   :  { %v1313_v10 = vpop.f32.mrf.mxu0 }
 0xf53   :  { %1430 = vrot.lane.b32.xlu1 %v1313_v10, %s4412_s23 }
 0xf63   :  { %v1414_v12 = vpop.f32.mrf.mxu2 }
 0xf64   :  { %1438 = vrot.lane.b32.xlu2 %v1414_v12, %s4413_s26 }
 0xf76   :  { %v1367_v15 = vpop.xlane.xlu0 %1366 }
 0xf77   :  { %v1369_v35 = vsub.f32 %v1361_v23, %v1367_v15  ;;  %v3941_v15 = vld [vmem:[%s4348_s10 + $0x1] ss:$0 sm:$0xff] }
 0xf79   :  { %v1372_v19 = vmul.f32 1.442695, %v1369_v35 }
 0xf7b   :  { %3184 = vpow2.f32 %v1372_v19 }
 0xf7d   :  { %1265 = vmax.xlane.f32.xlu1 %v1264_v18 }
 0xf81   :  { %v3185_v20 = vpop.eup %3184 }
 0xf82   :  { %v1377_v21 = vsel %vm332_vm9, %v3185_v20, 0.0 }
 0xf8d   :  { %1378 = vadd.xlane.f32.xlu2 %v1377_v21  ;;  %v2656_v21 = vld [vmem:[%s4351_s13 + $0xd8] sm:$0xff] }
 0xfbe   :  { %v1439_v27 = vpop.permute.xlu2 %1438 }
 0xfc5   :  { %v1431_v32 = vpop.permute.xlu1 %1430 }
 0xfc6   :  { %v1446_v33 = vsel %vm718_vm12, %v1444_v31, %v1431_v32  ;;  %v2651_v31 = vld [vmem:[%s4351_s13 + $0xb0] sm:$0xff]  ;;  %v2650_v32 = vld [vmem:[%s4351_s13 + $0xa8] sm:$0xff] }
 0xfc7   :  { %v1448_v34 = vsel %vm721_vm13, %v1446_v33, %v1439_v27  ;;  %v2649_v27 = vld [vmem:[%s4351_s13 + $0xa0] sm:$0xff]  ;;  %v2648_v33 = vld [vmem:[%s4351_s13 + $0x98] sm:$0xff] }
 0xfc8   :  { %2634 = vmatmul.msk.f32.vlgmr.msrb.gmra.mxu3 %vm186_vm2, %v1448_v34  ;;  %v2647_v34 = vld [vmem:[%s4351_s13 + $0x90] sm:$0xff] }
 0xff0   :  { %v1266_v36 = vpop.xlane.xlu1 %1265 }
 0xff1   :  { %v1268_v39 = vsub.f32 %v1260_v16, %v1266_v36  ;;  %v2646_v36 = vld [vmem:[%s4351_s13 + $0x88] sm:$0xff] }
 0xff3   :  { %v1271_v40 = vmul.f32 1.442695, %v1268_v39  ;;  %v2645_v39 = vld [vmem:[%s4351_s13 + $0x80] sm:$0xff] }
 0xff5   :  { %3186 = vpow2.f32 %v1271_v40  ;;  %v3991_v40 = vld [vmem:[%s4350_s12 + $0x1] ss:$0 sm:$0xff] }
 0xffb   :  { %v3187_v41 = vpop.eup %3186 }
 0xffc   :  { %v1276_v42 = vsel %vm332_vm9, %v3187_v41, 0.0 }
 0xffd   :  { %1277 = vadd.xlane.f32.xlu0 %v1276_v42 }
0x1000   :  { %v1379_v44 = vpop.xlane.xlu2 %1378 }
0x1001   :  { %3188 = vrcp.f32 %v1379_v44 }
0x1007   :  { %v3189_v47 = vpop.eup %3188 }
0x1008   :  { %v1383_v17 = vmul.f32 %v3189_v47, %v3185_v20 }
0x100a   :  { %2628 = vmatmul.msk.f32.gmra.mxu2 %vm328_vm6, %v1383_v17 }
0x1011   :  { %1424 = vrot.lane.b32.xlu0 %v1215_v11, %s4411_s25  ;;  %v3934_v11 = vld [vmem:[%s4347_s9 + $0x1] ss:$0 sm:$0xff]  ;;  %s3244_s9 = smov [#allocation2]  }
0x104b   :  { %v1483_v6 = vpop.f32.mrf.mxu3 }
0x104c   :  { %v1484_v49 = vadd.f32 %v3895_v48, %v1483_v6 }
0x104e   :  { %v3899_v50 = vadd.f32 %v1484_v49, %v3726_v37 }
0x1050   :  { %v1495_v51 = vsel %vm186_vm2, %v3899_v50, 0.0 }
0x1051   :  { %1496 = vadd.xlane.f32.xlu2 %v1495_v51 }
0x1070   :  { %v1278_v52 = vpop.xlane.xlu0 %1277 }
0x1071   :  { %3190 = vrcp.f32 %v1278_v52 }
0x1077   :  { %v3191_v9 = vpop.eup %3190 }
0x1078   :  { %v1282_v53 = vmul.f32 %v3191_v9, %v3187_v41 }
0x107a   :  { %2621 = vmatmul.msk.f32.gmra.mxu0 %vm328_vm6, %v1282_v53 }
0x1083   :  { %v1425_v8 = vpop.permute.xlu0 %1424 }
0x1084   :  { %v1445_v38 = vsel %vm292_vm10, %v3832_v29, %v1425_v8  ;;  %v2657_v29 = vld [vmem:[%s4351_s13 + $0xe0] sm:$0xff]  ;;  %vm1655_vm10 = vcmask 1040384  }
0x1085   :  { %1626 = vmatpush.msra.mxu1 %v2657_v29  ;;  %v2698_v29 = vld [vmem:[%s4355_s17 + $0x60] sm:$0xf0] }
0x1087   :  { %1627 = vmatpush.msra.mxu1 %v2656_v21  ;;  %v2704_v21 = vld [vmem:[%s4355_s17 + $0x48] sm:$0xf] }
0x1089   :  { %1628 = vmatpush.msra.mxu1 %v2655_v22  ;;  %v3003_v22 = vld [vmem:[%s4355_s17 + $0x64] sm:$0xf0] }
0x108b   :  { %1629 = vmatpush.msra.mxu1 %v2654_v26 }
0x108d   :  { %v1417_v37 = vpop.f32.mrf.mxu2  ;;  %1630 = vmatpush.msra.mxu1 %v2653_v45  ;;  %v2705_v45 = vor.u32 %v3003_v22, %v2704_v21 }
0x108f   :  { %1631 = vmatpush.msra.mxu1 %v2652_v30  ;;  %1839 = vmatpush.bf16.msrb.mxu0 %v2705_v45  ;;  %v2664_v30 = vld [vmem:[%s4355_s17] sm:$0xf] }
0x1091   :  { %1632 = vmatpush.msra.mxu1 %v2651_v31  ;;  %v2994_v31 = vld [vmem:[%s4355_s17 + $0x1c] sm:$0xf0] }
0x1093   :  { %1633 = vmatpush.msra.mxu1 %v2650_v32  ;;  %v2990_v32 = vld [vmem:[%s4355_s17 + $0x4] sm:$0xf] }
0x1095   :  { %1634 = vmatpush.msra.mxu1 %v2649_v27  ;;  %v2665_v27 = vor.u32 %v2994_v31, %v2664_v30  ;;  %v2690_v30 = vld [vmem:[%s4355_s17 + $0x38] sm:$0xf0] }
0x1096   :  { %v3029_v31 = vld [vmem:[%s4357_s19 + $0xb8] sm:$0xff] }
0x1097   :  { %1635 = vmatpush.msra.mxu1 %v2648_v33  ;;  %v2666_v33 = vld [vmem:[%s4355_s17 + $0x20] sm:$0xf0] }
0x1099   :  { %1636 = vmatpush.msra.mxu1 %v2647_v34  ;;  %v2672_v34 = vld [vmem:[%s4355_s17 + $0x8] sm:$0xf] }
0x109b   :  { %1637 = vmatpush.msra.mxu1 %v2646_v36  ;;  %v2995_v36 = vld [vmem:[%s4355_s17 + $0x24] sm:$0xf0] }
0x109d   :  { %1638 = vmatpush.msra.mxu1 %v2645_v39  ;;  %v2669_v39 = vor.u32 %v2990_v32, %v2666_v33  ;;  %v3013_v32 = vld [vmem:[%s4357_s19 + $0x38] sm:$0xff] }
0x109e   :  { %v3021_v33 = vld [vmem:[%s4357_s19 + $0x78] sm:$0xff] }
0x10c4   :  { %v1497_v28 = vpop.xlane.xlu2 %1496 }
0x10c5   :  { %v1501_v54 = vmul.f32 %v1497_v28, %v3455_v46 }
0x10c7   :  { %v1503_v55 = vsub.f32 %v3899_v50, %v1501_v54 }
0x10c9   :  { %v1505_v56 = vmul.f32 %v1503_v55, %v1503_v55 }
0x10cb   :  { %v1507_v57 = vsel %vm186_vm2, %v1505_v56, 0.0 }
0x10cc   :  { %1508 = vadd.xlane.f32.xlu1 %v1507_v57 }
0x10e5   :  { %1440 = vrot.lane.b32.xlu1 %v1417_v37, %s4413_s26 }
0x10f7   :  { %v1316_v58 = vpop.f32.mrf.mxu0 }
0x10f8   :  { %1432 = vrot.lane.b32.xlu2 %v1316_v58, %s4412_s23 }
0x113f   :  { %v1509_v2 = vpop.xlane.xlu1 %1508 }
0x1140   :  { %v1513_v3 = vmul.f32 %v1509_v2, %v3455_v46 }
0x1142   :  { %v1515_v24 = vadd.f32 1e-06, %v1513_v3 }
0x1144   :  { %3192 = vrsqrt.f32 %v1515_v24  ;;  %vm1523_vm9 = vweird.f32 %v1515_v24 }
0x114a   :  { %v3193_v4 = vpop.eup %3192 }
0x114b   :  { %v1518_v5 = vmul.f32 %v3193_v4, %v1515_v24  ;;  %vm1524_vm6 = vweird.f32 %v3193_v4 }
0x114c   :  { %vm1525_vm11 = vmor %vm1523_vm9, %vm1524_vm6 }
0x114d   :  { %v1519_v7 = vmul.f32 %v3193_v4, %v1518_v5 }
0x114f   :  { %v1520_v25 = vmul.f32 0.5, %v1519_v7 }
0x1151   :  { %v1521_v23 = vsub.f32 1.5, %v1520_v25 }
0x1152   :  { %v1433_v12 = vpop.permute.xlu2 %1432 }
0x1153   :  { %v1522_v10 = vmul.f32 %v3193_v4, %v1521_v23  ;;  %v1447_v16 = vsel %vm718_vm12, %v1445_v38, %v1433_v12 }
0x1155   :  { %v1526_v13 = vsel %vm1525_vm11, %v3193_v4, %v1522_v10 }
0x1156   :  { %v1537_v14 = vmul.f32 %v1526_v13, %v1503_v55 }
0x1157   :  { %v1441_v35 = vpop.permute.xlu1 %1440 }
0x1158   :  { %v1542_v18 = vmul.f32 %v3934_v11, %v1537_v14  ;;  %v1449_v19 = vsel %vm721_vm13, %v1447_v16, %v1441_v35 }
0x1159   :  { %2635 = vmatmul.msk.f32.gmra.mxu3 %vm186_vm2, %v1449_v19  ;;  %v2696_v19 = vld [vmem:[%s4355_s17 + $0x40] sm:$0xf] }
0x115a   :  { %v1547_v20 = vadd.f32 %v3941_v15, %v1542_v18 }
0x115c   :  { %2643 = vmatmul.msk.f32.vlgmr.msra.gmra.mxu0 %vm186_vm2, %v1547_v20 }
0x11d9   :  { %v1582_v41 = vpop.f32.mrf.mxu0 }
0x11da   :  { %v1583_v42 = vadd.f32 %v3991_v40, %v1582_v41  ;;  %v2673_v41 = vor.u32 %v2995_v36, %v2672_v34  ;;  %v3012_v34 = vld [vmem:[%s4357_s19 + $0x30] sm:$0xff] }
0x11db   :  { %v3028_v36 = vld [vmem:[%s4357_s19 + $0xb0] sm:$0xff] }
0x11dc   :  { %v1588_v44 = vmul.f32 %v1583_v42, %v1583_v42  ;;  %v1486_v47 = vpop.f32.mrf.mxu3  ;;  %1840 = vmatpush.bf16.msrb.mxu0 %v2673_v41  ;;  %v3011_v41 = vld [vmem:[%s4357_s19 + $0x28] sm:$0xff] }
0x11dd   :  { %v1487_v17 = vadd.f32 %v3895_v48, %v1486_v47 }
0x11de   :  { %v1590_v6 = vmul.f32 %v1588_v44, %v1583_v42  ;;  %v3005_v44 = vld [vmem:[%s4355_s17 + $0x74] sm:$0xf0] }
0x11df   :  { %v1490_v49 = vadd.f32 %v1487_v17, %v3731_v43  ;;  %v3106_v43 = vld [vmem:[%s4352_s14 + $0x1] ss:$0 sm:$0xff] }
0x11e0   :  { %v1592_v51 = vmul.f32 0.044715, %v1590_v6  ;;  %v2688_v6 = vld [vmem:[%s4355_s17 + $0x18] sm:$0xf] }
0x11e1   :  { %v1498_v52 = vsel %vm190_vm1, %v1490_v49, 0.0 }
0x11e2   :  { %v1594_v9 = vadd.f32 %v1592_v51, %v1583_v42  ;;  %1499 = vadd.xlane.f32.xlu0 %v1498_v52 }
0x11e4   :  { %v1596_v53 = vmul.f32 0.7978846, %v1594_v9 }
0x11e6   :  { %3194 = vtanh.f32 %v1596_v53 }
0x11ec   :  { %v3195_v28 = vpop.eup %3194 }
0x11ed   :  { %v1600_v54 = vadd.f32 1.0, %v3195_v28 }
0x11ef   :  { %v1602_v55 = vmul.f32 0.5, %v1600_v54  ;;  %v2999_v54 = vld [vmem:[%s4355_s17 + $0x4c] sm:$0xf] }
0x11f1   :  { %v1604_v56 = vmul.f32 %v1602_v55, %v1583_v42  ;;  %v2720_v42 = vld [vmem:[%s4355_s17 + $0x58] sm:$0xf]  ;;  %v2706_v55 = vld [vmem:[%s4355_s17 + $0x68] sm:$0xf0] }
0x11f2   :  { %v2721_v47 = vor.u32 %v3005_v44, %v2720_v42  ;;  %v3027_v42 = vld [vmem:[%s4357_s19 + $0xa8] sm:$0xff] }
0x11f3   :  { %1639 = vmatmul.f32.vlgmr.msra.gmra.mxu1 %v1604_v56  ;;  %v2712_v56 = vld [vmem:[%s4355_s17 + $0x50] sm:$0xf]  ;;  %v3019_v44 = vld [vmem:[%s4357_s19 + $0x68] sm:$0xff] }
0x11f4   :  { %1891 = vmatpush.bf16.msrb.mxu1 %v2721_v47  ;;  %v3010_v47 = vld [vmem:[%s4357_s19 + $0x20] sm:$0xff] }
0x1255   :  { %v1500_v57 = vpop.xlane.xlu0 %1499 }
0x1256   :  { %v1502_v37 = vmul.f32 %v1500_v57, %v3455_v46  ;;  %v2709_v57 = vor.u32 %v2999_v54, %v2706_v55  ;;  %v3024_v54 = vld [vmem:[%s4357_s19 + $0x90] sm:$0xff] }
0x1257   :  { %v3016_v55 = vld [vmem:[%s4357_s19 + $0x50] sm:$0xff] }
0x1258   :  { %v1504_v58 = vsub.f32 %v1490_v49, %v1502_v37  ;;  %v2997_v49 = vld [vmem:[%s4355_s17 + $0x34] sm:$0xf0]  ;;  %v3004_v37 = vld [vmem:[%s4355_s17 + $0x6c] sm:$0xf0] }
0x1259   :  { %v2689_v52 = vor.u32 %v2997_v49, %v2688_v6  ;;  %v3018_v6 = vld [vmem:[%s4357_s19 + $0x60] sm:$0xff]  ;;  %v3037_v49 = vld [vmem:[%s4357_s19 + $0xf8] sm:$0xff] }
0x125a   :  { %v1506_v48 = vmul.f32 %v1504_v58, %v1504_v58 }
0x125b   :  { %1892 = vmatpush.bf16.msrb.mxu1 %v2689_v52  ;;  %v3025_v52 = vld [vmem:[%s4357_s19 + $0x98] sm:$0xff] }
0x125c   :  { %v1510_v59 = vsel %vm190_vm1, %v1506_v48, 0.0  ;;  %v2713_v48 = vor.u32 %v3004_v37, %v2712_v56  ;;  %v3035_v56 = vld [vmem:[%s4357_s19 + $0xe8] sm:$0xff] }
0x125d   :  { %1511 = vadd.xlane.f32.xlu2 %v1510_v59  ;;  %v3015_v37 = vld [vmem:[%s4357_s19 + $0x48] sm:$0xff] }
0x125f   :  { %2461 = vmatpush.bf16.msra.mxu1 %v3029_v31 }
0x1263   :  { %2462 = vmatpush.bf16.msra.mxu1 %v3028_v36 }
0x1267   :  { %2463 = vmatpush.bf16.msra.mxu1 %v3027_v42 }
0x1270   :  { %v1640_v60 = vpop.f32.mrf.mxu1 }
0x1271   :  { %v1645_v61 = vadd.f32 %v1640_v60, %v3899_v50  ;;  %v2674_v60 = vld [vmem:[%s4355_s17 + $0x28] sm:$0xf0] }
0x1273   :  { %v1651_v62 = vadd.f32 %v3106_v43, %v1645_v61  ;;  %v2991_v43 = vld [vmem:[%s4355_s17 + $0xc] sm:$0xf]  ;;  %v2680_v61 = vld [vmem:[%s4355_s17 + $0x10] sm:$0xf] }
0x1275   :  { %v1653_v63 = vrot.slane %v1651_v62, 4 }
0x1277   :  { %v1656_v0 = vsel %vm1655_vm10, %v1651_v62, %v1653_v63  ;;  %v2677_v63 = vor.u32 %v2991_v43, %v2674_v60  ;;  %v3061_v43 = vld [vmem:[%s4357_s19 + $0x1b8] sm:$0xff] }
0x1278   :  { %v1659_v1 = vsel %vm190_vm1, %v1656_v0, 0.0  ;;  %v3045_v60 = vld [vmem:[%s4357_s19 + $0x138] sm:$0xff] }
0x1279   :  { %1660 = vadd.xlane.f32.xlu1 %v1659_v1  ;;  %v2992_v1 = vld [vmem:[%s4355_s17 + $0x14] sm:$0xf] }
0x12d0   :  { %v1512_v2 = vpop.xlane.xlu2 %1511 }
0x12d1   :  { %v1514_v3 = vmul.f32 %v1512_v2, %v3455_v46  ;;  %v2682_v2 = vld [vmem:[%s4355_s17 + $0x30] sm:$0xf0] }
0x12d3   :  { %v1516_v24 = vadd.f32 1e-06, %v1514_v3 }
0x12d5   :  { %3196 = vrsqrt.f32 %v1516_v24  ;;  %vm1533_vm13 = vweird.f32 %v1516_v24 }
0x12db   :  { %v3197_v4 = vpop.eup %3196 }
0x12dc   :  { %v1528_v5 = vmul.f32 %v3197_v4, %v1516_v24  ;;  %vm1534_vm12 = vweird.f32 %v3197_v4  ;;  %v2685_v24 = vor.u32 %v2992_v1, %v2682_v2  ;;  %v3044_v1 = vld [vmem:[%s4357_s19 + $0x130] sm:$0xff] }
0x12dd   :  { %vm1535_vm4 = vmor %vm1533_vm13, %vm1534_vm12  ;;  %v3052_v2 = vld [vmem:[%s4357_s19 + $0x170] sm:$0xff] }
0x12de   :  { %v1529_v7 = vmul.f32 %v3197_v4, %v1528_v5 }
0x12e0   :  { %v1530_v25 = vmul.f32 0.5, %v1529_v7 }
0x12e2   :  { %v1531_v23 = vsub.f32 1.5, %v1530_v25 }
0x12e4   :  { %v1532_v8 = vmul.f32 %v3197_v4, %v1531_v23 }
0x12e6   :  { %v1536_v50 = vsel %vm1535_vm4, %v3197_v4, %v1532_v8 }
0x12e7   :  { %v1538_v10 = vmul.f32 %v1536_v50, %v1504_v58  ;;  %v2714_v58 = vld [vmem:[%s4355_s17 + $0x70] sm:$0xf0] }
0x12e9   :  { %v1543_v12 = vmul.f32 %v3934_v11, %v1538_v10  ;;  %v3002_v11 = vld [vmem:[%s4355_s17 + $0x5c] sm:$0xf0] }
0x12ea   :  { %v2697_v20 = vor.u32 %v3002_v11, %v2696_v19 }
0x12eb   :  { %v1548_v13 = vadd.f32 %v3941_v15, %v1543_v12  ;;  %v2998_v15 = vld [vmem:[%s4355_s17 + $0x44] sm:$0xf] }
0x12ec   :  { %v1661_v38 = vpop.xlane.xlu1 %1660  ;;  %v2701_v26 = vor.u32 %v2998_v15, %v2698_v29  ;;  %1813 = vmatpush.bf16.msrb.mxu2 %v2697_v20  ;;  %v3001_v20 = vld [vmem:[%s4355_s17 + $0x5c] sm:$0xf] }
0x12ed   :  { %v1662_v14 = vmul.f32 %v1661_v38, %v3455_v46  ;;  %2644 = vmatmul.msk.f32.gmra.mxu0 %vm186_vm2, %v1548_v13  ;;  %v3107_v13 = vld [vmem:[%s4353_s15] ss:$0 sm:$0xff]  ;;  %v2722_v29 = vld [vmem:[%s4355_s17 + $0x78] sm:$0xf0]  ;;  %s2545_s15 = sshll.u32 %s3244_s9, 4  ;;  %s2546_s15 = int_to_ptr.vmem [resolvable:$true] %s2545_s15 }
0x12ee   :  { %1826 = vmatpush.bf16.msra.mxu3 %v2701_v26  ;;  %v2725_v26 = vor.u32 %v3001_v20, %v2722_v29  ;;  %v3047_v20 = vld [vmem:[%s4357_s19 + $0x148] sm:$0xff] }
0x12ef   :  { %v4009_v16 = vsub.f32 %v1656_v0, %v1662_v14  ;;  %v2996_v0 = vld [vmem:[%s4355_s17 + $0x2c] sm:$0xf0]  ;;  %v3067_v29 = vld [vmem:[%s4357_s19 + $0x1e8] sm:$0xff] }
0x12f0   :  { %1814 = vmatpush.bf16.msrb.mxu2 %v2665_v27  ;;  %v2681_v3 = vor.u32 %v2996_v0, %v2680_v61  ;;  %v3053_v61 = vld [vmem:[%s4357_s19 + $0x178] sm:$0xff] }
0x12f1   :  { %v1664_v35 = vmul.f32 %v4009_v16, %v4009_v16  ;;  %v3033_v0 = vld [vmem:[%s4357_s19 + $0xd8] sm:$0xff] }
0x12f2   :  { %1827 = vmatpush.bf16.msra.mxu3 %v2669_v39  ;;  %v3020_v39 = vld [vmem:[%s4357_s19 + $0x70] sm:$0xff] }
0x12f3   :  { %v1665_v18 = vsel %vm190_vm1, %v1664_v35, 0.0  ;;  %v3108_v35 = vld [vmem:[%s4354_s16] ss:$0 sm:$0xff] }
0x12f4   :  { %1666 = vadd.xlane.f32.xlu0 %v1665_v18  ;;  %1852 = vmatpush.bf16.msra.mxu2 %v2709_v57  ;;  %v3023_v57 = vld [vmem:[%s4357_s19 + $0x88] sm:$0xff] }
0x12f6   :  { %1865 = vmatpush.bf16.msrb.mxu3 %v2713_v48  ;;  %v3022_v48 = vld [vmem:[%s4357_s19 + $0x80] sm:$0xff] }
0x12f8   :  { %1853 = vmatpush.bf16.msra.mxu2 %v2677_v63  ;;  %v3059_v63 = vld [vmem:[%s4357_s19 + $0x1a8] sm:$0xff] }
0x12fa   :  { %1866 = vmatpush.bf16.msrb.mxu3 %v2681_v3  ;;  %v3058_v3 = vld [vmem:[%s4357_s19 + $0x1a0] sm:$0xff] }
0x1367   :  { %v1667_v17 = vpop.xlane.xlu0 %1666 }
0x1368   :  { %v1668_v51 = vmul.f32 %v1667_v17, %v3455_v46  ;;  %v3026_v17 = vld [vmem:[%s4357_s19 + $0xa0] sm:$0xff] }
0x1369   :  { %2464 = vmatpush.bf16.msra.mxu1 %v3026_v17 }
0x136a   :  { %v1669_v9 = vadd.f32 1e-06, %v1668_v51  ;;  %v1585_v53 = vpop.f32.mrf.mxu0  ;;  %v3009_v51 = vld [vmem:[%s4357_s19 + $0x18] sm:$0xff] }
0x136b   :  { %v1586_v28 = vadd.f32 %v3991_v40, %v1585_v53  ;;  %v3000_v40 = vld [vmem:[%s4355_s17 + $0x54] sm:$0xf] }
0x136c   :  { %3198 = vrsqrt.f32 %v1669_v9  ;;  %v2717_v59 = vor.u32 %v3000_v40, %v2714_v58  ;;  %vm1676_vm5 = vweird.f32 %v1669_v9  ;;  %v3036_v53 = vld [vmem:[%s4357_s19 + $0xf0] sm:$0xff]  ;;  %v3034_v40 = vld [vmem:[%s4357_s19 + $0xe0] sm:$0xff] }
0x136d   :  { %v1589_v46 = vmul.f32 %v1586_v28, %v1586_v28  ;;  %2465 = vmatpush.bf16.msra.mxu1 %v3025_v52  ;;  %v3006_v58 = vld [vmem:[%s4357_s19] sm:$0xff] }
0x136e   :  { %1878 = vmatpush.bf16.msra.mxu0 %v2717_v59  ;;  %v3014_v59 = vld [vmem:[%s4357_s19 + $0x40] sm:$0xff] }
0x136f   :  { %v1591_v62 = vmul.f32 %v1589_v46, %v1586_v28  ;;  %v3007_v46 = vld [vmem:[%s4357_s19 + $0x8] sm:$0xff] }
0x1371   :  { %v1593_v4 = vmul.f32 0.044715, %v1591_v62  ;;  %2466 = vmatpush.bf16.msra.mxu1 %v3024_v54  ;;  %v3060_v62 = vld [vmem:[%s4357_s19 + $0x1b0] sm:$0xff] }
0x1372   :  { %v3199_v5 = vpop.eup %3198  ;;  %1879 = vmatpush.bf16.msra.mxu0 %v2685_v24  ;;  %v3032_v24 = vld [vmem:[%s4357_s19 + $0xd0] sm:$0xff] }
0x1373   :  { %v1671_v7 = vmul.f32 %v3199_v5, %v1669_v9  ;;  %v1595_v25 = vadd.f32 %v1593_v4, %v1586_v28  ;;  %vm1677_vm1 = vweird.f32 %v3199_v5  ;;  %v3017_v9 = vld [vmem:[%s4357_s19 + $0x58] sm:$0xff]  ;;  %v3043_v4 = vld [vmem:[%s4357_s19 + $0x128] sm:$0xff] }
0x1374   :  { %vm1678_vm7 = vmor %vm1676_vm5, %vm1677_vm1 }
0x1375   :  { %v1672_v23 = vmul.f32 %v3199_v5, %v1671_v7  ;;  %v1597_v8 = vmul.f32 0.7978846, %v1595_v25  ;;  %2467 = vmatpush.bf16.msra.mxu1 %v3023_v57  ;;  %v3057_v7 = vld [vmem:[%s4357_s19 + $0x198] sm:$0xff]  ;;  %v3031_v25 = vld [vmem:[%s4357_s19 + $0xc8] sm:$0xff] }
0x1377   :  { %v1673_v50 = vmul.f32 0.5, %v1672_v23  ;;  %3200 = vtanh.f32 %v1597_v8  ;;  %v3042_v23 = vld [vmem:[%s4357_s19 + $0x120] sm:$0xff] }
0x1378   :  { %v3050_v8 = vld [vmem:[%s4357_s19 + $0x160] sm:$0xff] }
0x1379   :  { %v1674_v10 = vsub.f32 1.5, %v1673_v50  ;;  %2468 = vmatpush.bf16.msra.mxu1 %v3022_v48  ;;  %v3056_v50 = vld [vmem:[%s4357_s19 + $0x190] sm:$0xff] }
0x137b   :  { %v1675_v12 = vmul.f32 %v3199_v5, %v1674_v10  ;;  %v3030_v10 = vld [vmem:[%s4357_s19 + $0xc0] sm:$0xff] }
0x137d   :  { %v3201_v38 = vpop.eup %3200  ;;  %v1679_v14 = vsel %vm1678_vm7, %v3199_v5, %v1675_v12  ;;  %v3051_v5 = vld [vmem:[%s4357_s19 + $0x168] sm:$0xff]  ;;  %v3041_v12 = vld [vmem:[%s4357_s19 + $0x118] sm:$0xff] }
0x137e   :  { %v1680_v18 = vmul.f32 %v1679_v14, %v4009_v16  ;;  %v1601_v19 = vadd.f32 1.0, %v3201_v38  ;;  %v2993_v16 = vld [vmem:[%s4355_s17 + $0x1c] sm:$0xf]  ;;  %v3055_v14 = vld [vmem:[%s4357_s19 + $0x188] sm:$0xff] }
0x137f   :  { %v2693_v27 = vor.u32 %v2993_v16, %v2690_v30  ;;  %v3069_v38 = vld [vmem:[%s4357_s19 + $0x1f8] sm:$0xff] }
0x1380   :  { %v1684_v11 = vmul.f32 %v3107_v13, %v1680_v18  ;;  %v1603_v15 = vmul.f32 0.5, %v1601_v19  ;;  %v3049_v13 = vld [vmem:[%s4357_s19 + $0x158] sm:$0xff]  ;;  %v3048_v18 = vld [vmem:[%s4357_s19 + $0x150] sm:$0xff] }
0x1381   :  { %v3068_v19 = vld [vmem:[%s4357_s19 + $0x1f0] sm:$0xff]  ;;  %v3065_v16 = vld [vmem:[%s4357_s19 + $0x1d8] sm:$0xff] }
0x1382   :  { %v1688_v21 = vadd.f32 %v3108_v35, %v1684_v11  ;;  %v1605_v22 = vmul.f32 %v1603_v15, %v1586_v28  ;;  %v3008_v28 = vld [vmem:[%s4357_s19 + $0x10] sm:$0xff]  ;;  %v3054_v11 = vld [vmem:[%s4357_s19 + $0x180] sm:$0xff]  ;;  %v3039_v15 = vld [vmem:[%s4357_s19 + $0x108] sm:$0xff] }
0x1383   :  { %v3040_v35 = vld [vmem:[%s4357_s19 + $0x110] sm:$0xff] }
0x1384   :  { %v4113_v45 = vpack.c.bf16 %v1688_v21, %v1688_v21  ;;  %1642 = vmatmul.f32.gmra.mxu1 %v1605_v22  ;;  %v3038_v21 = vld [vmem:[%s4357_s19 + $0x100] sm:$0xff] }
0x1385   :  { %v3046_v22 = vld [vmem:[%s4357_s19 + $0x140] sm:$0xff] }
0x1386   :  { %2726 = vmatmul.msk.bf16.vlgmr.msrb.gmra.mxu2 %vm186_vm2, %v4113_v45  ;;  %2727 = vmatmul.msk.bf16.vlgmr.msra.gmra.mxu3 %vm186_vm2, %v4113_v45 }
0x1387   :  { %2728 = vmatmul.msk.bf16.vlgmr.msrb.gmra.mxu0 %vm186_vm2, %v4113_v45  ;;  %1904 = vmatpush.bf16.msrb.mxu2 %v2725_v26  ;;  %v3066_v26 = vld [vmem:[%s4357_s19 + $0x1e0] sm:$0xff] }
0x1388   :  { %2435 = vmatpush.bf16.msra.mxu3 %v3013_v32  ;;  %2448 = vmatpush.bf16.msrb.mxu0 %v3021_v33  ;;  %v3064_v32 = vld [vmem:[%s4357_s19 + $0x1d0] sm:$0xff] }
0x138b   :  { %1905 = vmatpush.bf16.msrb.mxu2 %v2693_v27 }
0x138c   :  { %2732 = vmatmul.msk.bf16.vlgmr.msrb.gmra.mxu1 %vm186_vm2, %v4113_v45  ;;  %2436 = vmatpush.bf16.msra.mxu3 %v3012_v34  ;;  %v3063_v34 = vld [vmem:[%s4357_s19 + $0x1c8] sm:$0xff] }
0x138d   :  { %2449 = vmatpush.bf16.msrb.mxu0 %v3020_v39  ;;  %2513 = vmatpush.bf16.msrb.mxu1 %v3061_v43 }
0x1390   :  { %2437 = vmatpush.bf16.msra.mxu3 %v3011_v41 }
0x1391   :  { %2450 = vmatpush.bf16.msrb.mxu0 %v3019_v44  ;;  %2514 = vmatpush.bf16.msrb.mxu1 %v3060_v62 }
0x1394   :  { %2438 = vmatpush.bf16.msra.mxu3 %v3010_v47 }
0x1395   :  { %2451 = vmatpush.bf16.msrb.mxu0 %v3018_v6  ;;  %2515 = vmatpush.bf16.msrb.mxu1 %v3059_v63 }
0x1396   :  { %2729 = vmatmul.msk.bf16.vlgmr.msra.gmra.mxu2 %vm186_vm2, %v4113_v45  ;;  %2730 = vmatmul.msk.bf16.vlgmr.msrb.gmra.mxu3 %vm186_vm2, %v4113_v45 }
0x1397   :  { %2731 = vmatmul.msk.bf16.vlgmr.msra.gmra.mxu0 %vm186_vm2, %v4113_v45  ;;  %2474 = vmatpush.bf16.msra.mxu2 %v3037_v49  ;;  %v3062_v49 = vld [vmem:[%s4357_s19 + $0x1c0] sm:$0xff] }
0x1398   :  { %2439 = vmatpush.bf16.msra.mxu3 %v3009_v51 }
0x1399   :  { %2452 = vmatpush.bf16.msrb.mxu0 %v3017_v9  ;;  %2516 = vmatpush.bf16.msrb.mxu1 %v3058_v3 }
0x139b   :  { %2475 = vmatpush.bf16.msra.mxu2 %v3036_v53 }
0x139c   :  { %2440 = vmatpush.bf16.msra.mxu3 %v3008_v28 }
0x139d   :  { %2453 = vmatpush.bf16.msrb.mxu0 %v3016_v55  ;;  %2517 = vmatpush.bf16.msrb.mxu1 %v3057_v7 }
0x139f   :  { %2476 = vmatpush.bf16.msra.mxu2 %v3035_v56 }
0x13a0   :  { %2441 = vmatpush.bf16.msra.mxu3 %v3007_v46 }
0x13a1   :  { %2454 = vmatpush.bf16.msrb.mxu0 %v3015_v37  ;;  %2518 = vmatpush.bf16.msrb.mxu1 %v3056_v50 }
0x13a3   :  { %2477 = vmatpush.bf16.msra.mxu2 %v3034_v40 }
0x13a4   :  { %2442 = vmatpush.bf16.msra.mxu3 %v3006_v58 }
0x13a5   :  { %2455 = vmatpush.bf16.msrb.mxu0 %v3014_v59  ;;  %2519 = vmatpush.bf16.msrb.mxu1 %v3055_v14 }
0x13a6   :  { %2733 = vmatmul.msk.bf16.vlgmr.msrb.gmra.mxu2 %vm186_vm2, %v4113_v45  ;;  %v1706_v45 = vld [vmem:[%s4356_s18] sm:$0xff] }
0x13a7   :  { %2478 = vmatpush.bf16.msra.mxu2 %v3033_v0  ;;  %v1710_v31 = vperm.slane %v1706_v45, 2  ;;  %v1708_v36 = vperm.slane %v1706_v45, 0  ;;  %v1709_v39 = vperm.slane %v1706_v45, 1  ;;  %v1714_v53 = vperm.slane %v1706_v45, 6 }
0x13a8   :  { %2487 = vmatpush.bf16.msrb.mxu3 %v3045_v60  ;;  %v1713_v57 = vperm.slane %v1706_v45, 5  ;;  %v1711_v37 = vperm.slane %v1706_v45, 3  ;;  %v1712_v40 = vperm.slane %v1706_v45, 4 }
0x13a9   :  { %2500 = vmatpush.bf16.msra.mxu0 %v3053_v61  ;;  %2520 = vmatpush.bf16.msrb.mxu1 %v3054_v11 }
0x13ab   :  { %2479 = vmatpush.bf16.msra.mxu2 %v3032_v24  ;;  %v1715_v24 = vperm.slane %v1706_v45, 7 }
0x13ac   :  { %2488 = vmatpush.bf16.msrb.mxu3 %v3044_v1 }
0x13ad   :  { %2501 = vmatpush.bf16.msra.mxu0 %v3052_v2 }
0x13af   :  { %2480 = vmatpush.bf16.msra.mxu2 %v3031_v25 }
0x13b0   :  { %2489 = vmatpush.bf16.msrb.mxu3 %v3043_v4 }
0x13b1   :  { %2502 = vmatpush.bf16.msra.mxu0 %v3051_v5 }
0x13b3   :  { %2481 = vmatpush.bf16.msra.mxu2 %v3030_v10 }
0x13b4   :  { %2490 = vmatpush.bf16.msrb.mxu3 %v3042_v23 }
0x13b5   :  { %2503 = vmatpush.bf16.msra.mxu0 %v3050_v8 }
0x13b7   :  { %2526 = vmatpush.bf16.msrb.mxu2 %v3069_v38 }
0x13b8   :  { %2491 = vmatpush.bf16.msrb.mxu3 %v3041_v12 }
0x13b9   :  { %2504 = vmatpush.bf16.msra.mxu0 %v3049_v13  ;;  %v3109_v13 = vld [vmem:[%s4358_s20] ss:$0 sm:$0xff]  ;;  %s2547_s20 = sshll.u32 %s4359_s21, 4  ;;  %s2548_s20 = int_to_ptr.hbm [resolvable:$true] %s2547_s20 }
0x13bb   :  { %2527 = vmatpush.bf16.msrb.mxu2 %v3068_v19 }
0x13bc   :  { %2492 = vmatpush.bf16.msrb.mxu3 %v3040_v35 }
0x13bd   :  { %2505 = vmatpush.bf16.msra.mxu0 %v3048_v18 }
0x13bf   :  { %2528 = vmatpush.bf16.msrb.mxu2 %v3067_v29 }
0x13c0   :  { %2493 = vmatpush.bf16.msrb.mxu3 %v3039_v15 }
0x13c1   :  { %2506 = vmatpush.bf16.msra.mxu0 %v3047_v20 }
0x13c3   :  { %2529 = vmatpush.bf16.msrb.mxu2 %v3066_v26 }
0x13c4   :  { %2494 = vmatpush.bf16.msrb.mxu3 %v3038_v21 }
0x13c5   :  { %2507 = vmatpush.bf16.msra.mxu0 %v3046_v22 }
0x13c7   :  { %2530 = vmatpush.bf16.msrb.mxu2 %v3065_v16 }
0x13cb   :  { %2531 = vmatpush.bf16.msrb.mxu2 %v3064_v32 }
0x13cf   :  { %2532 = vmatpush.bf16.msrb.mxu2 %v3063_v34 }
0x13d3   :  { %2533 = vmatpush.bf16.msrb.mxu2 %v3062_v49 }
0x1401   :  { %v1643_v30 = vpop.f32.mrf.mxu1 }
0x1404   :  { %v1842_v27 = vpop.f32.mrf.mxu0 }
0x1405   :  { %v1843_v33 = vadd.f32 %v1842_v27, %v1710_v31 }
0x1407   :  { %v1913_v41 = vpack.c.bf16 %v1843_v33, %v1843_v33 }
0x1409   :  { %2469 = vmatmul.bf16.vlgmr.msra.gmra.mxu1 %v1913_v41  ;;  %v1816_v42 = vpop.f32.mrf.mxu2  ;;  %v1829_v44 = vpop.f32.mrf.mxu3 }
0x140a   :  { %v1817_v47 = vadd.f32 %v1816_v42, %v1708_v36  ;;  %v1830_v17 = vadd.f32 %v1829_v44, %v1709_v39  ;;  %v1894_v6 = vpop.f32.mrf.mxu1 }
0x140b   :  { %v1895_v56 = vadd.f32 %v1894_v6, %v1714_v53 }
0x140c   :  { %v1911_v51 = vpack.c.bf16 %v1817_v47, %v1817_v47  ;;  %v1912_v52 = vpack.c.bf16 %v1830_v17, %v1830_v17  ;;  %v1844_v9 = vpop.f32.mrf.mxu0 }
0x140d   :  { %v1917_v58 = vpack.c.bf16 %v1895_v56, %v1895_v56 }
0x140e   :  { %2443 = vmatmul.bf16.vlgmr.msra.gmra.mxu3 %v1911_v51  ;;  %2456 = vmatmul.bf16.vlgmr.msrb.gmra.mxu0 %v1912_v52 }
0x1411   :  { %v1818_v28 = vpop.f32.mrf.mxu2  ;;  %v1831_v54 = vpop.f32.mrf.mxu3 }
0x1412   :  { %v1896_v55 = vpop.f32.mrf.mxu1 }
0x1414   :  { %v1881_v46 = vpop.f32.mrf.mxu0 }
0x1415   :  { %v1882_v48 = vadd.f32 %v1881_v46, %v1713_v57 }
0x1417   :  { %v1916_v1 = vpack.c.bf16 %v1882_v48, %v1882_v48 }
0x1419   :  { %2521 = vmatmul.bf16.vlgmr.msrb.gmra.mxu1 %v1917_v58  ;;  %v1855_v59 = vpop.f32.mrf.mxu2  ;;  %v1868_v43 = vpop.f32.mrf.mxu3 }
0x141a   :  { %v1856_v60 = vadd.f32 %v1855_v59, %v1711_v37  ;;  %v1869_v61 = vadd.f32 %v1868_v43, %v1712_v40 }
0x141c   :  { %v1914_v62 = vpack.c.bf16 %v1856_v60, %v1856_v60  ;;  %v1915_v63 = vpack.c.bf16 %v1869_v61, %v1869_v61  ;;  %v1883_v0 = vpop.f32.mrf.mxu0 }
0x141e   :  { %2482 = vmatmul.bf16.vlgmr.msra.gmra.mxu2 %v1914_v62  ;;  %2495 = vmatmul.bf16.vlgmr.msrb.gmra.mxu3 %v1915_v63 }
0x141f   :  { %2508 = vmatmul.bf16.vlgmr.msra.gmra.mxu0 %v1916_v1 }
0x1421   :  { %v1857_v2 = vpop.f32.mrf.mxu2  ;;  %v1870_v3 = vpop.f32.mrf.mxu3 }
0x1429   :  { %v1907_v4 = vpop.f32.mrf.mxu2 }
0x142a   :  { %v1908_v5 = vadd.f32 %v1907_v4, %v1715_v24 }
0x142c   :  { %v1918_v7 = vpack.c.bf16 %v1908_v5, %v1908_v5 }
0x142e   :  { %2534 = vmatmul.bf16.vlgmr.msrb.gmra.mxu2 %v1918_v7 }
0x1431   :  { %v1909_v25 = vpop.f32.mrf.mxu2 }
0x1486   :  { %v2470_v23 = vpop.f32.mrf.mxu1 }
0x148b   :  { %v2457_v8 = vpop.f32.mrf.mxu0 }
0x148e   :  { %v2472_v50 = vpop.f32.mrf.mxu1 }
0x1491   :  { %v2444_v10 = vpop.f32.mrf.mxu3 }
0x1492   :  { %v2445_v35 = vadd.f32 %v3109_v13, %v2444_v10 }
0x1493   :  { %v2459_v12 = vpop.f32.mrf.mxu0 }
0x1494   :  { %v2458_v19 = vadd.f32 %v2457_v8, %v2445_v35 }
0x1496   :  { %v2522_v38 = vpop.f32.mrf.mxu1  ;;  %v2471_v29 = vadd.f32 %v2470_v23, %v2458_v19 }
0x1499   :  { %v2446_v14 = vpop.f32.mrf.mxu3 }
0x149c   :  { %v2509_v18 = vpop.f32.mrf.mxu0 }
0x149e   :  { %v2524_v11 = vpop.f32.mrf.mxu1 }
0x14a1   :  { %v2483_v15 = vpop.f32.mrf.mxu2  ;;  %v2496_v20 = vpop.f32.mrf.mxu3 }
0x14a2   :  { %v2484_v21 = vadd.f32 %v2483_v15, %v2471_v29 }
0x14a4   :  { %v2511_v22 = vpop.f32.mrf.mxu0  ;;  %v2497_v26 = vadd.f32 %v2496_v20, %v2484_v21 }
0x14a6   :  { %v2510_v30 = vadd.f32 %v2509_v18, %v2497_v26 }
0x14a8   :  { %v2523_v31 = vadd.f32 %v2522_v38, %v2510_v30 }
0x14a9   :  { %v2485_v45 = vpop.f32.mrf.mxu2  ;;  %v2498_v16 = vpop.f32.mrf.mxu3 }
0x14b1   :  { %v2535_v32 = vpop.f32.mrf.mxu2 }
0x14b2   :  { %v2536_v27 = vadd.f32 %v2535_v32, %v2523_v31 }
0x14b4   :  { %2539 = vst [vmem:[#allocation2] sm:$0x3] %v2536_v27 }
0x14b5   :  { %2550 = dma.vmem_to_hbm [thread:$0]  %s2546_s15, 32, %s2548_s20, [#allocation3]  }
0x14b9   :  { %v2537_v33 = vpop.f32.mrf.mxu2 }
0x14ba   :  { %3226 = dma.done.wait [#allocation3], 32  }
0x14bb   :  { %3227 = vsyncadd [#allocation3], 4294967264 }
0x14bc   :  { %2555 = vsyncpa [#allocation3], 1 }

</bundles_post_ra>
